<compile_context>
chip_gen: v5e
topology: v5e:2x2
jax: 0.10.0
libtpu: 0.0.40
codegen_flags: <defaults>
</compile_context>

<pallas_src>
import functools

import jax
import jax.numpy as jnp
from jax.experimental import pallas as pl
from jax.experimental.pallas import tpu as pltpu

_EPS = 1e-5      # nn.GroupNorm default eps
_LANE = 128      # TPU lane width


def _round_up(x, m):
    return (x + m - 1) // m * m


def _pick_batch_block(n, requested=None):
    # Images per grid step: amortize per-step overhead / feed the MXU a taller M,
    # but keep >= 2 grid steps when possible so megacore can shard the batch.
    if requested is not None:
        assert n % requested == 0, "batch_block must divide N"
        return requested
    best = 1
    for b in range(2, min(n, 8) + 1):
        if n % b == 0 and n // b >= 2:
            best = b
    return best


# ------------------------------ kernel helpers ------------------------------ #

def _gn(y2d, g, b, B, HW):
    # Per-image, per-channel instance norm (== GroupNorm(C, C)) over the spatial
    # extent; single-pass statistics (E[x^2] - mu^2), biased variance, f32.
    C = y2d.shape[-1]
    y = y2d.reshape(B, HW, C)
    mu = jnp.mean(y, axis=1, keepdims=True)
    ms = jnp.mean(y * y, axis=1, keepdims=True)
    var = jnp.maximum(ms - mu * mu, 0.0)
    yn = (y - mu) * jax.lax.rsqrt(var + _EPS) * g + b
    return yn.reshape(B * HW, C)


# --------------------------------- kernel ------------------------------------ #

def _block_kernel(B, Ho, Wo, proj, *refs):
    # x_ref:   (B, Ho*Wo, K1p)   im2col of x (9 taps concatenated along K, padded)
    # w1_ref:  (K1p, Pp)         conv1 weights in im2col layout
    # w2_ref:  (9, Pp, Pp)       conv2 weights, one (Pp, Pp) slab per tap
    # wsc_ref: (K1p, Pp)         shortcut (1x1 conv or identity) embedded at the
    #                            center-tap rows of the im2col K axis
    # g*/b*:   (1, Pp) f32       GroupNorm affine (zero on padded channels)
    # o_ref:   (B, Ho*Wo, Pp)    output (compute dtype)
    # o1_ref:  (B, Ho+2, Wo+2, Pp) VMEM scratch: out1 with a 1-pixel zero halo
    if proj:
        (x_ref, w1_ref, g1_ref, b1_ref, w2_ref, g2_ref, b2_ref,
         wsc_ref, gsc_ref, bsc_ref, o_ref, o1_ref) = refs
    else:
        (x_ref, w1_ref, g1_ref, b1_ref, w2_ref, g2_ref, b2_ref,
         wsc_ref, o_ref, o1_ref) = refs
        gsc_ref = bsc_ref = None

    HW = Ho * Wo
    Pp = o_ref.shape[-1]
    Hs, Ws = Ho + 2, Wo + 2

    xcol = x_ref[...].reshape(B * HW, x_ref.shape[-1])

    # conv1 (3x3, stride folded into the im2col): ONE MXU dot + GN1 + ReLU.
    y1 = jnp.dot(xcol, w1_ref[...], preferred_element_type=jnp.float32)
    y1 = jnp.maximum(_gn(y1, g1_ref[...], b1_ref[...], B, HW), 0.0)

    # shortcut: a second dot on the same im2col columns (weight embedded at the
    # center tap) -> projection 1x1 conv (+GN) or exact identity pass-through.
    s = jnp.dot(xcol, wsc_ref[...], preferred_element_type=jnp.float32)
    if proj:
        s = _gn(s, gsc_ref[...], bsc_ref[...], B, HW)

    # Stage out1 into the halo scratch for conv2.  Zero only the 1-pixel halo
    # ring each step (scratch is per-TensorCore under megacore sharding).
    zdt = o1_ref.dtype
    o1_ref[:, pl.ds(0, 1), :, :] = jnp.zeros((B, 1, Ws, Pp), zdt)
    o1_ref[:, pl.ds(Hs - 1, 1), :, :] = jnp.zeros((B, 1, Ws, Pp), zdt)
    o1_ref[:, :, pl.ds(0, 1), :] = jnp.zeros((B, Hs, 1, Pp), zdt)
    o1_ref[:, :, pl.ds(Ws - 1, 1), :] = jnp.zeros((B, Hs, 1, Pp), zdt)
    o1_ref[:, pl.ds(1, Ho), pl.ds(1, Wo), :] = (
        y1.reshape(B, Ho, Wo, Pp).astype(zdt))

    # conv2 (3x3, stride 1): 9 shifted K=Pp MXU dots with f32 accumulation.
    # TODO(synk): on v6e/v7x group taps into K=256 pairs to fill the 256-wide MXU.
    src = o1_ref[...]
    acc = jnp.zeros((B * HW, Pp), jnp.float32)
    for dy in range(3):
        for dx in range(3):
            tap = jax.lax.slice(src, (0, dy, dx, 0), (B, dy + Ho, dx + Wo, Pp))
            acc = acc + jnp.dot(tap.reshape(B * HW, Pp), w2_ref[3 * dy + dx],
                                preferred_element_type=jnp.float32)
    y2 = _gn(acc, g2_ref[...], b2_ref[...], B, HW)

    out = jnp.maximum(y2 + s, 0.0)
    o_ref[...] = out.reshape(B, HW, Pp).astype(o_ref.dtype)


# ------------------------------ pallas wrapper ------------------------------ #

def _run_block(x1col, w1col, g1, b1, w2r, g2, b2, wsc, sc_affine,
               B, Ho, Wo, compute_dtype):
    N, HW, K1p = x1col.shape
    Pp = w1col.shape[-1]

    def cspec(shape):
        nd = len(shape)
        return pl.BlockSpec(shape, lambda n, _nd=nd: (0,) * _nd)

    in_specs = [pl.BlockSpec((B, HW, K1p), lambda n: (n, 0, 0)),
                cspec(w1col.shape), cspec(g1.shape), cspec(b1.shape),
                cspec(w2r.shape), cspec(g2.shape), cspec(b2.shape),
                cspec(wsc.shape)]
    args = [x1col, w1col, g1, b1, w2r, g2, b2, wsc]

    proj = sc_affine is not None
    if proj:
        gsc, bsc = sc_affine
        in_specs += [cspec(gsc.shape), cspec(bsc.shape)]
        args += [gsc, bsc]

    kernel = functools.partial(_block_kernel, B, Ho, Wo, proj)

    return pl.pallas_call(
        kernel,
        out_shape=jax.ShapeDtypeStruct((N, HW, Pp), compute_dtype),
        grid_spec=pltpu.PrefetchScalarGridSpec(
            num_scalar_prefetch=0,
            grid=(N // B,),
            in_specs=in_specs,
            out_specs=pl.BlockSpec((B, HW, Pp), lambda n: (n, 0, 0)),
            scratch_shapes=[pltpu.VMEM((B, Ho + 2, Wo + 2, Pp), compute_dtype)]),
        compiler_params=pltpu.CompilerParams(
            dimension_semantics=("parallel",)),
    )(*args)


def basic_block_forward(x_nchw, params, stride=1, compute_dtype=jnp.bfloat16,
                        batch_block=None):
    """Forward pass of BasicBlock (norm='instancenorm'), NCHW in / NCHW out."""
    w1, g1, b1, w2, g2, b2, shortcut = params          # w1/w2 in HWIO layout
    N, Cin, H, W = x_nchw.shape
    P = w1.shape[-1]
    Pp = _round_up(P, _LANE)
    Ho = (H + 2 - 3) // stride + 1
    Wo = (W + 2 - 3) // stride + 1
    K1 = 9 * Cin
    K1p = _round_up(K1, _LANE)
    B = _pick_batch_block(N, batch_block)

    # NCHW -> NHWC, 1-pixel halo, then im2col: 9 (optionally strided) taps
    # concatenated along the channel/K axis; K padded ONCE to the lane width.
    x = jnp.transpose(x_nchw, (0, 2, 3, 1)).astype(compute_dtype)
    xp = jnp.pad(x, ((0, 0), (1, 1), (1, 1), (0, 0)))
    taps = []
    for dy in range(3):
        for dx in range(3):
            taps.append(jax.lax.slice(
                xp, (0, dy, dx, 0),
                (N, dy + stride * (Ho - 1) + 1, dx + stride * (Wo - 1) + 1, Cin),
                (1, stride, stride, 1)))
    x1col = jnp.concatenate(taps, axis=-1)                        # (N,Ho,Wo,9*Cin)
    x1col = jnp.pad(x1col, ((0, 0), (0, 0), (0, 0), (0, K1p - K1)))
    x1col = x1col.reshape(N, Ho * Wo, K1p).astype(compute_dtype)

    # conv1 weights in matching im2col layout; conv2 weights one slab per tap.
    w1col = jnp.pad(w1.reshape(K1, P),
                    ((0, K1p - K1), (0, Pp - P))).astype(compute_dtype)
    w2r = jnp.pad(w2, ((0, 0), (0, 0), (0, Pp - P), (0, Pp - P))
                  ).reshape(9, Pp, Pp).astype(compute_dtype)

    def affine(v):  # gamma/beta stay f32; padded channels get 0 -> stay 0
        return jnp.pad(v.astype(jnp.float32), (0, Pp - P)).reshape(1, Pp)

    # Shortcut embedded at the center-tap rows (rows 4*Cin .. 5*Cin) of the
    # im2col K axis: projection 1x1 conv weights, or an identity matrix.
    if shortcut is None:
        assert stride == 1 and Cin == P, "identity shortcut needs matching shape"
        idx = jnp.arange(Cin)
        wsc_full = jnp.zeros((K1, P), jnp.float32).at[4 * Cin + idx, idx].set(1.0)
        sc_affine = None
    else:
        wsc, gsc, bsc = shortcut                       # 1x1 conv (Cin, P) + GN
        wsc_full = jnp.zeros((K1, P), jnp.float32
                             ).at[4 * Cin:5 * Cin, :].set(wsc.astype(jnp.float32))
        sc_affine = (affine(gsc), affine(bsc))
    wsc_emb = jnp.pad(wsc_full, ((0, K1p - K1), (0, Pp - P))).astype(compute_dtype)

    out = _run_block(x1col, w1col, affine(g1), affine(b1),
                     w2r, affine(g2), affine(b2),
                     wsc_emb, sc_affine, B, Ho, Wo, compute_dtype)  # (N,Ho*Wo,Pp)
    out = out.reshape(N, Ho, Wo, Pp)[..., :P]
    return jnp.transpose(out, (0, 3, 1, 2))            # drop channel pad -> NCHW
# NOTE: if the surrounding model runs NHWC end-to-end, the transposes above are
# pure layout plumbing and can be dropped.


# ----------------------------- pure-JAX reference --------------------------- #

def _ref_forward(x_nchw, params, stride=1):
    w1, g1, b1, w2, g2, b2, shortcut = params
    x = jnp.transpose(x_nchw, (0, 2, 3, 1)).astype(jnp.float32)

    def conv3x3(x, w, s):
        return jax.lax.conv_general_dilated(
            x, w, (s, s), [(1, 1), (1, 1)],
            dimension_numbers=("NHWC", "HWIO", "NHWC"))

    def gn(y, g, b):
        mu = jnp.mean(y, axis=(1, 2), keepdims=True)
        var = jnp.mean(jnp.square(y - mu), axis=(1, 2), keepdims=True)
        return (y - mu) * jax.lax.rsqrt(var + _EPS) * g + b

    out = jax.nn.relu(gn(conv3x3(x, w1, stride), g1, b1))
    out = gn(conv3x3(out, w2, 1), g2, b2)
    if shortcut is None:
        sc = x
    else:
        wsc, gsc, bsc = shortcut
        sc = gn(jnp.einsum("nhwc,cd->nhwd", x[:, ::stride, ::stride, :], wsc),
                gsc, bsc)
    return jnp.transpose(jax.nn.relu(out + sc), (0, 3, 1, 2))


# ------------------------------------ main ----------------------------------- #

def _check(name, out, ref, rtol, atol):
    err = float(jnp.max(jnp.abs(out.astype(jnp.float32) - ref)))
    assert bool(jnp.allclose(out.astype(jnp.float32), ref, rtol=rtol, atol=atol)), \
        (name, err)


def _make_params(key, Cin, planes, proj):
    f32 = jnp.float32
    ks = jax.random.split(key, 9)
    w1 = (0.1 * jax.random.normal(ks[0], (3, 3, Cin, planes))).astype(f32)
    w2 = (0.1 * jax.random.normal(ks[1], (3, 3, planes, planes))).astype(f32)
    g1 = (1.0 + 0.1 * jax.random.normal(ks[2], (planes,))).astype(f32)
    b1 = (0.1 * jax.random.normal(ks[3], (planes,))).astype(f32)
    g2 = (1.0 + 0.1 * jax.random.normal(ks[4], (planes,))).astype(f32)
    b2 = (0.1 * jax.random.normal(ks[5], (planes,))).astype(f32)
    if proj:
        wsc = (0.1 * jax.random.normal(ks[6], (Cin, planes))).astype(f32)
        gsc = (1.0 + 0.1 * jax.random.normal(ks[7], (planes,))).astype(f32)
        bsc = (0.1 * jax.random.normal(ks[8], (planes,))).astype(f32)
        sc = (wsc, gsc, bsc)
    else:
        sc = None
    return (w1, g1, b1, w2, g2, b2, sc)


if __name__ == "__main__":
    f32 = jnp.float32
    root = jax.random.PRNGKey(0)
    kA, kB, kC, kx1, kx2, kx3 = jax.random.split(root, 6)

    # --- config A: projection shortcut (in_planes != planes), stride=1 -------
    N, Cin, H, W, planes, stride = 2, 4, 16, 16, 8, 1
    params_a = _make_params(kA, Cin, planes, proj=True)
    x_a = jax.random.normal(kx1, (N, Cin, H, W), dtype=f32)
    ref_a = jax.block_until_ready(_ref_forward(x_a, params_a, stride))

    out_f32 = jax.block_until_ready(
        basic_block_forward(x_a, params_a, stride, compute_dtype=jnp.float32))
    assert out_f32.shape == (N, planes, H, W), out_f32.shape
    _check("proj/f32", out_f32, ref_a, rtol=1e-3, atol=1e-3)

    out_bf16 = jax.block_until_ready(basic_block_forward(x_a, params_a, stride))
    _check("proj/bf16", out_bf16, ref_a, rtol=5e-2, atol=5e-2)

    # --- config B: identity shortcut (in_planes == planes), stride=1 ---------
    Cin_b = 8
    params_b = _make_params(kB, Cin_b, Cin_b, proj=False)
    x_b = jax.random.normal(kx2, (N, Cin_b, H, W), dtype=f32)
    ref_b = jax.block_until_ready(_ref_forward(x_b, params_b, 1))
    out_b = jax.block_until_ready(
        basic_block_forward(x_b, params_b, 1, compute_dtype=jnp.float32))
    assert out_b.shape == (N, Cin_b, H, W), out_b.shape
    _check("id/f32", out_b, ref_b, rtol=1e-3, atol=1e-3)

    # --- config C: downsampling block (stride=2, projection), batched steps --
    N_c = 4
    params_c = _make_params(kC, Cin, planes, proj=True)
    x_c = jax.random.normal(kx3, (N_c, Cin, H, W), dtype=f32)
    ref_c = jax.block_until_ready(_ref_forward(x_c, params_c, 2))
    out_c = jax.block_until_ready(
        basic_block_forward(x_c, params_c, 2, compute_dtype=jnp.float32))
    assert out_c.shape == (N_c, planes, H // 2, W // 2), out_c.shape
    _check("proj-s2/f32", out_c, ref_c, rtol=1e-3, atol=1e-3)

    print("KERNEL_OK")
</pallas_src>

<mosaic_0001>
module attributes {stable_mosaic.version = 11 : i64} {
  func.func @_block_kernel(%arg0: i32, %arg1: memref<1x256x128xf32, #tpu.memory_space<vmem>>, %arg2: memref<128x128xf32, #tpu.memory_space<vmem>>, %arg3: memref<1x128xf32, #tpu.memory_space<vmem>>, %arg4: memref<1x128xf32, #tpu.memory_space<vmem>>, %arg5: memref<9x128x128xf32, #tpu.memory_space<vmem>>, %arg6: memref<1x128xf32, #tpu.memory_space<vmem>>, %arg7: memref<1x128xf32, #tpu.memory_space<vmem>>, %arg8: memref<128x128xf32, #tpu.memory_space<vmem>>, %arg9: memref<1x128xf32, #tpu.memory_space<vmem>>, %arg10: memref<1x128xf32, #tpu.memory_space<vmem>>, %arg11: memref<1x256x128xf32, #tpu.memory_space<vmem>>, %arg12: memref<1x18x18x128xf32, #tpu.memory_space<vmem>>) attributes {dimension_semantics = [#tpu.dimension_semantics<parallel>], iteration_bounds = array<i64: 2>, scalar_prefetch = 0 : i64, scratch_operands = 1 : i64, tpu.core_type = #tpu.core_type<tc>, window_params = [{transform_indices = @transform_0, window_bounds = array<i64: 1, 256, 128>}, {pipeline_mode = #tpu.pipeline_mode<synchronous>, transform_indices = @transform_1, window_bounds = array<i64: 128, 128>}, {pipeline_mode = #tpu.pipeline_mode<synchronous>, transform_indices = @transform_2, window_bounds = array<i64: 1, 128>}, {pipeline_mode = #tpu.pipeline_mode<synchronous>, transform_indices = @transform_3, window_bounds = array<i64: 1, 128>}, {pipeline_mode = #tpu.pipeline_mode<synchronous>, transform_indices = @transform_4, window_bounds = array<i64: 9, 128, 128>}, {pipeline_mode = #tpu.pipeline_mode<synchronous>, transform_indices = @transform_5, window_bounds = array<i64: 1, 128>}, {pipeline_mode = #tpu.pipeline_mode<synchronous>, transform_indices = @transform_6, window_bounds = array<i64: 1, 128>}, {pipeline_mode = #tpu.pipeline_mode<synchronous>, transform_indices = @transform_7, window_bounds = array<i64: 128, 128>}, {pipeline_mode = #tpu.pipeline_mode<synchronous>, transform_indices = @transform_8, window_bounds = array<i64: 1, 128>}, {pipeline_mode = #tpu.pipeline_mode<synchronous>, transform_indices = @transform_9, window_bounds = array<i64: 1, 128>}, {transform_indices = @transform_10, window_bounds = array<i64: 1, 256, 128>}]} {
    %c0 = arith.constant 0 : index
    %c0_0 = arith.constant 0 : index
    %c0_1 = arith.constant 0 : index
    %0 = vector.load %arg1[%c0, %c0_0, %c0_1] : memref<1x256x128xf32, #tpu.memory_space<vmem>>, vector<1x256x128xf32>
    %1 = vector.shape_cast %0 : vector<1x256x128xf32> to vector<256x128xf32>
    %c0_2 = arith.constant 0 : index
    %c0_3 = arith.constant 0 : index
    %2 = vector.load %arg2[%c0_2, %c0_3] : memref<128x128xf32, #tpu.memory_space<vmem>>, vector<128x128xf32>
    %cst = arith.constant dense<0.000000e+00> : vector<256x128xf32>
    %3 = tpu.matmul %1, %2, %cst {dimension_numbers = #tpu.dot_dimension_numbers<[1], [0], [0], [1], [0, 0, 1, 1], [], []>} : vector<256x128xf32>, vector<128x128xf32>, vector<256x128xf32> -> vector<256x128xf32>
    %c0_4 = arith.constant 0 : index
    %c0_5 = arith.constant 0 : index
    %4 = vector.load %arg3[%c0_4, %c0_5] : memref<1x128xf32, #tpu.memory_space<vmem>>, vector<1x128xf32>
    %c0_6 = arith.constant 0 : index
    %c0_7 = arith.constant 0 : index
    %5 = vector.load %arg4[%c0_6, %c0_7] : memref<1x128xf32, #tpu.memory_space<vmem>>, vector<1x128xf32>
    %6 = vector.shape_cast %3 : vector<256x128xf32> to vector<1x256x128xf32>
    %cst_8 = arith.constant dense<0.000000e+00> : vector<1x128xf32>
    %7 = vector.multi_reduction <add>, %6, %cst_8 [1] : vector<1x256x128xf32> to vector<1x128xf32>
    %8 = vector.shape_cast %7 : vector<1x128xf32> to vector<1x1x128xf32>
    %cst_9 = arith.constant 2.560000e+02 : f32
    %9 = vector.broadcast %cst_9 : f32 to vector<1x1x128xf32>
    %10 = arith.divf %8, %9 : vector<1x1x128xf32>
    %11 = arith.mulf %6, %6 : vector<1x256x128xf32>
    %cst_10 = arith.constant dense<0.000000e+00> : vector<1x128xf32>
    %12 = vector.multi_reduction <add>, %11, %cst_10 [1] : vector<1x256x128xf32> to vector<1x128xf32>
    %13 = vector.shape_cast %12 : vector<1x128xf32> to vector<1x1x128xf32>
    %cst_11 = arith.constant 2.560000e+02 : f32
    %14 = vector.broadcast %cst_11 : f32 to vector<1x1x128xf32>
    %15 = arith.divf %13, %14 : vector<1x1x128xf32>
    %16 = arith.mulf %10, %10 : vector<1x1x128xf32>
    %17 = arith.subf %15, %16 : vector<1x1x128xf32>
    %cst_12 = arith.constant 0.000000e+00 : f32
    %18 = vector.broadcast %cst_12 : f32 to vector<1x1x128xf32>
    %19 = arith.maximumf %17, %18 : vector<1x1x128xf32>
    %20 = vector.broadcast %10 : vector<1x1x128xf32> to vector<1x256x128xf32>
    %21 = arith.subf %6, %20 : vector<1x256x128xf32>
    %cst_13 = arith.constant 9.99999974E-6 : f32
    %22 = vector.broadcast %cst_13 : f32 to vector<1x1x128xf32>
    %23 = arith.addf %19, %22 : vector<1x1x128xf32>
    %24 = math.rsqrt %23 : vector<1x1x128xf32>
    %25 = vector.broadcast %24 : vector<1x1x128xf32> to vector<1x256x128xf32>
    %26 = arith.mulf %21, %25 : vector<1x256x128xf32>
    %27 = vector.shape_cast %4 : vector<1x128xf32> to vector<1x1x128xf32>
    %28 = vector.broadcast %27 : vector<1x1x128xf32> to vector<1x256x128xf32>
    %29 = arith.mulf %26, %28 : vector<1x256x128xf32>
    %30 = vector.shape_cast %5 : vector<1x128xf32> to vector<1x1x128xf32>
    %31 = vector.broadcast %30 : vector<1x1x128xf32> to vector<1x256x128xf32>
    %32 = arith.addf %29, %31 : vector<1x256x128xf32>
    %33 = vector.shape_cast %32 : vector<1x256x128xf32> to vector<256x128xf32>
    %cst_14 = arith.constant 0.000000e+00 : f32
    %34 = vector.broadcast %cst_14 : f32 to vector<256x128xf32>
    %35 = arith.maximumf %33, %34 : vector<256x128xf32>
    %c0_15 = arith.constant 0 : index
    %c0_16 = arith.constant 0 : index
    %36 = vector.load %arg8[%c0_15, %c0_16] : memref<128x128xf32, #tpu.memory_space<vmem>>, vector<128x128xf32>
    %cst_17 = arith.constant dense<0.000000e+00> : vector<256x128xf32>
    %37 = tpu.matmul %1, %36, %cst_17 {dimension_numbers = #tpu.dot_dimension_numbers<[1], [0], [0], [1], [0, 0, 1, 1], [], []>} : vector<256x128xf32>, vector<128x128xf32>, vector<256x128xf32> -> vector<256x128xf32>
    %c0_18 = arith.constant 0 : index
    %c0_19 = arith.constant 0 : index
    %38 = vector.load %arg9[%c0_18, %c0_19] : memref<1x128xf32, #tpu.memory_space<vmem>>, vector<1x128xf32>
    %c0_20 = arith.constant 0 : index
    %c0_21 = arith.constant 0 : index
    %39 = vector.load %arg10[%c0_20, %c0_21] : memref<1x128xf32, #tpu.memory_space<vmem>>, vector<1x128xf32>
    %40 = vector.shape_cast %37 : vector<256x128xf32> to vector<1x256x128xf32>
    %cst_22 = arith.constant dense<0.000000e+00> : vector<1x128xf32>
    %41 = vector.multi_reduction <add>, %40, %cst_22 [1] : vector<1x256x128xf32> to vector<1x128xf32>
    %42 = vector.shape_cast %41 : vector<1x128xf32> to vector<1x1x128xf32>
    %cst_23 = arith.constant 2.560000e+02 : f32
    %43 = vector.broadcast %cst_23 : f32 to vector<1x1x128xf32>
    %44 = arith.divf %42, %43 : vector<1x1x128xf32>
    %45 = arith.mulf %40, %40 : vector<1x256x128xf32>
    %cst_24 = arith.constant dense<0.000000e+00> : vector<1x128xf32>
    %46 = vector.multi_reduction <add>, %45, %cst_24 [1] : vector<1x256x128xf32> to vector<1x128xf32>
    %47 = vector.shape_cast %46 : vector<1x128xf32> to vector<1x1x128xf32>
    %cst_25 = arith.constant 2.560000e+02 : f32
    %48 = vector.broadcast %cst_25 : f32 to vector<1x1x128xf32>
    %49 = arith.divf %47, %48 : vector<1x1x128xf32>
    %50 = arith.mulf %44, %44 : vector<1x1x128xf32>
    %51 = arith.subf %49, %50 : vector<1x1x128xf32>
    %cst_26 = arith.constant 0.000000e+00 : f32
    %52 = vector.broadcast %cst_26 : f32 to vector<1x1x128xf32>
    %53 = arith.maximumf %51, %52 : vector<1x1x128xf32>
    %54 = vector.broadcast %44 : vector<1x1x128xf32> to vector<1x256x128xf32>
    %55 = arith.subf %40, %54 : vector<1x256x128xf32>
    %cst_27 = arith.constant 9.99999974E-6 : f32
    %56 = vector.broadcast %cst_27 : f32 to vector<1x1x128xf32>
    %57 = arith.addf %53, %56 : vector<1x1x128xf32>
    %58 = math.rsqrt %57 : vector<1x1x128xf32>
    %59 = vector.broadcast %58 : vector<1x1x128xf32> to vector<1x256x128xf32>
    %60 = arith.mulf %55, %59 : vector<1x256x128xf32>
    %61 = vector.shape_cast %38 : vector<1x128xf32> to vector<1x1x128xf32>
    %62 = vector.broadcast %61 : vector<1x1x128xf32> to vector<1x256x128xf32>
    %63 = arith.mulf %60, %62 : vector<1x256x128xf32>
    %64 = vector.shape_cast %39 : vector<1x128xf32> to vector<1x1x128xf32>
    %65 = vector.broadcast %64 : vector<1x1x128xf32> to vector<1x256x128xf32>
    %66 = arith.addf %63, %65 : vector<1x256x128xf32>
    %67 = vector.shape_cast %66 : vector<1x256x128xf32> to vector<256x128xf32>
    %cst_28 = arith.constant 0.000000e+00 : f32
    %68 = vector.broadcast %cst_28 : f32 to vector<1x1x18x128xf32>
    %c0_29 = arith.constant 0 : index
    %c0_30 = arith.constant 0 : index
    %c0_31 = arith.constant 0 : index
    %c0_32 = arith.constant 0 : index
    %69 = vector.load %arg12[%c0_29, %c0_30, %c0_31, %c0_32] : memref<1x18x18x128xf32, #tpu.memory_space<vmem>>, vector<1x1x18x128xf32>
    tpu.vector_store %arg12[%c0_29, %c0_30, %c0_31, %c0_32], %68 {strides = array<i32>} : memref<1x18x18x128xf32, #tpu.memory_space<vmem>>, vector<1x1x18x128xf32>,
    %cst_33 = arith.constant 0.000000e+00 : f32
    %70 = vector.broadcast %cst_33 : f32 to vector<1x1x18x128xf32>
    %c0_34 = arith.constant 0 : index
    %c17 = arith.constant 17 : index
    %c0_35 = arith.constant 0 : index
    %c0_36 = arith.constant 0 : index
    %71 = vector.load %arg12[%c0_34, %c17, %c0_35, %c0_36] : memref<1x18x18x128xf32, #tpu.memory_space<vmem>>, vector<1x1x18x128xf32>
    tpu.vector_store %arg12[%c0_34, %c17, %c0_35, %c0_36], %70 {strides = array<i32>} : memref<1x18x18x128xf32, #tpu.memory_space<vmem>>, vector<1x1x18x128xf32>,
    %cst_37 = arith.constant 0.000000e+00 : f32
    %72 = vector.broadcast %cst_37 : f32 to vector<1x18x1x128xf32>
    %c0_38 = arith.constant 0 : index
    %c0_39 = arith.constant 0 : index
    %c0_40 = arith.constant 0 : index
    %c0_41 = arith.constant 0 : index
    %73 = vector.load %arg12[%c0_38, %c0_39, %c0_40, %c0_41] : memref<1x18x18x128xf32, #tpu.memory_space<vmem>>, vector<1x18x1x128xf32>
    tpu.vector_store %arg12[%c0_38, %c0_39, %c0_40, %c0_41], %72 {strides = array<i32>} : memref<1x18x18x128xf32, #tpu.memory_space<vmem>>, vector<1x18x1x128xf32>,
    %cst_42 = arith.constant 0.000000e+00 : f32
    %74 = vector.broadcast %cst_42 : f32 to vector<1x18x1x128xf32>
    %c0_43 = arith.constant 0 : index
    %c0_44 = arith.constant 0 : index
    %c17_45 = arith.constant 17 : index
    %c0_46 = arith.constant 0 : index
    %75 = vector.load %arg12[%c0_43, %c0_44, %c17_45, %c0_46] : memref<1x18x18x128xf32, #tpu.memory_space<vmem>>, vector<1x18x1x128xf32>
    tpu.vector_store %arg12[%c0_43, %c0_44, %c17_45, %c0_46], %74 {strides = array<i32>} : memref<1x18x18x128xf32, #tpu.memory_space<vmem>>, vector<1x18x1x128xf32>,
    %76 = vector.shape_cast %35 : vector<256x128xf32> to vector<1x16x16x128xf32>
    %c0_47 = arith.constant 0 : index
    %c1 = arith.constant 1 : index
    %c1_48 = arith.constant 1 : index
    %c0_49 = arith.constant 0 : index
    %77 = vector.load %arg12[%c0_47, %c1, %c1_48, %c0_49] : memref<1x18x18x128xf32, #tpu.memory_space<vmem>>, vector<1x16x16x128xf32>
    tpu.vector_store %arg12[%c0_47, %c1, %c1_48, %c0_49], %76 {strides = array<i32>} : memref<1x18x18x128xf32, #tpu.memory_space<vmem>>, vector<1x16x16x128xf32>,
    %c0_50 = arith.constant 0 : index
    %c0_51 = arith.constant 0 : index
    %c0_52 = arith.constant 0 : index
    %c0_53 = arith.constant 0 : index
    %78 = vector.load %arg12[%c0_50, %c0_51, %c0_52, %c0_53] : memref<1x18x18x128xf32, #tpu.memory_space<vmem>>, vector<1x18x18x128xf32>
    %cst_54 = arith.constant 0.000000e+00 : f32
    %79 = vector.broadcast %cst_54 : f32 to vector<256x128xf32>
    %80 = vector.extract_strided_slice %78 {offsets = [0, 0, 0, 0], sizes = [1, 16, 16, 128], strides = [1, 1, 1, 1]} : vector<1x18x18x128xf32> to vector<1x16x16x128xf32>
    %81 = vector.shape_cast %80 : vector<1x16x16x128xf32> to vector<256x128xf32>
    %c0_55 = arith.constant 0 : index
    %c0_56 = arith.constant 0 : index
    %c0_57 = arith.constant 0 : index
    %82 = vector.load %arg5[%c0_55, %c0_56, %c0_57] : memref<9x128x128xf32, #tpu.memory_space<vmem>>, vector<1x128x128xf32>
    %83 = vector.shape_cast %82 : vector<1x128x128xf32> to vector<128x128xf32>
    %cst_58 = arith.constant dense<0.000000e+00> : vector<256x128xf32>
    %84 = tpu.matmul %81, %83, %cst_58 {dimension_numbers = #tpu.dot_dimension_numbers<[1], [0], [0], [1], [0, 0, 1, 1], [], []>} : vector<256x128xf32>, vector<128x128xf32>, vector<256x128xf32> -> vector<256x128xf32>
    %85 = arith.addf %79, %84 : vector<256x128xf32>
    %86 = vector.extract_strided_slice %78 {offsets = [0, 0, 1, 0], sizes = [1, 16, 16, 128], strides = [1, 1, 1, 1]} : vector<1x18x18x128xf32> to vector<1x16x16x128xf32>
    %87 = vector.shape_cast %86 : vector<1x16x16x128xf32> to vector<256x128xf32>
    %c1_59 = arith.constant 1 : index
    %c0_60 = arith.constant 0 : index
    %c0_61 = arith.constant 0 : index
    %88 = vector.load %arg5[%c1_59, %c0_60, %c0_61] : memref<9x128x128xf32, #tpu.memory_space<vmem>>, vector<1x128x128xf32>
    %89 = vector.shape_cast %88 : vector<1x128x128xf32> to vector<128x128xf32>
    %cst_62 = arith.constant dense<0.000000e+00> : vector<256x128xf32>
    %90 = tpu.matmul %87, %89, %cst_62 {dimension_numbers = #tpu.dot_dimension_numbers<[1], [0], [0], [1], [0, 0, 1, 1], [], []>} : vector<256x128xf32>, vector<128x128xf32>, vector<256x128xf32> -> vector<256x128xf32>
    %91 = arith.addf %85, %90 : vector<256x128xf32>
    %92 = vector.extract_strided_slice %78 {offsets = [0, 0, 2, 0], sizes = [1, 16, 16, 128], strides = [1, 1, 1, 1]} : vector<1x18x18x128xf32> to vector<1x16x16x128xf32>
    %93 = vector.shape_cast %92 : vector<1x16x16x128xf32> to vector<256x128xf32>
    %c2 = arith.constant 2 : index
    %c0_63 = arith.constant 0 : index
    %c0_64 = arith.constant 0 : index
    %94 = vector.load %arg5[%c2, %c0_63, %c0_64] : memref<9x128x128xf32, #tpu.memory_space<vmem>>, vector<1x128x128xf32>
    %95 = vector.shape_cast %94 : vector<1x128x128xf32> to vector<128x128xf32>
    %cst_65 = arith.constant dense<0.000000e+00> : vector<256x128xf32>
    %96 = tpu.matmul %93, %95, %cst_65 {dimension_numbers = #tpu.dot_dimension_numbers<[1], [0], [0], [1], [0, 0, 1, 1], [], []>} : vector<256x128xf32>, vector<128x128xf32>, vector<256x128xf32> -> vector<256x128xf32>
    %97 = arith.addf %91, %96 : vector<256x128xf32>
    %98 = vector.extract_strided_slice %78 {offsets = [0, 1, 0, 0], sizes = [1, 16, 16, 128], strides = [1, 1, 1, 1]} : vector<1x18x18x128xf32> to vector<1x16x16x128xf32>
    %99 = vector.shape_cast %98 : vector<1x16x16x128xf32> to vector<256x128xf32>
    %c3 = arith.constant 3 : index
    %c0_66 = arith.constant 0 : index
    %c0_67 = arith.constant 0 : index
    %100 = vector.load %arg5[%c3, %c0_66, %c0_67] : memref<9x128x128xf32, #tpu.memory_space<vmem>>, vector<1x128x128xf32>
    %101 = vector.shape_cast %100 : vector<1x128x128xf32> to vector<128x128xf32>
    %cst_68 = arith.constant dense<0.000000e+00> : vector<256x128xf32>
    %102 = tpu.matmul %99, %101, %cst_68 {dimension_numbers = #tpu.dot_dimension_numbers<[1], [0], [0], [1], [0, 0, 1, 1], [], []>} : vector<256x128xf32>, vector<128x128xf32>, vector<256x128xf32> -> vector<256x128xf32>
    %103 = arith.addf %97, %102 : vector<256x128xf32>
    %104 = vector.extract_strided_slice %78 {offsets = [0, 1, 1, 0], sizes = [1, 16, 16, 128], strides = [1, 1, 1, 1]} : vector<1x18x18x128xf32> to vector<1x16x16x128xf32>
    %105 = vector.shape_cast %104 : vector<1x16x16x128xf32> to vector<256x128xf32>
    %c4 = arith.constant 4 : index
    %c0_69 = arith.constant 0 : index
    %c0_70 = arith.constant 0 : index
    %106 = vector.load %arg5[%c4, %c0_69, %c0_70] : memref<9x128x128xf32, #tpu.memory_space<vmem>>, vector<1x128x128xf32>
    %107 = vector.shape_cast %106 : vector<1x128x128xf32> to vector<128x128xf32>
    %cst_71 = arith.constant dense<0.000000e+00> : vector<256x128xf32>
    %108 = tpu.matmul %105, %107, %cst_71 {dimension_numbers = #tpu.dot_dimension_numbers<[1], [0], [0], [1], [0, 0, 1, 1], [], []>} : vector<256x128xf32>, vector<128x128xf32>, vector<256x128xf32> -> vector<256x128xf32>
    %109 = arith.addf %103, %108 : vector<256x128xf32>
    %110 = vector.extract_strided_slice %78 {offsets = [0, 1, 2, 0], sizes = [1, 16, 16, 128], strides = [1, 1, 1, 1]} : vector<1x18x18x128xf32> to vector<1x16x16x128xf32>
    %111 = vector.shape_cast %110 : vector<1x16x16x128xf32> to vector<256x128xf32>
    %c5 = arith.constant 5 : index
    %c0_72 = arith.constant 0 : index
    %c0_73 = arith.constant 0 : index
    %112 = vector.load %arg5[%c5, %c0_72, %c0_73] : memref<9x128x128xf32, #tpu.memory_space<vmem>>, vector<1x128x128xf32>
    %113 = vector.shape_cast %112 : vector<1x128x128xf32> to vector<128x128xf32>
    %cst_74 = arith.constant dense<0.000000e+00> : vector<256x128xf32>
    %114 = tpu.matmul %111, %113, %cst_74 {dimension_numbers = #tpu.dot_dimension_numbers<[1], [0], [0], [1], [0, 0, 1, 1], [], []>} : vector<256x128xf32>, vector<128x128xf32>, vector<256x128xf32> -> vector<256x128xf32>
    %115 = arith.addf %109, %114 : vector<256x128xf32>
    %116 = vector.extract_strided_slice %78 {offsets = [0, 2, 0, 0], sizes = [1, 16, 16, 128], strides = [1, 1, 1, 1]} : vector<1x18x18x128xf32> to vector<1x16x16x128xf32>
    %117 = vector.shape_cast %116 : vector<1x16x16x128xf32> to vector<256x128xf32>
    %c6 = arith.constant 6 : index
    %c0_75 = arith.constant 0 : index
    %c0_76 = arith.constant 0 : index
    %118 = vector.load %arg5[%c6, %c0_75, %c0_76] : memref<9x128x128xf32, #tpu.memory_space<vmem>>, vector<1x128x128xf32>
    %119 = vector.shape_cast %118 : vector<1x128x128xf32> to vector<128x128xf32>
    %cst_77 = arith.constant dense<0.000000e+00> : vector<256x128xf32>
    %120 = tpu.matmul %117, %119, %cst_77 {dimension_numbers = #tpu.dot_dimension_numbers<[1], [0], [0], [1], [0, 0, 1, 1], [], []>} : vector<256x128xf32>, vector<128x128xf32>, vector<256x128xf32> -> vector<256x128xf32>
    %121 = arith.addf %115, %120 : vector<256x128xf32>
    %122 = vector.extract_strided_slice %78 {offsets = [0, 2, 1, 0], sizes = [1, 16, 16, 128], strides = [1, 1, 1, 1]} : vector<1x18x18x128xf32> to vector<1x16x16x128xf32>
    %123 = vector.shape_cast %122 : vector<1x16x16x128xf32> to vector<256x128xf32>
    %c7 = arith.constant 7 : index
    %c0_78 = arith.constant 0 : index
    %c0_79 = arith.constant 0 : index
    %124 = vector.load %arg5[%c7, %c0_78, %c0_79] : memref<9x128x128xf32, #tpu.memory_space<vmem>>, vector<1x128x128xf32>
    %125 = vector.shape_cast %124 : vector<1x128x128xf32> to vector<128x128xf32>
    %cst_80 = arith.constant dense<0.000000e+00> : vector<256x128xf32>
    %126 = tpu.matmul %123, %125, %cst_80 {dimension_numbers = #tpu.dot_dimension_numbers<[1], [0], [0], [1], [0, 0, 1, 1], [], []>} : vector<256x128xf32>, vector<128x128xf32>, vector<256x128xf32> -> vector<256x128xf32>
    %127 = arith.addf %121, %126 : vector<256x128xf32>
    %128 = vector.extract_strided_slice %78 {offsets = [0, 2, 2, 0], sizes = [1, 16, 16, 128], strides = [1, 1, 1, 1]} : vector<1x18x18x128xf32> to vector<1x16x16x128xf32>
    %129 = vector.shape_cast %128 : vector<1x16x16x128xf32> to vector<256x128xf32>
    %c8 = arith.constant 8 : index
    %c0_81 = arith.constant 0 : index
    %c0_82 = arith.constant 0 : index
    %130 = vector.load %arg5[%c8, %c0_81, %c0_82] : memref<9x128x128xf32, #tpu.memory_space<vmem>>, vector<1x128x128xf32>
    %131 = vector.shape_cast %130 : vector<1x128x128xf32> to vector<128x128xf32>
    %cst_83 = arith.constant dense<0.000000e+00> : vector<256x128xf32>
    %132 = tpu.matmul %129, %131, %cst_83 {dimension_numbers = #tpu.dot_dimension_numbers<[1], [0], [0], [1], [0, 0, 1, 1], [], []>} : vector<256x128xf32>, vector<128x128xf32>, vector<256x128xf32> -> vector<256x128xf32>
    %133 = arith.addf %127, %132 : vector<256x128xf32>
    %c0_84 = arith.constant 0 : index
    %c0_85 = arith.constant 0 : index
    %134 = vector.load %arg6[%c0_84, %c0_85] : memref<1x128xf32, #tpu.memory_space<vmem>>, vector<1x128xf32>
    %c0_86 = arith.constant 0 : index
    %c0_87 = arith.constant 0 : index
    %135 = vector.load %arg7[%c0_86, %c0_87] : memref<1x128xf32, #tpu.memory_space<vmem>>, vector<1x128xf32>
    %136 = vector.shape_cast %133 : vector<256x128xf32> to vector<1x256x128xf32>
    %cst_88 = arith.constant dense<0.000000e+00> : vector<1x128xf32>
    %137 = vector.multi_reduction <add>, %136, %cst_88 [1] : vector<1x256x128xf32> to vector<1x128xf32>
    %138 = vector.shape_cast %137 : vector<1x128xf32> to vector<1x1x128xf32>
    %cst_89 = arith.constant 2.560000e+02 : f32
    %139 = vector.broadcast %cst_89 : f32 to vector<1x1x128xf32>
    %140 = arith.divf %138, %139 : vector<1x1x128xf32>
    %141 = arith.mulf %136, %136 : vector<1x256x128xf32>
    %cst_90 = arith.constant dense<0.000000e+00> : vector<1x128xf32>
    %142 = vector.multi_reduction <add>, %141, %cst_90 [1] : vector<1x256x128xf32> to vector<1x128xf32>
    %143 = vector.shape_cast %142 : vector<1x128xf32> to vector<1x1x128xf32>
    %cst_91 = arith.constant 2.560000e+02 : f32
    %144 = vector.broadcast %cst_91 : f32 to vector<1x1x128xf32>
    %145 = arith.divf %143, %144 : vector<1x1x128xf32>
    %146 = arith.mulf %140, %140 : vector<1x1x128xf32>
    %147 = arith.subf %145, %146 : vector<1x1x128xf32>
    %cst_92 = arith.constant 0.000000e+00 : f32
    %148 = vector.broadcast %cst_92 : f32 to vector<1x1x128xf32>
    %149 = arith.maximumf %147, %148 : vector<1x1x128xf32>
    %150 = vector.broadcast %140 : vector<1x1x128xf32> to vector<1x256x128xf32>
    %151 = arith.subf %136, %150 : vector<1x256x128xf32>
    %cst_93 = arith.constant 9.99999974E-6 : f32
    %152 = vector.broadcast %cst_93 : f32 to vector<1x1x128xf32>
    %153 = arith.addf %149, %152 : vector<1x1x128xf32>
    %154 = math.rsqrt %153 : vector<1x1x128xf32>
    %155 = vector.broadcast %154 : vector<1x1x128xf32> to vector<1x256x128xf32>
    %156 = arith.mulf %151, %155 : vector<1x256x128xf32>
    %157 = vector.shape_cast %134 : vector<1x128xf32> to vector<1x1x128xf32>
    %158 = vector.broadcast %157 : vector<1x1x128xf32> to vector<1x256x128xf32>
    %159 = arith.mulf %156, %158 : vector<1x256x128xf32>
    %160 = vector.shape_cast %135 : vector<1x128xf32> to vector<1x1x128xf32>
    %161 = vector.broadcast %160 : vector<1x1x128xf32> to vector<1x256x128xf32>
    %162 = arith.addf %159, %161 : vector<1x256x128xf32>
    %163 = vector.shape_cast %162 : vector<1x256x128xf32> to vector<256x128xf32>
    %164 = arith.addf %163, %67 : vector<256x128xf32>
    %cst_94 = arith.constant 0.000000e+00 : f32
    %165 = vector.broadcast %cst_94 : f32 to vector<256x128xf32>
    %166 = arith.maximumf %164, %165 : vector<256x128xf32>
    %167 = vector.shape_cast %166 : vector<256x128xf32> to vector<1x256x128xf32>
    %c0_95 = arith.constant 0 : index
    %c0_96 = arith.constant 0 : index
    %c0_97 = arith.constant 0 : index
    %168 = vector.load %arg11[%c0_95, %c0_96, %c0_97] : memref<1x256x128xf32, #tpu.memory_space<vmem>>, vector<1x256x128xf32>
    tpu.vector_store %arg11[%c0_95, %c0_96, %c0_97], %167 {strides = array<i32>} : memref<1x256x128xf32, #tpu.memory_space<vmem>>, vector<1x256x128xf32>,
    return
  }
  func.func @transform_0(%arg0: i32) -> (i32, i32, i32) {
    %c0_i32 = arith.constant 0 : i32
    %c0_i32_0 = arith.constant 0 : i32
    %c0_i32_1 = arith.constant 0 : i32
    return %arg0, %c0_i32, %c0_i32_0 : i32, i32, i32
  }
  func.func @transform_1(%arg0: i32) -> (i32, i32) {
    %c0_i32 = arith.constant 0 : i32
    %c0_i32_0 = arith.constant 0 : i32
    %c0_i32_1 = arith.constant 0 : i32
    return %c0_i32, %c0_i32_0 : i32, i32
  }
  func.func @transform_2(%arg0: i32) -> (i32, i32) {
    %c0_i32 = arith.constant 0 : i32
    %c0_i32_0 = arith.constant 0 : i32
    %c0_i32_1 = arith.constant 0 : i32
    return %c0_i32, %c0_i32_0 : i32, i32
  }
  func.func @transform_3(%arg0: i32) -> (i32, i32) {
    %c0_i32 = arith.constant 0 : i32
    %c0_i32_0 = arith.constant 0 : i32
    %c0_i32_1 = arith.constant 0 : i32
    return %c0_i32, %c0_i32_0 : i32, i32
  }
  func.func @transform_4(%arg0: i32) -> (i32, i32, i32) {
    %c0_i32 = arith.constant 0 : i32
    %c0_i32_0 = arith.constant 0 : i32
    %c0_i32_1 = arith.constant 0 : i32
    %c0_i32_2 = arith.constant 0 : i32
    return %c0_i32, %c0_i32_0, %c0_i32_1 : i32, i32, i32
  }
  func.func @transform_5(%arg0: i32) -> (i32, i32) {
    %c0_i32 = arith.constant 0 : i32
    %c0_i32_0 = arith.constant 0 : i32
    %c0_i32_1 = arith.constant 0 : i32
    return %c0_i32, %c0_i32_0 : i32, i32
  }
  func.func @transform_6(%arg0: i32) -> (i32, i32) {
    %c0_i32 = arith.constant 0 : i32
    %c0_i32_0 = arith.constant 0 : i32
    %c0_i32_1 = arith.constant 0 : i32
    return %c0_i32, %c0_i32_0 : i32, i32
  }
  func.func @transform_7(%arg0: i32) -> (i32, i32) {
    %c0_i32 = arith.constant 0 : i32
    %c0_i32_0 = arith.constant 0 : i32
    %c0_i32_1 = arith.constant 0 : i32
    return %c0_i32, %c0_i32_0 : i32, i32
  }
  func.func @transform_8(%arg0: i32) -> (i32, i32) {
    %c0_i32 = arith.constant 0 : i32
    %c0_i32_0 = arith.constant 0 : i32
    %c0_i32_1 = arith.constant 0 : i32
    return %c0_i32, %c0_i32_0 : i32, i32
  }
  func.func @transform_9(%arg0: i32) -> (i32, i32) {
    %c0_i32 = arith.constant 0 : i32
    %c0_i32_0 = arith.constant 0 : i32
    %c0_i32_1 = arith.constant 0 : i32
    return %c0_i32, %c0_i32_0 : i32, i32
  }
  func.func @transform_10(%arg0: i32) -> (i32, i32, i32) {
    %c0_i32 = arith.constant 0 : i32
    %c0_i32_0 = arith.constant 0 : i32
    %c0_i32_1 = arith.constant 0 : i32
    return %arg0, %c0_i32, %c0_i32_0 : i32, i32, i32
  }
}

</mosaic_0001>

<bundles_post_ra>
// kernel: tpu_custom_call.1
= control target key start
LH: loop header
LB: loop body
LE: loop exit
PB: predicated region body
PF: predicated region fallthrough
CT: control target
= control target key end

     0   :  { %s6944_s0 = inlined_call_operand.hbm [shape: f32[2,256,128], index: 0, kind: input, shape index: {}]   ;;  %s6945_s1 = inlined_call_operand.hbm [shape: f32[128,128], index: 1, kind: input, shape index: {}]   ;;  %s6946_s2 = inlined_call_operand.vmem [shape: f32[1,128], index: 2, kind: input, shape index: {}]   ;;  %s6947_s3 = inlined_call_operand.vmem [shape: f32[1,128], index: 3, kind: input, shape index: {}]   ;;  %s6948_s4 = inlined_call_operand.hbm [shape: f32[9,128,128], index: 4, kind: input, shape index: {}]   ;;  %s6949_s5 = inlined_call_operand.vmem [shape: f32[1,128], index: 5, kind: input, shape index: {}]   ;;  %s6950_s6 = inlined_call_operand.vmem [shape: f32[1,128], index: 6, kind: input, shape index: {}]   ;;  %s6951_s7 = inlined_call_operand.hbm [shape: f32[128,128], index: 7, kind: input, shape index: {}]   ;;  %s6952_s8 = inlined_call_operand.vmem [shape: f32[1,128], index: 8, kind: input, shape index: {}]   ;;  %s6953_s9 = inlined_call_operand.vmem [shape: f32[1,128], index: 9, kind: input, shape index: {}]   ;;  %s6954_s10 = inlined_call_operand.hbm [shape: f32[2,256,128], index: 10, kind: output, shape index: {}]  }
   0x1   :  { %7121 = sst [smem:[#allocation120_spill]] %s6945_s1 }
   0x2   :  { %7122 = sst [smem:[#allocation121_spill]] %s6948_s4 }
   0x3   :  { %7123 = sst [smem:[#allocation122_spill]] %s6951_s7 }
   0x4   :  { %15 = vsyncpa [#allocation4], 0 }
   0x5   :  { %17 = vsyncpa [#allocation4 + $0x1], 0 }
   0x6   :  { %18 = vsyncpa [#allocation7], 0 }
   0x7   :  { %19 = vsyncpa [#allocation10], 0 }
   0x8   :  { %20 = vsyncpa [#allocation5], 0 }
   0x9   :  { %22 = vsyncpa [#allocation5 + $0x1], 0  ;;  %s4032_s13 = smov 0   ;;  %s4034_s14 = smov 0  }
   0xa   :  { %s4036_s15 = smov 0   ;;  %s4038_s16 = smov 0  }
   0xb LB: > { %s4053_s17 = sadd.s32 4294967295, %s3966_s16   ;;  %s3578_s18 = sadd.s32 4294967294, %s3966_s16   ;;  %s3966_s16 = sphi %s4038_s16, %s7554_s16   ;;  %s3962_s15 = sphi %s4036_s15, %s7553_s15   ;;  %s3958_s14 = sphi %s4034_s14, %s7552_s14   ;;  %s3954_s13 = sphi %s4032_s13, %s7551_s13  }
   0xc   : > { %p48_p0 = scmp.ne.s32.totalorder %s3958_s14, %s3954_s13  ;;  %p49_p1 = scmp.eq.s32.totalorder %s4053_s17, 0 }
   0xd   : > { %p261_p2 = scmp.eq.s32.totalorder %s4053_s17, 1  ;;  %p267_p3 = scmp.eq.s32.totalorder %s3578_s18, 1 }
   0xe   : > { %p4062_p4 = por %p49_p1, %p48_p0  ;;  %p3579_p5 = scmp.ge.s32.totalorder %s3966_s16, 1 }
   0xf   : > { %p4067_p6 = por %p267_p3, %p48_p0  ;;  %p274_p7 = scmp.lt.s32.totalorder %s3966_s16, 3 }
  0x10   : > { %s7126_s1 = sld [smem:[#allocation120_spill]]  ;;  %s3968_s25 = smov [#allocation6]  }
  0x11   : > { %p4075_p8 = pnand %p3579_p5, %p274_p7  ;;  %s287_s26 = sshll.u32 %s3968_s25, 4  ;;  %s288_s26 = int_to_ptr.vmem [resolvable:$true] %s287_s26 }
  0x12   : > { %s7129_s4 = sld [smem:[#allocation121_spill]]  ;;  %s6955_s11 = smov 128  }
  0x13   : > { %p3664_p9 = pneg %p4075_p8  ;;  %s6956_s12 = smov 8  }
  0x14   : > { %s3971_s18 = smov [#allocation8]   ;;  %s7130_s7 = sld [smem:[#allocation122_spill]] }
  0x15   : > { %p4083_p10 = pnand %p3664_p9, %p49_p1  ;;  %s307_s21 = sshll.u32 %s3971_s18, 4  ;;  %s308_s21 = int_to_ptr.vmem [resolvable:$true] %s307_s21 }
  0x16   : > { %s285_s23 = sshll.u32 %s7126_s1, 4  ;;  %s4105_s29 = sadd.s32 1, %s3966_s16   ;;  %s286_s23 = int_to_ptr.hbm [resolvable:$true] %s285_s23 }
  0x17   : > { %3667 = dma.hbm_to_vmem [thread:$0]  (!%p4083_p10), %s286_s23, 2048, %s288_s26, [#allocation7], %s6955_s11, %s6955_s11, %s6956_s12  }
  0x18   : > { %s305_s30 = sshll.u32 %s7129_s4, 4  ;;  %s3972_s23 = smov [#allocation9]   ;;  %s306_s30 = int_to_ptr.hbm [resolvable:$true] %s305_s30 }
  0x19   : > { %3670 = dma.hbm_to_vmem [thread:$0]  (!%p4083_p10), %s306_s30, 18432, %s308_s21, [#allocation7], %s6955_s11, %s6955_s11, %s6956_s12  }
  0x1a   : > { %s325_s28 = sshll.u32 %s7130_s7, 4  ;;  %s327_s26 = sshll.u32 %s3972_s23, 4  ;;  %s326_s28 = int_to_ptr.hbm [resolvable:$true] %s325_s28  ;;  %s328_s26 = int_to_ptr.vmem [resolvable:$true] %s327_s26 }
  0x1b   : > { %3673 = dma.hbm_to_vmem [thread:$0]  (!%p4083_p10), %s326_s28, 2048, %s328_s26, [#allocation10], %s6955_s11, %s6955_s11, %s6956_s12  }
  0x1c   : > { %s32_s18 = ssub.s32 %s3966_s16, %s4105_s29  ;;  %s35_s22 = sadd.s32 1, %s3962_s15 }
  0x1d   : > { %p33_p12 = scmp.eq.s32.totalorder %s32_s18, 0  ;;  %p42_p13 = scmp.ne.s32.totalorder %s3962_s15, %s3958_s14 }
  0x1e   : > { %p43_p0 = scmp.eq.s32.totalorder %s3966_s16, 0  ;;  %p3685_p5 = scmp.lt.s32.totalorder %s3966_s16, 2 }
  0x1f   : > { %s4119_s25 = scalar_select %p33_p12, %s3962_s15, %s35_s22  }
  0x20   : > { %p4123_p3 = por %p261_p2, %p42_p13  ;;  %s347_s21 = sand.u32 1, %s3962_s15  }
  0x21   : > { %7131 = sst [smem:[#allocation16_spill]] %s4119_s25  ;;  %s3598_s27 = sshll.u32 %s3966_s16, 8 }
  0x22   : > { %p44_p7 = por %p43_p0, %p42_p13  ;;  %s3584_s23 = sshll.u32 %s347_s21, 8 }
  0x23   : > { %s356_s28 = scalar_lea.hbm %s6944_s0, %s3598_s27  ;;  %s351_s18 = scalar_lea.vmem [#allocation3], %s3584_s23 }
  0x24   : > { %s357_s26 = sshll.u32 %s356_s28, 4  ;;  %s359_s11 = sshll.u32 %s351_s18, 4  ;;  %s358_s26 = int_to_ptr.hbm [resolvable:$true] %s357_s26  ;;  %s360_s11 = int_to_ptr.vmem [resolvable:$true] %s359_s11 }
  0x25   : > { %p4133_p9 = pnand %p3685_p5, %p44_p7  ;;  %s348_s12 = scalar_lea.sflag [#allocation4], %s347_s21 }
  0x26   : > { %s3862_s7 = sshra.s32 %s358_s26, 4  ;;  %s3869_s27 = scalar_lea.hbm %s6944_s0, 512  ;;  %s3863_s7 = int_to_ptr.hbm [resolvable:$true] %s3862_s7 }
  0x27   : > { %s3864_s25 = scalar_lea.hbm %s3863_s7, 256  ;;  %p3866_p10 = pneg %p4133_p9 }
  0x28   : > { %p3865_p2 = scmp.ne.s32.totalorder %s3863_s7, %s3864_s25  ;;  %p3870_p0 = scmp.lt.s32.totalorder %s3863_s7, %s6944_s0 }
  0x29   : > { %p3871_p5 = scmp.lt.s32.totalorder %s3869_s27, %s3864_s25 }
  0x2a   : > { %p3867_p12 = pnand %p3866_p10, %p3865_p2 }
  0x2b   : > { %p3872_p7 = por %p3871_p5, %p3870_p0 }
  0x2c   : > { %p3868_p13 = pneg %p3867_p12 }
  0x2e   : > { %p3873_p11 = pnand %p3872_p7, %p3868_p13 }
  0x30   : > { %3876 = shalt.err (!%p3873_p11)
}
  0x31   : > { %s7134_s21 = smov 8   ;;  %s7135_s18 = smov 128  }
  0x32   : > { %3677 = dma.hbm_to_vmem [thread:$0]  (!%p4133_p9), %s358_s26, 4096, %s360_s11, %s348_s12, %s7135_s18, %s7135_s18, %s7134_s21  }
  0x33   : > { %371 = sbr.rel (%p4075_p8) target bundleno = 1500 (0x5dc), region = 60 }
  0x38   : > { %s4153_s1 = sand.u32 1, %s3958_s14  }
  0x39   : > { %s3588_s7 = sshll.u32 %s4153_s1, 8  ;;  %s374_s25 = scalar_lea.sflag [#allocation4], %s4153_s1 }
  0x3a   : > { %s4159_s4 = scalar_lea.vmem [#allocation3], %s3588_s7 }
  0x3b   : > { %3937 = dma.done.wait (%p4062_p4), %s374_s25, 4096  }
  0x3c   : > { %3939 = vsyncadd (%p4062_p4), %s374_s25, 4294963200 }
  0x3d   : > { %3941 = dma.done.wait (%p49_p1), [#allocation7], 20480  }
  0x3e   : > { %3943 = vsyncadd (%p49_p1), [#allocation7], 4294946816 }
  0x3f   : > { %3945 = dma.done.wait (%p49_p1), [#allocation10], 2048  }
  0x40   : > { %3947 = vsyncadd (%p49_p1), [#allocation10], 4294965248  ;;  %v477_v0 = vld [vmem:[#allocation6 + $0x78] sm:$0xff]  ;;  %v476_v1 = vld [vmem:[#allocation6 + $0x70] sm:$0xff]  ;;  %vm1469_vm4 = vcmask 1046528   ;;  %vm1825_vm5 = vcmask 1045504  }
  0x41   : > { %478 = vmatpush.msra.mxu0 %v477_v0  ;;  %3600 = vmatpush.msra.mxu3 %v477_v0  ;;  %v475_v2 = vld [vmem:[#allocation6 + $0x68] sm:$0xff]  ;;  %v474_v3 = vld [vmem:[#allocation6 + $0x60] sm:$0xff]  ;;  %v473_v4 = vld [vmem:[#allocation6 + $0x58] sm:$0xff]  ;;  %s3461_s26 = scalar_lea.sflag [#allocation5], %s4153_s1  ;;  %s3912_s21 = scalar_lea.hbm %s6954_s10, 512 }
  0x42   : > { %v472_v5 = vld [vmem:[#allocation6 + $0x50] sm:$0xff]  ;;  %v471_v6 = vld [vmem:[#allocation6 + $0x48] sm:$0xff]  ;;  %v470_v7 = vld [vmem:[#allocation6 + $0x40] sm:$0xff] }
  0x43   : > { %479 = vmatpush.msra.mxu0 %v476_v1  ;;  %3601 = vmatpush.msra.mxu3 %v476_v1  ;;  %v469_v8 = vld [vmem:[#allocation6 + $0x38] sm:$0xff]  ;;  %v468_v9 = vld [vmem:[#allocation6 + $0x30] sm:$0xff]  ;;  %v467_v10 = vld [vmem:[#allocation6 + $0x28] sm:$0xff] }
  0x44   : > { %v466_v11 = vld [vmem:[#allocation6 + $0x20] sm:$0xff]  ;;  %v465_v12 = vld [vmem:[#allocation6 + $0x18] sm:$0xff]  ;;  %v464_v13 = vld [vmem:[#allocation6 + $0x10] sm:$0xff] }
  0x45   : > { %480 = vmatpush.msra.mxu0 %v475_v2  ;;  %3602 = vmatpush.msra.mxu3 %v475_v2  ;;  %v463_v14 = vld [vmem:[#allocation6 + $0x8] sm:$0xff]  ;;  %v462_v15 = vld [vmem:[#allocation6] sm:$0xff]  ;;  %v4182_v18 = vld [vmem:[%s4159_s4 + $0x10] sm:$0xff] }
  0x46   : > { %v4174_v16 = vld [vmem:[%s4159_s4] sm:$0xff]  ;;  %v4178_v17 = vld [vmem:[%s4159_s4 + $0x8] sm:$0xff]  ;;  %v4186_v19 = vld [vmem:[%s4159_s4 + $0x18] sm:$0xff] }
  0x47   : > { %481 = vmatpush.msra.mxu0 %v474_v3  ;;  %3603 = vmatpush.msra.mxu3 %v474_v3  ;;  %v4190_v20 = vld [vmem:[%s4159_s4 + $0x20] sm:$0xff]  ;;  %v4194_v21 = vld [vmem:[%s4159_s4 + $0x28] sm:$0xff]  ;;  %v4198_v22 = vld [vmem:[%s4159_s4 + $0x30] sm:$0xff] }
  0x48   : > { %v4202_v23 = vld [vmem:[%s4159_s4 + $0x38] sm:$0xff]  ;;  %v4206_v24 = vld [vmem:[%s4159_s4 + $0x40] sm:$0xff]  ;;  %v4210_v25 = vld [vmem:[%s4159_s4 + $0x48] sm:$0xff] }
  0x49   : > { %482 = vmatpush.msra.mxu0 %v473_v4  ;;  %3604 = vmatpush.msra.mxu3 %v473_v4  ;;  %v903_v26 = vld [vmem:[#allocation9 + $0x78] sm:$0xff]  ;;  %v902_v27 = vld [vmem:[#allocation9 + $0x70] sm:$0xff]  ;;  %v901_v28 = vld [vmem:[#allocation9 + $0x68] sm:$0xff] }
  0x4a   : > { %904 = vmatpush.msra.mxu1 %v903_v26  ;;  %v900_v29 = vld [vmem:[#allocation9 + $0x60] sm:$0xff]  ;;  %v4214_v30 = vld [vmem:[%s4159_s4 + $0x50] sm:$0xff]  ;;  %v899_v31 = vld [vmem:[#allocation9 + $0x58] sm:$0xff] }
  0x4b   : > { %483 = vmatpush.msra.mxu0 %v472_v5  ;;  %3605 = vmatpush.msra.mxu3 %v472_v5  ;;  %v898_v32 = vld [vmem:[#allocation9 + $0x50] sm:$0xff]  ;;  %v897_v33 = vld [vmem:[#allocation9 + $0x48] sm:$0xff]  ;;  %v896_v34 = vld [vmem:[#allocation9 + $0x40] sm:$0xff] }
  0x4c   : > { %905 = vmatpush.msra.mxu1 %v902_v27  ;;  %v4218_v35 = vld [vmem:[%s4159_s4 + $0x58] sm:$0xff]  ;;  %v894_v37 = vld [vmem:[#allocation9 + $0x30] sm:$0xff]  ;;  %v893_v38 = vld [vmem:[#allocation9 + $0x28] sm:$0xff] }
  0x4d   : > { %484 = vmatpush.msra.mxu0 %v471_v6  ;;  %3606 = vmatpush.msra.mxu3 %v471_v6  ;;  %v895_v36 = vld [vmem:[#allocation9 + $0x38] sm:$0xff]  ;;  %v4222_v39 = vld [vmem:[%s4159_s4 + $0x60] sm:$0xff]  ;;  %v890_v42 = vld [vmem:[#allocation9 + $0x10] sm:$0xff] }
  0x4e   : > { %906 = vmatpush.msra.mxu1 %v901_v28  ;;  %v892_v40 = vld [vmem:[#allocation9 + $0x20] sm:$0xff]  ;;  %v891_v41 = vld [vmem:[#allocation9 + $0x18] sm:$0xff]  ;;  %v889_v43 = vld [vmem:[#allocation9 + $0x8] sm:$0xff] }
  0x4f   : > { %485 = vmatpush.msra.mxu0 %v470_v7  ;;  %3607 = vmatpush.msra.mxu3 %v470_v7  ;;  %v4226_v44 = vld [vmem:[%s4159_s4 + $0x68] sm:$0xff]  ;;  %v888_v45 = vld [vmem:[#allocation9] sm:$0xff]  ;;  %v4232_v47 = vld [vmem:[%s4159_s4 + $0x70] sm:$0xff] }
  0x50   : > { %907 = vmatpush.msra.mxu1 %v900_v29  ;;  %v454_v46 = vld [vmem:[%s4159_s4 + $0xc0] sm:$0xff]  ;;  %v455_v48 = vld [vmem:[%s4159_s4 + $0xc8] sm:$0xff]  ;;  %v445_v49 = vld [vmem:[%s4159_s4 + $0x78] sm:$0xff] }
  0x51   : > { %486 = vmatpush.msra.mxu0 %v469_v8  ;;  %3608 = vmatpush.msra.mxu3 %v469_v8  ;;  %v456_v50 = vld [vmem:[%s4159_s4 + $0xd0] sm:$0xff]  ;;  %v446_v52 = vld [vmem:[%s4159_s4 + $0x80] sm:$0xff]  ;;  %v457_v53 = vld [vmem:[%s4159_s4 + $0xd8] sm:$0xff] }
  0x52   : > { %908 = vmatpush.msra.mxu1 %v899_v31  ;;  %v447_v55 = vld [vmem:[%s4159_s4 + $0x88] sm:$0xff]  ;;  %v458_v56 = vld [vmem:[%s4159_s4 + $0xe0] sm:$0xff]  ;;  %v448_v58 = vld [vmem:[%s4159_s4 + $0x90] sm:$0xff] }
  0x53   : > { %487 = vmatpush.msra.mxu0 %v468_v9  ;;  %3609 = vmatpush.msra.mxu3 %v468_v9  ;;  %v459_v59 = vld [vmem:[%s4159_s4 + $0xe8] sm:$0xff]  ;;  %v449_v61 = vld [vmem:[%s4159_s4 + $0x98] sm:$0xff]  ;;  %v460_v62 = vld [vmem:[%s4159_s4 + $0xf0] sm:$0xff] }
  0x54   : > { %909 = vmatpush.msra.mxu1 %v898_v32  ;;  %v450_v0 = vld [vmem:[%s4159_s4 + $0xa0] sm:$0xff]  ;;  %v461_v1 = vld [vmem:[%s4159_s4 + $0xf8] sm:$0xff]  ;;  %v451_v3 = vld [vmem:[%s4159_s4 + $0xa8] sm:$0xff] }
  0x55   : > { %488 = vmatpush.msra.mxu0 %v467_v10  ;;  %3610 = vmatpush.msra.mxu3 %v467_v10  ;;  %v452_v5 = vld [vmem:[%s4159_s4 + $0xb0] sm:$0xff]  ;;  %v4276_v7 = vld [vmem:[%s4159_s4 + $0xb8] sm:$0xff]  ;;  %s6701_s4 = scalar_lea.vmem [#allocation11], %s3588_s7  ;;  %s3599_s7 = sshll.u32 %s4053_s17, 8 }
  0x56   : > { %910 = vmatpush.msra.mxu1 %v897_v33  ;;  %s3472_s11 = scalar_lea.hbm %s6954_s10, %s3599_s7  ;;  %s3473_s17 = sshll.u32 %s6701_s4, 4  ;;  %s3474_s17 = int_to_ptr.vmem [resolvable:$true] %s3473_s17 }
  0x57   : > { %489 = vmatpush.msra.mxu0 %v466_v11  ;;  %3611 = vmatpush.msra.mxu3 %v466_v11  ;;  %s3475_s12 = sshll.u32 %s3472_s11, 4  ;;  %s3476_s12 = int_to_ptr.hbm [resolvable:$true] %s3475_s12 }
  0x58   : > { %911 = vmatpush.msra.mxu1 %v896_v34  ;;  %s3906_s22 = sshra.s32 %s3476_s12, 4  ;;  %s3907_s22 = int_to_ptr.hbm [resolvable:$true] %s3906_s22 }
  0x59   : > { %490 = vmatpush.msra.mxu0 %v465_v12  ;;  %3612 = vmatpush.msra.mxu3 %v465_v12  ;;  %s3908_s27 = scalar_lea.hbm %s3907_s22, 256  ;;  %p3913_p11 = scmp.lt.s32.totalorder %s3907_s22, %s6954_s10 }
  0x5a   : > { %912 = vmatpush.msra.mxu1 %v895_v36  ;;  %p3909_p1 = scmp.ne.s32.totalorder %s3907_s22, %s3908_s27  ;;  %p3914_p9 = scmp.lt.s32.totalorder %s3912_s21, %s3908_s27 }
  0x5b   : > { %491 = vmatpush.msra.mxu0 %v464_v13  ;;  %3613 = vmatpush.msra.mxu3 %v464_v13 }
  0x5c   : > { %913 = vmatpush.msra.mxu1 %v894_v37  ;;  %p3910_p4 = pnand %p3909_p1, %p4123_p3  ;;  %p3915_p2 = por %p3914_p9, %p3913_p11 }
  0x5d   : > { %492 = vmatpush.msra.mxu0 %v463_v14  ;;  %3614 = vmatpush.msra.mxu3 %v463_v14 }
  0x5e   : > { %914 = vmatpush.msra.mxu1 %v893_v38  ;;  %p3911_p8 = pneg %p3910_p4 }
  0x5f   : > { %493 = vmatpush.msra.mxu0 %v462_v15  ;;  %3615 = vmatpush.msra.mxu3 %v462_v15 }
  0x60   : > { %494 = vmatmul.f32.vlgmr.msra.gmra.mxu0 %v4174_v16  ;;  %915 = vmatpush.msra.mxu1 %v892_v40  ;;  %p3916_p10 = pnand %p3915_p2, %p3911_p8 }
  0x61   : > { %3616 = vmatpush.msrb.mxu3 %v903_v26 }
  0x62   : > { %916 = vmatpush.msra.mxu1 %v891_v41  ;;  %566 = vmatmul.f32.vlgmr.msra.gmra.mxu3 %v454_v46 }
  0x63   : > { %3617 = vmatpush.msrb.mxu3 %v902_v27 }
  0x64   : > { %917 = vmatpush.msra.mxu1 %v890_v42 }
  0x65   : > { %3618 = vmatpush.msrb.mxu3 %v901_v28 }
  0x66   : > { %918 = vmatpush.msra.mxu1 %v889_v43 }
  0x67   : > { %3619 = vmatpush.msrb.mxu3 %v900_v29 }
  0x68   : > { %497 = vmatmul.f32.gmra.mxu0 %v4178_v17  ;;  %919 = vmatpush.msra.mxu1 %v888_v45 }
  0x69   : > { %3620 = vmatpush.msrb.mxu3 %v899_v31  ;;  %920 = vmatmul.f32.vlgmr.msra.gmra.mxu1 %v4174_v16 }
  0x6a   : > { %569 = vmatmul.f32.gmra.mxu3 %v455_v48 }
  0x6b   : > { %3621 = vmatpush.msrb.mxu3 %v898_v32 }
  0x6d   : > { %3622 = vmatpush.msrb.mxu3 %v897_v33 }
  0x6f   : > { %3623 = vmatpush.msrb.mxu3 %v896_v34 }
  0x70   : > { %500 = vmatmul.f32.gmra.mxu0 %v4182_v18 }
  0x71   : > { %3624 = vmatpush.msrb.mxu3 %v895_v36  ;;  %923 = vmatmul.f32.gmra.mxu1 %v4178_v17 }
  0x72   : > { %572 = vmatmul.f32.gmra.mxu3 %v456_v50 }
  0x73   : > { %3625 = vmatpush.msrb.mxu3 %v894_v37 }
  0x75   : > { %3626 = vmatpush.msrb.mxu3 %v893_v38 }
  0x77   : > { %3627 = vmatpush.msrb.mxu3 %v892_v40 }
  0x78   : > { %503 = vmatmul.f32.gmra.mxu0 %v4186_v19 }
  0x79   : > { %3628 = vmatpush.msrb.mxu3 %v891_v41  ;;  %926 = vmatmul.f32.gmra.mxu1 %v4182_v18 }
  0x7a   : > { %575 = vmatmul.f32.gmra.mxu3 %v457_v53 }
  0x7b   : > { %3629 = vmatpush.msrb.mxu3 %v890_v42 }
  0x7d   : > { %3630 = vmatpush.msrb.mxu3 %v889_v43 }
  0x7f   : > { %3631 = vmatpush.msrb.mxu3 %v888_v45 }
  0x80   : > { %506 = vmatmul.f32.gmra.mxu0 %v4190_v20 }
  0x81   : > { %929 = vmatmul.f32.gmra.mxu1 %v4186_v19 }
  0x82   : > { %578 = vmatmul.f32.gmra.mxu3 %v458_v56 }
  0x88   : > { %509 = vmatmul.f32.gmra.mxu0 %v4194_v21 }
  0x89   : > { %932 = vmatmul.f32.gmra.mxu1 %v4190_v20 }
  0x8a   : > { %581 = vmatmul.f32.gmra.mxu3 %v459_v59 }
  0x90   : > { %512 = vmatmul.f32.gmra.mxu0 %v4198_v22 }
  0x91   : > { %935 = vmatmul.f32.gmra.mxu1 %v4194_v21 }
  0x92   : > { %584 = vmatmul.f32.gmra.mxu3 %v460_v62 }
  0x98   : > { %515 = vmatmul.f32.gmra.mxu0 %v4202_v23 }
  0x99   : > { %938 = vmatmul.f32.gmra.mxu1 %v4198_v22 }
  0x9a   : > { %587 = vmatmul.f32.gmra.mxu3 %v461_v1 }
  0xa0   : > { %518 = vmatmul.f32.gmra.mxu0 %v4206_v24 }
  0xa1   : > { %941 = vmatmul.f32.gmra.mxu1 %v4202_v23 }
  0xa2   : > { %992 = vmatmul.f32.vlgmr.msrb.gmra.mxu3 %v454_v46 }
  0xa8   : > { %521 = vmatmul.f32.gmra.mxu0 %v4210_v25 }
  0xa9   : > { %944 = vmatmul.f32.gmra.mxu1 %v4206_v24 }
  0xaa   : > { %995 = vmatmul.f32.gmra.mxu3 %v455_v48 }
  0xb0   : > { %524 = vmatmul.f32.gmra.mxu0 %v4214_v30 }
  0xb1   : > { %947 = vmatmul.f32.gmra.mxu1 %v4210_v25 }
  0xb2   : > { %998 = vmatmul.f32.gmra.mxu3 %v456_v50 }
  0xb8   : > { %527 = vmatmul.f32.gmra.mxu0 %v4218_v35 }
  0xb9   : > { %950 = vmatmul.f32.gmra.mxu1 %v4214_v30 }
  0xba   : > { %1001 = vmatmul.f32.gmra.mxu3 %v457_v53 }
  0xc0   : > { %530 = vmatmul.f32.gmra.mxu0 %v4222_v39 }
  0xc1   : > { %953 = vmatmul.f32.gmra.mxu1 %v4218_v35 }
  0xc2   : > { %1004 = vmatmul.f32.gmra.mxu3 %v458_v56 }
  0xc8   : > { %533 = vmatmul.f32.gmra.mxu0 %v4226_v44 }
  0xc9   : > { %956 = vmatmul.f32.gmra.mxu1 %v4222_v39 }
  0xca   : > { %1007 = vmatmul.f32.gmra.mxu3 %v459_v59 }
  0xd0   : > { %536 = vmatmul.f32.gmra.mxu0 %v4232_v47 }
  0xd1   : > { %959 = vmatmul.f32.gmra.mxu1 %v4226_v44 }
  0xd2   : > { %1010 = vmatmul.f32.gmra.mxu3 %v460_v62 }
  0xd8   : > { %539 = vmatmul.f32.gmra.mxu0 %v445_v49 }
  0xd9   : > { %962 = vmatmul.f32.gmra.mxu1 %v4232_v47 }
  0xda   : > { %1013 = vmatmul.f32.gmra.mxu3 %v461_v1 }
  0xdd   : > { %v4240_v51 = vpop.f32.mrf.mxu0 }
  0xde   : > { %v638_v21 = vmul.f32 %v4240_v51, %v4240_v51 }
  0xe0   : > { %542 = vmatmul.f32.gmra.mxu0 %v446_v52 }
  0xe1   : > { %965 = vmatmul.f32.gmra.mxu1 %v445_v49 }
  0xe5   : > { %v4245_v54 = vpop.f32.mrf.mxu0  ;;  %v4300_v16 = vpop.f32.mrf.mxu3 }
  0xe6   : > { %v639_v20 = vmul.f32 %v4245_v54, %v4245_v54  ;;  %v593_v22 = vadd.f32 %v4245_v54, %v4240_v51 }
  0xe8   : > { %545 = vmatmul.f32.gmra.mxu0 %v447_v55  ;;  %v670_v24 = vadd.f32 %v639_v20, %v638_v21 }
  0xe9   : > { %968 = vmatmul.f32.gmra.mxu1 %v446_v52 }
  0xed   : > { %v4250_v57 = vpop.f32.mrf.mxu0  ;;  %v4306_v19 = vpop.f32.mrf.mxu3 }
  0xee   : > { %v640_v23 = vmul.f32 %v4250_v57, %v4250_v57  ;;  %v594_v25 = vadd.f32 %v593_v22, %v4250_v57 }
  0xf0   : > { %548 = vmatmul.f32.gmra.mxu0 %v448_v58  ;;  %v671_v28 = vadd.f32 %v670_v24, %v640_v23 }
  0xf1   : > { %971 = vmatmul.f32.gmra.mxu1 %v447_v55 }
  0xf5   : > { %v4255_v60 = vpop.f32.mrf.mxu0  ;;  %v4324_v31 = vpop.f32.mrf.mxu3 }
  0xf6   : > { %v641_v26 = vmul.f32 %v4255_v60, %v4255_v60  ;;  %v595_v29 = vadd.f32 %v594_v25, %v4255_v60 }
  0xf8   : > { %551 = vmatmul.f32.gmra.mxu0 %v449_v61  ;;  %v672_v32 = vadd.f32 %v671_v28, %v641_v26 }
  0xf9   : > { %974 = vmatmul.f32.gmra.mxu1 %v448_v58 }
  0xfd   : > { %v4260_v63 = vpop.f32.mrf.mxu0  ;;  %v4343_v48 = vpop.f32.mrf.mxu3 }
  0xfe   : > { %v642_v30 = vmul.f32 %v4260_v63, %v4260_v63  ;;  %v596_v33 = vadd.f32 %v595_v29, %v4260_v63 }
 0x100   : > { %554 = vmatmul.f32.gmra.mxu0 %v450_v0  ;;  %v673_v35 = vadd.f32 %v672_v32, %v642_v30 }
 0x101   : > { %977 = vmatmul.f32.gmra.mxu1 %v449_v61 }
 0x105   : > { %v4265_v2 = vpop.f32.mrf.mxu0  ;;  %v4363_v22 = vpop.f32.mrf.mxu3 }
 0x106   : > { %v643_v34 = vmul.f32 %v4265_v2, %v4265_v2  ;;  %v597_v36 = vadd.f32 %v596_v33, %v4265_v2 }
 0x108   : > { %557 = vmatmul.f32.gmra.mxu0 %v451_v3  ;;  %v674_v38 = vadd.f32 %v673_v35, %v643_v34 }
 0x109   : > { %980 = vmatmul.f32.gmra.mxu1 %v450_v0 }
 0x10d   : > { %v4269_v4 = vpop.f32.mrf.mxu0 }
 0x10e   : > { %v644_v37 = vmul.f32 %v4269_v4, %v4269_v4  ;;  %v598_v39 = vadd.f32 %v597_v36, %v4269_v4 }
 0x110   : > { %560 = vmatmul.f32.gmra.mxu0 %v452_v5  ;;  %v675_v42 = vadd.f32 %v674_v38, %v644_v37 }
 0x111   : > { %983 = vmatmul.f32.gmra.mxu1 %v451_v3 }
 0x115   : > { %v4273_v6 = vpop.f32.mrf.mxu0 }
 0x116   : > { %v645_v40 = vmul.f32 %v4273_v6, %v4273_v6  ;;  %v599_v43 = vadd.f32 %v598_v39, %v4273_v6 }
 0x118   : > { %563 = vmatmul.f32.gmra.mxu0 %v4276_v7  ;;  %v676_v45 = vadd.f32 %v675_v42, %v645_v40  ;;  %v4384_v42 = vpop.f32.mrf.mxu3 }
 0x119   : > { %986 = vmatmul.f32.gmra.mxu1 %v452_v5 }
 0x11d   : > { %v4280_v8 = vpop.f32.mrf.mxu0 }
 0x11e   : > { %v646_v44 = vmul.f32 %v4280_v8, %v4280_v8  ;;  %v600_v46 = vadd.f32 %v599_v43, %v4280_v8 }
 0x120   : > { %v677_v49 = vadd.f32 %v676_v45, %v646_v44 }
 0x121   : > { %989 = vmatmul.f32.gmra.mxu1 %v4276_v7 }
 0x125   : > { %v4283_v9 = vpop.f32.mrf.mxu0 }
 0x126   : > { %v647_v47 = vmul.f32 %v4283_v9, %v4283_v9  ;;  %v601_v50 = vadd.f32 %v600_v46, %v4283_v9 }
 0x128   : > { %v678_v53 = vadd.f32 %v677_v49, %v647_v47 }
 0x12d   : > { %v4286_v10 = vpop.f32.mrf.mxu0 }
 0x12e   : > { %v648_v52 = vmul.f32 %v4286_v10, %v4286_v10  ;;  %v602_v55 = vadd.f32 %v601_v50, %v4286_v10 }
 0x130   : > { %v679_v59 = vadd.f32 %v678_v53, %v648_v52 }
 0x135   : > { %v4289_v11 = vpop.f32.mrf.mxu0 }
 0x136   : > { %v649_v56 = vmul.f32 %v4289_v11, %v4289_v11  ;;  %v603_v61 = vadd.f32 %v602_v55, %v4289_v11 }
 0x138   : > { %v680_v0 = vadd.f32 %v679_v59, %v649_v56 }
 0x13d   : > { %v4292_v12 = vpop.f32.mrf.mxu0 }
 0x13e   : > { %v650_v62 = vmul.f32 %v4292_v12, %v4292_v12  ;;  %v604_v1 = vadd.f32 %v603_v61, %v4292_v12 }
 0x140   : > { %v681_v5 = vadd.f32 %v680_v0, %v650_v62 }
 0x145   : > { %v4294_v13 = vpop.f32.mrf.mxu0 }
 0x146   : > { %v651_v3 = vmul.f32 %v4294_v13, %v4294_v13  ;;  %v605_v20 = vadd.f32 %v604_v1, %v4294_v13  ;;  %v4401_v1 = vpop.f32.mrf.mxu3 }
 0x148   : > { %v682_v23 = vadd.f32 %v681_v5, %v651_v3  ;;  %v662_v3 = vmul.f32 %v4300_v16, %v4300_v16 }
 0x14d   : > { %v4296_v14 = vpop.f32.mrf.mxu0 }
 0x14e   : > { %v652_v21 = vmul.f32 %v4296_v14, %v4296_v14  ;;  %v606_v24 = vadd.f32 %v605_v20, %v4296_v14 }
 0x150   : > { %v683_v26 = vadd.f32 %v682_v23, %v652_v21  ;;  %v3973_v21 = vmov 256.0   ;;  %v663_v23 = vmul.f32 %v4306_v19, %v4306_v19 }
 0x151   : > { %3737 = vrcp.f32 %v3973_v21 }
 0x155   : > { %v4298_v15 = vpop.f32.mrf.mxu0 }
 0x156   : > { %v653_v7 = vmul.f32 %v4298_v15, %v4298_v15  ;;  %v607_v28 = vadd.f32 %v606_v24, %v4298_v15 }
 0x158   : > { %v684_v30 = vadd.f32 %v683_v26, %v653_v7  ;;  %v664_v26 = vmul.f32 %v4324_v31, %v4324_v31 }
 0x15d   : > { %v4302_v17 = vpop.f32.mrf.mxu0 }
 0x15e   : > { %v654_v29 = vmul.f32 %v4302_v17, %v4302_v17  ;;  %v608_v32 = vadd.f32 %v607_v28, %v4302_v17 }
 0x160   : > { %v685_v34 = vadd.f32 %v684_v30, %v654_v29  ;;  %v3738_v30 = vpop.eup %3737 }
 0x161   : > { %vm635_vm0 = vweird.f32 %v3738_v30 }
 0x165   : > { %v4304_v18 = vpop.f32.mrf.mxu0 }
 0x166   : > { %v655_v33 = vmul.f32 %v4304_v18, %v4304_v18  ;;  %v609_v35 = vadd.f32 %v608_v32, %v4304_v18  ;;  %v665_v32 = vmul.f32 %v4343_v48, %v4343_v48 }
 0x168   : > { %v686_v37 = vadd.f32 %v685_v34, %v655_v33 }
 0x16d   : > { %v4319_v27 = vpop.f32.mrf.mxu0 }
 0x16e   : > { %v656_v36 = vmul.f32 %v4319_v27, %v4319_v27  ;;  %v610_v38 = vadd.f32 %v609_v35, %v4319_v27  ;;  %v666_v35 = vmul.f32 %v4363_v22, %v4363_v22 }
 0x170   : > { %v687_v43 = vadd.f32 %v686_v37, %v656_v36 }
 0x175   : > { %v4335_v41 = vpop.f32.mrf.mxu0 }
 0x176   : > { %v657_v39 = vmul.f32 %v4335_v41, %v4335_v41  ;;  %v611_v44 = vadd.f32 %v610_v38, %v4335_v41  ;;  %v4418_v38 = vpop.f32.mrf.mxu3 }
 0x178   : > { %v688_v46 = vadd.f32 %v687_v43, %v657_v39  ;;  %v631_v39 = vmul.f32 256.0, %v3738_v30 }
 0x17d   : > { %v4351_v58 = vpop.f32.mrf.mxu0 }
 0x17e   : > { %v658_v45 = vmul.f32 %v4351_v58, %v4351_v58  ;;  %v612_v47 = vadd.f32 %v611_v44, %v4351_v58  ;;  %v667_v44 = vmul.f32 %v4384_v42, %v4384_v42 }
 0x180   : > { %v689_v50 = vadd.f32 %v688_v46, %v658_v45 }
 0x185   : > { %v4368_v25 = vpop.f32.mrf.mxu0 }
 0x186   : > { %v659_v49 = vmul.f32 %v4368_v25, %v4368_v25  ;;  %v613_v52 = vadd.f32 %v612_v47, %v4368_v25 }
 0x188   : > { %v690_v55 = vadd.f32 %v689_v50, %v659_v49  ;;  %v668_v49 = vmul.f32 %v4401_v1, %v4401_v1  ;;  %v669_v50 = vmul.f32 %v4418_v38, %v4418_v38 }
 0x18d   : > { %v4382_v40 = vpop.f32.mrf.mxu0 }
 0x18e   : > { %v660_v53 = vmul.f32 %v4382_v40, %v4382_v40  ;;  %v614_v56 = vadd.f32 %v613_v52, %v4382_v40  ;;  %v632_v52 = vsub.f32 1.0, %v631_v39 }
 0x190   : > { %v691_v61 = vadd.f32 %v690_v55, %v660_v53 }
 0x195   : > { %v4396_v59 = vpop.f32.mrf.mxu0 }
 0x196   : > { %v615_v62 = vadd.f32 %v614_v56, %v4396_v59  ;;  %v661_v0 = vmul.f32 %v4396_v59, %v4396_v59 }
 0x198   : > { %v616_v5 = vadd.f32 %v615_v62, %v4300_v16  ;;  %v692_v20 = vadd.f32 %v691_v61, %v661_v0  ;;  %v633_v62 = vmul.f32 %v3738_v30, %v632_v52  ;;  %v1597_v52 = vld [vmem:[#allocation8 + $0xf0] sm:$0xff] }
 0x19a   : > { %v617_v24 = vadd.f32 %v616_v5, %v4306_v19  ;;  %v693_v7 = vadd.f32 %v692_v20, %v662_v3  ;;  %v634_v21 = vadd.f32 %v3738_v30, %v633_v62 }
 0x19c   : > { %v694_v28 = vadd.f32 %v693_v7, %v663_v23  ;;  %v618_v29 = vadd.f32 %v617_v24, %v4324_v31  ;;  %v4429_v7 = vpop.f32.mrf.mxu1 }
 0x19d   : > { %7136 = vst [vmem:[#allocation17_spill] sm:$0xff] %v4429_v7 }
 0x19e   : > { %v619_v33 = vadd.f32 %v618_v29, %v4343_v48  ;;  %v695_v34 = vadd.f32 %v694_v28, %v664_v26  ;;  %v4431_v29 = vsel %vm635_vm0, %v3738_v30, %v634_v21  ;;  %v1954_v30 = vld [vmem:[#allocation8 + $0x178] sm:$0xff] }
 0x19f   : > { %7137 = vst [vmem:[#allocation18_spill] sm:$0xff] %v4431_v29  ;;  %1955 = vmatpush.msrb.mxu0 %v1954_v30  ;;  %v1950_v21 = vld [vmem:[#allocation8 + $0x158] sm:$0xff] }
 0x1a0   : > { %v620_v36 = vadd.f32 %v619_v33, %v4363_v22  ;;  %v696_v37 = vadd.f32 %v695_v34, %v665_v32 }
 0x1a2   : > { %v621_v43 = vadd.f32 %v620_v36, %v4384_v42  ;;  %v697_v45 = vadd.f32 %v696_v37, %v666_v35 }
 0x1a4   : > { %v698_v46 = vadd.f32 %v697_v45, %v667_v44  ;;  %v622_v47 = vadd.f32 %v621_v43, %v4401_v1  ;;  %v4439_v43 = vpop.f32.mrf.mxu1 }
 0x1a5   : > { %7138 = vst [vmem:[#allocation19_spill] sm:$0xff] %v4439_v43  ;;  %v2277_v43 = vld [vmem:[#allocation8 + $0x220] sm:$0xff] }
 0x1a6   : > { %v699_v53 = vadd.f32 %v698_v46, %v668_v49  ;;  %v623_v55 = vadd.f32 %v622_v47, %v4418_v38  ;;  %v1598_v46 = vld [vmem:[#allocation8 + $0xf8] sm:$0xff] }
 0x1a7   : > { %1599 = vmatpush.msra.mxu2 %v1598_v46  ;;  %3632 = vmatpush.msra.mxu3 %v1598_v46  ;;  %v1947_v46 = vld [vmem:[#allocation8 + $0x140] sm:$0xff] }
 0x1a8   : > { %v624_v56 = vrot.slane %v623_v55, 4  ;;  %v700_v61 = vadd.f32 %v699_v53, %v669_v50  ;;  %v1953_v53 = vld [vmem:[#allocation8 + $0x170] sm:$0xff] }
 0x1a9   : > { %1600 = vmatpush.msra.mxu2 %v1597_v52  ;;  %1956 = vmatpush.msrb.mxu0 %v1953_v53 }
 0x1aa   : > { %v625_v0 = vadd.f32 %v624_v56, %v623_v55  ;;  %v701_v3 = vrot.slane %v700_v61, 4  ;;  %v1596_v56 = vld [vmem:[#allocation8 + $0xe8] sm:$0xff]  ;;  %3633 = vmatpush.msra.mxu3 %v1597_v52  ;;  %v1946_v52 = vld [vmem:[#allocation8 + $0x138] sm:$0xff] }
 0x1ab   : > { %1601 = vmatpush.msra.mxu2 %v1596_v56 }
 0x1ac   : > { %v626_v5 = vrot.slane %v625_v0, 2  ;;  %v702_v20 = vadd.f32 %v701_v3, %v700_v61  ;;  %v4441_v49 = vpop.f32.mrf.mxu1  ;;  %v1952_v61 = vld [vmem:[#allocation8 + $0x168] sm:$0xff]  ;;  %v1951_v3 = vld [vmem:[#allocation8 + $0x160] sm:$0xff]  ;;  %3634 = vmatpush.msra.mxu3 %v1596_v56 }
 0x1ad   : > { %7139 = vst [vmem:[#allocation20_spill] sm:$0xff] %v4441_v49  ;;  %1957 = vmatpush.msrb.mxu0 %v1952_v61  ;;  %v4471_v61 = vld [vmem:[#allocation8 + $0xb0] sm:$0xff] }
 0x1ae   : > { %v627_v23 = vadd.f32 %v626_v5, %v625_v0  ;;  %v703_v24 = vrot.slane %v702_v20, 2  ;;  %v1595_v0 = vld [vmem:[#allocation8 + $0xe0] sm:$0xff] }
 0x1af   : > { %1602 = vmatpush.msra.mxu2 %v1595_v0  ;;  %1958 = vmatpush.msrb.mxu0 %v1951_v3 }
 0x1b0   : > { %v628_v26 = vrot.slane %v627_v23, 1  ;;  %v704_v28 = vadd.f32 %v703_v24, %v702_v20  ;;  %v1594_v20 = vld [vmem:[#allocation8 + $0xd8] sm:$0xff]  ;;  %3635 = vmatpush.msra.mxu3 %v1595_v0  ;;  %v1593_v24 = vld [vmem:[#allocation8 + $0xd0] sm:$0xff] }
 0x1b1   : > { %1603 = vmatpush.msra.mxu2 %v1594_v20  ;;  %1959 = vmatpush.msrb.mxu0 %v1950_v21 }
 0x1b2   : > { %v629_v32 = vadd.f32 %v628_v26, %v627_v23  ;;  %v705_v33 = vrot.slane %v704_v28, 1  ;;  %v1949_v26 = vld [vmem:[#allocation8 + $0x150] sm:$0xff]  ;;  %3636 = vmatpush.msra.mxu3 %v1594_v20 }
 0x1b3   : > { %1604 = vmatpush.msra.mxu2 %v1593_v24  ;;  %1960 = vmatpush.msrb.mxu0 %v1949_v26 }
 0x1b4   : > { %v4434_v34 = vmul.f32 %v4431_v29, %v629_v32  ;;  %v706_v35 = vadd.f32 %v705_v33, %v704_v28  ;;  %v4446_v28 = vld [vmem:[%s6946_s2] ss:$0 sm:$0xff]  ;;  %v4448_v32 = vpop.f32.mrf.mxu1  ;;  %3637 = vmatpush.msra.mxu3 %v1593_v24 }
 0x1b5   : > { %7140 = vst [vmem:[#allocation21_spill] sm:$0xff] %v4448_v32 }
 0x1b6   : > { %v707_v36 = vmul.f32 %v706_v35, %v4431_v29  ;;  %v708_v37 = vmul.f32 %v4434_v34, %v4434_v34  ;;  %v742_v33 = vsub.f32 %v4418_v38, %v4434_v34  ;;  %v4463_v38 = vld [vmem:[#allocation8 + $0xc0] sm:$0xff]  ;;  %v711_v3 = vsub.f32 %v4240_v51, %v4434_v34 }
 0x1b7   : > { %v713_v20 = vsub.f32 %v4250_v57, %v4434_v34  ;;  %v714_v21 = vsub.f32 %v4255_v60, %v4434_v34  ;;  %v715_v24 = vsub.f32 %v4260_v63, %v4434_v34  ;;  %v716_v26 = vsub.f32 %v4265_v2, %v4434_v34 }
 0x1b8   : > { %v709_v39 = vsub.f32 %v707_v36, %v708_v37  ;;  %v4454_v36 = vld [vmem:[#allocation8 + $0xc8] sm:$0xff]  ;;  %v718_v51 = vsub.f32 %v4273_v6, %v4434_v34  ;;  %v719_v57 = vsub.f32 %v4280_v8, %v4434_v34  ;;  %v720_v60 = vsub.f32 %v4283_v9, %v4434_v34  ;;  %v2109_v8 = vld [vmem:[#allocation8 + $0x1c0] sm:$0xff] }
 0x1b9   : > { %v1948_v37 = vld [vmem:[#allocation8 + $0x148] sm:$0xff]  ;;  %1605 = vmatpush.msra.mxu2 %v4454_v36  ;;  %v721_v63 = vsub.f32 %v4286_v10, %v4434_v34  ;;  %v722_v2 = vsub.f32 %v4289_v11, %v4434_v34  ;;  %v723_v6 = vsub.f32 %v4292_v12, %v4434_v34  ;;  %v7143_v11 = vsub.f32 %v4296_v14, %v4434_v34 }
 0x1ba   : > { %v710_v44 = vmax.f32 %v709_v39, 0.0  ;;  %v4459_v39 = vld [vmem:[%s6947_s3] ss:$0 sm:$0xff]  ;;  %1961 = vmatpush.msrb.mxu0 %v1948_v37  ;;  %v724_v37 = vsub.f32 %v4294_v13, %v4434_v34  ;;  %3638 = vmatpush.msra.mxu3 %v4454_v36 }
 0x1bb   : > { %1606 = vmatpush.msra.mxu2 %v4463_v38 }
 0x1bc   : > { %v743_v45 = vadd.f32 1e-05, %v710_v44  ;;  %1962 = vmatpush.msrb.mxu0 %v1947_v46  ;;  %v4473_v0 = vpop.f32.mrf.mxu1  ;;  %3639 = vmatpush.msra.mxu3 %v4463_v38 }
 0x1bd   : > { %7141 = vst [vmem:[#allocation22_spill] sm:$0xff] %v4473_v0 }
 0x1be   : > { %3739 = vrsqrt.f32 %v743_v45  ;;  %vm750_vm2 = vweird.f32 %v743_v45  ;;  %1963 = vmatpush.msrb.mxu0 %v1946_v52  ;;  %v1942_v52 = vld [vmem:[#allocation8 + $0x118] sm:$0xff] }
 0x1c4   : > { %v3740_v47 = vpop.eup %3739  ;;  %v4552_v10 = vpop.f32.mrf.mxu1 }
 0x1c5   : > { %v745_v50 = vmul.f32 %v3740_v47, %v743_v45  ;;  %vm751_vm1 = vweird.f32 %v3740_v47  ;;  %v2116_v45 = vld [vmem:[#allocation8 + $0x1f8] sm:$0xff]  ;;  %7142 = vst [vmem:[#allocation23_spill] sm:$0xff] %v4552_v10 }
 0x1c6   : > { %vm752_vm3 = vmor %vm750_vm2, %vm751_vm1  ;;  %2117 = vmatpush.msrb.mxu1 %v2116_v45 }
 0x1c7   : > { %v746_v55 = vmul.f32 %v3740_v47, %v745_v50  ;;  %v4467_v50 = vld [vmem:[#allocation8 + $0xb8] sm:$0xff] }
 0x1c8   : > { %1607 = vmatpush.msra.mxu2 %v4467_v50  ;;  %3640 = vmatpush.msra.mxu3 %v4467_v50 }
 0x1c9   : > { %v747_v62 = vmul.f32 0.5, %v746_v55  ;;  %v2114_v55 = vld [vmem:[#allocation8 + $0x1e8] sm:$0xff] }
 0x1ca   : > { %1608 = vmatpush.msra.mxu2 %v4471_v61  ;;  %3641 = vmatpush.msra.mxu3 %v4471_v61 }
 0x1cb   : > { %v748_v5 = vsub.f32 1.5, %v747_v62  ;;  %v1945_v62 = vld [vmem:[#allocation8 + $0x130] sm:$0xff] }
 0x1cc   : > { %1964 = vmatpush.msrb.mxu0 %v1945_v62 }
 0x1cd   : > { %v749_v23 = vmul.f32 %v3740_v47, %v748_v5  ;;  %v712_v5 = vsub.f32 %v4245_v54, %v4434_v34  ;;  %v4492_v54 = vld [vmem:[#allocation8 + $0xa8] sm:$0xff] }
 0x1ce   : > { %1609 = vmatpush.msra.mxu2 %v4492_v54  ;;  %3642 = vmatpush.msra.mxu3 %v4492_v54 }
 0x1cf   : > { %v4452_v35 = vsel %vm752_vm3, %v3740_v47, %v749_v23  ;;  %v2115_v47 = vld [vmem:[#allocation8 + $0x1f0] sm:$0xff]  ;;  %v2113_v23 = vld [vmem:[#allocation8 + $0x1e0] sm:$0xff] }
 0x1d0   : > { %v785_v44 = vmul.f32 %v4452_v35, %v742_v33  ;;  %2118 = vmatpush.msrb.mxu1 %v2115_v47  ;;  %v717_v33 = vsub.f32 %v4269_v4, %v4434_v34  ;;  %v1944_v4 = vld [vmem:[#allocation8 + $0x128] sm:$0xff]  ;;  %v754_v45 = vmul.f32 %v4452_v35, %v711_v3  ;;  %v755_v46 = vmul.f32 %v4452_v35, %v712_v5  ;;  %v4540_v3 = vld [vmem:[#allocation8 + $0x98] sm:$0xff] }
 0x1d1   : > { %v756_v12 = vmul.f32 %v4452_v35, %v713_v20  ;;  %1965 = vmatpush.msrb.mxu0 %v1944_v4  ;;  %v758_v20 = vmul.f32 %v4452_v35, %v715_v24  ;;  %v759_v62 = vmul.f32 %v4452_v35, %v716_v26  ;;  %v761_v4 = vmul.f32 %v4452_v35, %v718_v51  ;;  %v4561_v26 = vld [vmem:[#allocation8 + $0x90] sm:$0xff] }
 0x1d2   : > { %v820_v30 = vmul.f32 %v4446_v28, %v785_v44  ;;  %2119 = vmatpush.msrb.mxu1 %v2114_v55  ;;  %v2112_v44 = vld [vmem:[#allocation8 + $0x1d8] sm:$0xff]  ;;  %v757_v55 = vmul.f32 %v4452_v35, %v714_v21  ;;  %v760_v5 = vmul.f32 %v4452_v35, %v717_v33  ;;  %v789_v24 = vmul.f32 %v4446_v28, %v754_v45  ;;  %v2110_v33 = vld [vmem:[#allocation8 + $0x1c8] sm:$0xff]  ;;  %v1941_v21 = vld [vmem:[#allocation8 + $0x110] sm:$0xff] }
 0x1d3   : > { %v794_v45 = vmul.f32 %v4446_v28, %v759_v62 }
 0x1d4   : > { %v855_v53 = vadd.f32 %v4459_v39, %v820_v30  ;;  %2120 = vmatpush.msrb.mxu1 %v2113_v23  ;;  %v4516_v30 = vld [vmem:[#allocation8 + $0xa0] sm:$0xff]  ;;  %v2111_v23 = vld [vmem:[#allocation8 + $0x1d0] sm:$0xff]  ;;  %v792_v47 = vmul.f32 %v4446_v28, %v757_v55  ;;  %v763_v55 = vmul.f32 %v4452_v35, %v720_v60  ;;  %v765_v60 = vmul.f32 %v4452_v35, %v722_v2 }
 0x1d5   : > { %1610 = vmatpush.msra.mxu2 %v4516_v30  ;;  %v768_v2 = vmul.f32 %v4452_v35, %v7143_v11  ;;  %v829_v14 = vadd.f32 %v4459_v39, %v794_v45  ;;  %v4599_v11 = vld [vmem:[#allocation8 + $0x80] sm:$0xff]  ;;  %3643 = vmatpush.msra.mxu3 %v4516_v30 }
 0x1d6   : > { %v887_v56 = vmax.f32 %v855_v53, 0.0  ;;  %2121 = vmatpush.msrb.mxu1 %v2112_v44  ;;  %v790_v44 = vmul.f32 %v4446_v28, %v755_v46  ;;  %v791_v53 = vmul.f32 %v4446_v28, %v756_v12  ;;  %v762_v12 = vmul.f32 %v4452_v35, %v719_v57 }
 0x1d7   : > { %1611 = vmatpush.msra.mxu2 %v4540_v3  ;;  %v795_v46 = vmul.f32 %v4446_v28, %v760_v5  ;;  %v824_v57 = vadd.f32 %v4459_v39, %v789_v24  ;;  %v827_v62 = vadd.f32 %v4459_v39, %v792_v47  ;;  %v4580_v5 = vld [vmem:[#allocation8 + $0x88] sm:$0xff]  ;;  %v2108_v24 = vld [vmem:[#allocation8 + $0x1b8] sm:$0xff]  ;;  %v798_v13 = vmul.f32 %v4446_v28, %v763_v55 }
 0x1d8   : > { %1350 = vst [vmem:[#allocation2 + $0x189] sm:$0xff] %v887_v56  ;;  %v1943_v56 = vld [vmem:[#allocation8 + $0x120] sm:$0xff]  ;;  %2122 = vmatpush.msrb.mxu1 %v2111_v23  ;;  %v764_v23 = vmul.f32 %v4452_v35, %v721_v63  ;;  %v826_v9 = vadd.f32 %v4459_v39, %v791_v53  ;;  %v766_v63 = vmul.f32 %v4452_v35, %v723_v6  ;;  %v1940_v47 = vld [vmem:[#allocation8 + $0x108] sm:$0xff] }
 0x1d9   : > { %1966 = vmatpush.msrb.mxu0 %v1943_v56  ;;  %v793_v56 = vmul.f32 %v4446_v28, %v758_v20  ;;  %v825_v20 = vadd.f32 %v4459_v39, %v790_v44  ;;  %1612 = vmatpush.msra.mxu2 %v4561_v26  ;;  %v767_v53 = vmul.f32 %v4452_v35, %v724_v37 }
 0x1da   : > { %2123 = vmatpush.msrb.mxu1 %v2110_v33  ;;  %v797_v6 = vmul.f32 %v4446_v28, %v762_v12  ;;  %v7144_v44 = vsub.f32 %v4298_v15, %v4434_v34  ;;  %v799_v37 = vmul.f32 %v4446_v28, %v764_v23  ;;  %v830_v12 = vadd.f32 %v4459_v39, %v795_v46  ;;  %v1939_v15 = vld [vmem:[#allocation8 + $0x100] sm:$0xff] }
 0x1db   : > { %1967 = vmatpush.msrb.mxu0 %v1942_v52  ;;  %v796_v52 = vmul.f32 %v4446_v28, %v761_v4  ;;  %v828_v4 = vadd.f32 %v4459_v39, %v793_v56  ;;  %v856_v56 = vmax.f32 %v824_v57, 0.0  ;;  %v858_v51 = vmax.f32 %v826_v9, 0.0  ;;  %1613 = vmatpush.msra.mxu2 %v4580_v5 }
 0x1dc   : > { %v769_v33 = vmul.f32 %v4452_v35, %v7144_v44  ;;  %2124 = vmatpush.msrb.mxu1 %v2109_v8  ;;  %v7145_v55 = vsub.f32 %v4302_v17, %v4434_v34  ;;  %v800_v45 = vmul.f32 %v4446_v28, %v765_v60  ;;  %v859_v44 = vmax.f32 %v827_v62, 0.0  ;;  %3644 = vmatpush.msra.mxu3 %v4540_v3 }
 0x1dd   : > { %1968 = vmatpush.msrb.mxu0 %v1941_v21  ;;  %v857_v21 = vmax.f32 %v825_v20, 0.0  ;;  %v831_v8 = vadd.f32 %v4459_v39, %v796_v52  ;;  %v801_v46 = vmul.f32 %v4446_v28, %v766_v63  ;;  %v832_v9 = vadd.f32 %v4459_v39, %v797_v6  ;;  %1319 = vst [vmem:[#allocation2 + $0x19] sm:$0xff] %v856_v56  ;;  %v4620_v63 = vpop.f32.mrf.mxu1 }
 0x1de   : > { %v770_v23 = vmul.f32 %v4452_v35, %v7145_v55  ;;  %2125 = vmatpush.msrb.mxu1 %v2108_v24  ;;  %v860_v36 = vmax.f32 %v828_v4, 0.0  ;;  %1614 = vmatpush.msra.mxu2 %v4599_v11  ;;  %v7146_v17 = vsub.f32 %v4304_v18, %v4434_v34  ;;  %v802_v20 = vmul.f32 %v4446_v28, %v767_v53 }
 0x1df   : > { %1969 = vmatpush.msrb.mxu0 %v1940_v47  ;;  %v833_v60 = vadd.f32 %v4459_v39, %v798_v13  ;;  %v861_v52 = vmax.f32 %v829_v14, 0.0  ;;  %1320 = vst [vmem:[#allocation2 + $0x21] sm:$0xff] %v857_v21  ;;  %v7148_v62 = vsub.f32 %v4319_v27, %v4434_v34  ;;  %v803_v6 = vmul.f32 %v4446_v28, %v768_v2 }
 0x1e0   : > { %v771_v57 = vmul.f32 %v4452_v35, %v7146_v17  ;;  %7147 = vst [vmem:[#allocation24_spill] sm:$0xff] %v4620_v63  ;;  %v834_v18 = vadd.f32 %v4459_v39, %v799_v37  ;;  %v862_v4 = vmax.f32 %v830_v12, 0.0  ;;  %v7149_v53 = vsub.f32 %v4335_v41, %v4434_v34  ;;  %3645 = vmatpush.msra.mxu3 %v4561_v26 }
 0x1e1   : > { %1970 = vmatpush.msrb.mxu0 %v1939_v15  ;;  %v772_v38 = vmul.f32 %v4452_v35, %v7148_v62  ;;  %1321 = vst [vmem:[#allocation2 + $0x31] sm:$0xff] %v858_v51  ;;  %v804_v24 = vmul.f32 %v4446_v28, %v769_v33  ;;  %v835_v13 = vadd.f32 %v4459_v39, %v800_v45  ;;  %v863_v27 = vmax.f32 %v831_v8, 0.0 }
 0x1e2   : > { %v773_v47 = vmul.f32 %v4452_v35, %v7149_v53  ;;  %1322 = vst [vmem:[#allocation2 + $0x39] sm:$0xff] %v859_v44  ;;  %v7150_v2 = vsub.f32 %v4351_v58, %v4434_v34  ;;  %v805_v51 = vmul.f32 %v4446_v28, %v770_v23  ;;  %v836_v50 = vadd.f32 %v4459_v39, %v801_v46 }
 0x1e3   : > { %v864_v14 = vmax.f32 %v832_v9, 0.0  ;;  %1323 = vst [vmem:[#allocation2 + $0x49] sm:$0xff] %v860_v36  ;;  %v7151_v41 = vsub.f32 %v4368_v25, %v4434_v34  ;;  %v806_v12 = vmul.f32 %v4446_v28, %v771_v57  ;;  %v837_v56 = vadd.f32 %v4459_v39, %v802_v20  ;;  %3646 = vmatpush.msra.mxu3 %v4580_v5 }
 0x1e4   : > { %v774_v37 = vmul.f32 %v4452_v35, %v7150_v2  ;;  %v865_v58 = vmax.f32 %v833_v60, 0.0  ;;  %1324 = vst [vmem:[#allocation2 + $0x51] sm:$0xff] %v861_v52  ;;  %v7152_v21 = vsub.f32 %v4382_v40, %v4434_v34  ;;  %v807_v55 = vmul.f32 %v4446_v28, %v772_v38 }
 0x1e5   : > { %v775_v33 = vmul.f32 %v4452_v35, %v7151_v41  ;;  %v838_v61 = vadd.f32 %v4459_v39, %v803_v6  ;;  %v866_v23 = vmax.f32 %v834_v18, 0.0  ;;  %1325 = vst [vmem:[#allocation2 + $0x61] sm:$0xff] %v862_v4  ;;  %v7153_v25 = vsub.f32 %v4396_v59, %v4434_v34  ;;  %3647 = vmatpush.msra.mxu3 %v4599_v11 }
 0x1e6   : > { %v776_v15 = vmul.f32 %v4452_v35, %v7152_v21  ;;  %v808_v8 = vmul.f32 %v4446_v28, %v773_v47  ;;  %v839_v44 = vadd.f32 %v4459_v39, %v804_v24  ;;  %v867_v46 = vmax.f32 %v835_v13, 0.0  ;;  %1326 = vst [vmem:[#allocation2 + $0x69] sm:$0xff] %v863_v27 }
 0x1e7   : > { %v777_v45 = vmul.f32 %v4452_v35, %v7153_v25  ;;  %v7154_v40 = vsub.f32 %v4300_v16, %v4434_v34  ;;  %v809_v36 = vmul.f32 %v4446_v28, %v774_v37  ;;  %v840_v17 = vadd.f32 %v4459_v39, %v805_v51  ;;  %1327 = vst [vmem:[#allocation2 + $0x79] sm:$0xff] %v864_v14 }
 0x1e8   : > { %v868_v59 = vmax.f32 %v836_v50, 0.0  ;;  %v7155_v57 = vsub.f32 %v4306_v19, %v4434_v34  ;;  %v810_v60 = vmul.f32 %v4446_v28, %v775_v33  ;;  %v841_v54 = vadd.f32 %v4459_v39, %v806_v12  ;;  %1328 = vst [vmem:[#allocation2 + $0x81] sm:$0xff] %v865_v58 }
 0x1e9   : > { %v778_v9 = vmul.f32 %v4452_v35, %v7154_v40  ;;  %v869_v52 = vmax.f32 %v837_v56, 0.0  ;;  %v7156_v16 = vsub.f32 %v4324_v31, %v4434_v34  ;;  %v811_v38 = vmul.f32 %v4446_v28, %v776_v15  ;;  %1329 = vst [vmem:[#allocation2 + $0x91] sm:$0xff] %v866_v23  ;;  %v4687_v31 = vpop.f32.mrf.mxu1 }
 0x1ea   : > { %v779_v20 = vmul.f32 %v4452_v35, %v7155_v57  ;;  %v842_v6 = vadd.f32 %v4459_v39, %v807_v55  ;;  %v870_v19 = vmax.f32 %v838_v61, 0.0  ;;  %v7157_v18 = vsub.f32 %v4343_v48, %v4434_v34  ;;  %1330 = vst [vmem:[#allocation2 + $0x99] sm:$0xff] %v867_v46 }
 0x1eb   : > { %v780_v62 = vmul.f32 %v4452_v35, %v7156_v16  ;;  %v812_v53 = vmul.f32 %v4446_v28, %v777_v45  ;;  %v843_v30 = vadd.f32 %v4459_v39, %v808_v8  ;;  %v871_v47 = vmax.f32 %v839_v44, 0.0  ;;  %7158 = vst [vmem:[#allocation25_spill] sm:$0xff] %v4687_v31  ;;  %v2107_v16 = vld [vmem:[#allocation8 + $0x1b0] sm:$0xff] }
 0x1ec   : > { %v781_v4 = vmul.f32 %v4452_v35, %v7157_v18  ;;  %v7159_v24 = vsub.f32 %v4363_v22, %v4434_v34  ;;  %v813_v27 = vmul.f32 %v4446_v28, %v778_v9  ;;  %v844_v48 = vadd.f32 %v4459_v39, %v809_v36  ;;  %1331 = vst [vmem:[#allocation2 + $0xa9] sm:$0xff] %v868_v59 }
 0x1ed   : > { %v872_v2 = vmax.f32 %v840_v17, 0.0  ;;  %v7160_v37 = vsub.f32 %v4384_v42, %v4434_v34  ;;  %v814_v3 = vmul.f32 %v4446_v28, %v779_v20  ;;  %v845_v50 = vadd.f32 %v4459_v39, %v810_v60  ;;  %1332 = vst [vmem:[#allocation2 + $0xb1] sm:$0xff] %v869_v52  ;;  %2126 = vmatpush.msrb.mxu1 %v2107_v16 }
 0x1ee   : > { %v782_v13 = vmul.f32 %v4452_v35, %v7159_v24  ;;  %v873_v14 = vmax.f32 %v841_v54, 0.0  ;;  %v7161_v22 = vsub.f32 %v4401_v1, %v4434_v34  ;;  %v815_v33 = vmul.f32 %v4446_v28, %v780_v62  ;;  %1333 = vst [vmem:[#allocation2 + $0xc1] sm:$0xff] %v870_v19  ;;  %v2288_v62 = vld [vmem:[#allocation8 + $0x278] sm:$0xff]  ;;  %v2106_v19 = vld [vmem:[#allocation8 + $0x1a8] sm:$0xff]  ;;  %v2103_v24 = vld [vmem:[#allocation8 + $0x190] sm:$0xff] }
 0x1ef   : > { %v783_v51 = vmul.f32 %v4452_v35, %v7160_v37  ;;  %v846_v12 = vadd.f32 %v4459_v39, %v811_v38  ;;  %v874_v42 = vmax.f32 %v842_v6, 0.0  ;;  %v816_v56 = vmul.f32 %v4446_v28, %v781_v4  ;;  %1334 = vst [vmem:[#allocation2 + $0xc9] sm:$0xff] %v871_v47  ;;  %2289 = vmatpush.msrb.mxu2 %v2288_v62  ;;  %v2105_v4 = vld [vmem:[#allocation8 + $0x1a0] sm:$0xff]  ;;  %v2104_v47 = vld [vmem:[#allocation8 + $0x198] sm:$0xff] }
 0x1f0   : > { %v784_v41 = vmul.f32 %v4452_v35, %v7161_v22  ;;  %v847_v58 = vadd.f32 %v4459_v39, %v812_v53  ;;  %v875_v21 = vmax.f32 %v843_v30, 0.0  ;;  %v817_v26 = vmul.f32 %v4446_v28, %v782_v13  ;;  %1335 = vst [vmem:[#allocation2 + $0xd9] sm:$0xff] %v872_v2  ;;  %2127 = vmatpush.msrb.mxu1 %v2106_v19  ;;  %v2102_v13 = vld [vmem:[#allocation8 + $0x188] sm:$0xff]  ;;  %v2284_v62 = vld [vmem:[#allocation8 + $0x258] sm:$0xff] }
 0x1f1   : > { %v848_v1 = vadd.f32 %v4459_v39, %v813_v27  ;;  %v876_v34 = vmax.f32 %v844_v48, 0.0  ;;  %v818_v35 = vmul.f32 %v4446_v28, %v783_v51  ;;  %v849_v15 = vadd.f32 %v4459_v39, %v814_v3  ;;  %1336 = vst [vmem:[#allocation2 + $0xe1] sm:$0xff] %v873_v14  ;;  %v4721_v9 = vpop.f32.mrf.mxu1  ;;  %v2287_v27 = vld [vmem:[#allocation8 + $0x270] sm:$0xff]  ;;  %v2101_v48 = vld [vmem:[#allocation8 + $0x180] sm:$0xff] }
 0x1f2   : > { %v877_v55 = vmax.f32 %v845_v50, 0.0  ;;  %v819_v61 = vmul.f32 %v4446_v28, %v784_v41  ;;  %v850_v23 = vadd.f32 %v4459_v39, %v815_v33  ;;  %v878_v25 = vmax.f32 %v846_v12, 0.0  ;;  %1337 = vst [vmem:[#allocation2 + $0xf1] sm:$0xff] %v874_v42  ;;  %2128 = vmatpush.msrb.mxu1 %v2105_v4  ;;  %2290 = vmatpush.msrb.mxu2 %v2287_v27  ;;  %v4790_v33 = vld [vmem:[#allocation2 + $0x20] sm:$0xff]  ;;  %v2286_v12 = vld [vmem:[#allocation8 + $0x268] sm:$0xff]  ;;  %v4862_v27 = vld [vmem:[#allocation2 + $0x50] sm:$0xff] }
 0x1f3   : > { %v851_v5 = vadd.f32 %v4459_v39, %v816_v56  ;;  %v879_v45 = vmax.f32 %v847_v58, 0.0  ;;  %1338 = vst [vmem:[#allocation2 + $0xf9] sm:$0xff] %v875_v21  ;;  %v852_v8 = vadd.f32 %v4459_v39, %v817_v26  ;;  %v880_v44 = vmax.f32 %v848_v1, 0.0  ;;  %v2285_v26 = vld [vmem:[#allocation8 + $0x260] sm:$0xff] }
 0x1f4   : > { %1339 = vst [vmem:[#allocation2 + $0x109] sm:$0xff] %v876_v34  ;;  %v853_v46 = vadd.f32 %v4459_v39, %v818_v35  ;;  %v881_v40 = vmax.f32 %v849_v15, 0.0  ;;  %v854_v28 = vadd.f32 %v4459_v39, %v819_v61  ;;  %v882_v11 = vmax.f32 %v850_v23, 0.0  ;;  %2129 = vmatpush.msrb.mxu1 %v2104_v47  ;;  %2291 = vmatpush.msrb.mxu2 %v2286_v12  ;;  %v1418_v47 = vld [vmem:[#allocation8 + $0x68] sm:$0xff]  ;;  %v5020_v10 = vld [vmem:[#allocation2 + $0xb0] sm:$0xff] }
 0x1f5   : > { %1340 = vst [vmem:[#allocation2 + $0x111] sm:$0xff] %v877_v55  ;;  %v883_v36 = vmax.f32 %v851_v5, 0.0  ;;  %v884_v17 = vmax.f32 %v852_v8, 0.0  ;;  %v6957_v20 = vmov 0.0   ;;  %v4819_v55 = vld [vmem:[#allocation2 + $0x38] sm:$0xff]  ;;  %v1842_v29 = vrot.slane %v4862_v27, 2 }
 0x1f6   : > { %7162 = vst [vmem:[#allocation26_spill] sm:$0xff] %v4721_v9  ;;  %v885_v59 = vmax.f32 %v853_v46, 0.0  ;;  %v886_v57 = vmax.f32 %v854_v28, 0.0  ;;  %v4734_v39 = vrot.slane %v6957_v20, 1  ;;  %v4738_v54 = vrot.slane %v6957_v20, 2  ;;  %2130 = vmatpush.msrb.mxu1 %v2103_v24  ;;  %2292 = vmatpush.msrb.mxu2 %v2285_v26  ;;  %v1416_v26 = vld [vmem:[#allocation8 + $0x58] sm:$0xff] }
 0x1f7   : > { %1341 = vst [vmem:[#allocation2 + $0x121] sm:$0xff] %v878_v25  ;;  %v4988_v9 = vld [vmem:[#allocation2 + $0x98] sm:$0xff] }
 0x1f8   : > { %1342 = vst [vmem:[#allocation2 + $0x129] sm:$0xff] %v879_v45  ;;  %2131 = vmatpush.msrb.mxu1 %v2102_v13  ;;  %2293 = vmatpush.msrb.mxu2 %v2284_v62  ;;  %v1501_v32 = vrot.slane %v4988_v9, 1 }
 0x1f9   : > { %1343 = vst [vmem:[#allocation2 + $0x139] sm:$0xff] %v880_v44  ;;  %v4725_v60 = vpop.f32.mrf.mxu1 }
 0x1fa   : > { %1344 = vst [vmem:[#allocation2 + $0x141] sm:$0xff] %v881_v40  ;;  %2132 = vmatpush.msrb.mxu1 %v2101_v48  ;;  %v1476_v40 = vrot.slane %v4790_v33, 1  ;;  %v1417_v48 = vld [vmem:[#allocation8 + $0x60] sm:$0xff] }
 0x1fb   : > { %1345 = vst [vmem:[#allocation2 + $0x151] sm:$0xff] %v882_v11  ;;  %v1832_v11 = vrot.slane %v4790_v33, 2 }
 0x1fc   : > { %1346 = vst [vmem:[#allocation2 + $0x159] sm:$0xff] %v883_v36 }
 0x1fd   : > { %1347 = vst [vmem:[#allocation2 + $0x169] sm:$0xff] %v884_v17 }
 0x1fe   : > { %1348 = vst [vmem:[#allocation2 + $0x171] sm:$0xff] %v885_v59 }
 0x1ff   : > { %1349 = vst [vmem:[#allocation2 + $0x181] sm:$0xff] %v886_v57  ;;  %v4769_v51 = vld [vmem:[#allocation2 + $0x128] sm:$0xff] }
 0x200   : > { %1275 = vst [vmem:[#allocation2] sm:$0xff] %v6957_v20  ;;  %v1531_v3 = vrot.slane %v4769_v51, 1 }
 0x201   : > { %7163 = vst [vmem:[#allocation27_spill] sm:$0xff] %v4725_v60  ;;  %v4746_v18 = vpop.f32.mrf.mxu1  ;;  %v4817_v35 = vld [vmem:[#allocation2 + $0x140] sm:$0xff] }
 0x202   : > { %1276 = vst [vmem:[#allocation2 + $0x8] sm:$0xff] %v6957_v20  ;;  %v1536_v5 = vrot.slane %v4817_v35, 1 }
 0x203   : > { %1282 = vst [vmem:[#allocation2] sm:$0x1] %v6957_v20 }
 0x204   : > { %1277 = vst [vmem:[#allocation2 + $0x10] sm:$0x3] %v6957_v20 }
 0x205   : > { %1279 = vst [vmem:[#allocation2 + $0x198] sm:$0xff] %v6957_v20 }
 0x206   : > { %1281 = vst [vmem:[#allocation2 + $0x1a8] sm:$0x3] %v6957_v20 }
 0x207   : > { %1283 = vst [vmem:[#allocation2 + $0x18] sm:$0x1] %v6957_v20 }
 0x208   : > { %1284 = vst [vmem:[#allocation2 + $0x30] sm:$0x1] %v6957_v20 }
 0x209   : > { %1285 = vst [vmem:[#allocation2 + $0x48] sm:$0x1] %v6957_v20  ;;  %v4762_v2 = vpop.f32.mrf.mxu1 }
 0x20a   : > { %v4740_v52 = vld [vmem:[#allocation2] sm:$0xff]  ;;  %1286 = vst [vmem:[#allocation2 + $0x60] sm:$0x1] %v6957_v20 }
 0x20b   : > { %v1470_v38 = vrot.slane %v4740_v52, 1  ;;  %v1826_v6 = vrot.slane %v4740_v52, 2  ;;  %7164 = vst [vmem:[#allocation28_spill] sm:$0xff] %v4746_v18 }
 0x20c   : > { %1287 = vst [vmem:[#allocation2 + $0x78] sm:$0x1] %v6957_v20 }
 0x20d   : > { %v1472_v53 = vsel %vm1469_vm4, %v1470_v38, %v4734_v39  ;;  %1288 = vst [vmem:[#allocation2 + $0x90] sm:$0x1] %v6957_v20  ;;  %v1828_v30 = vsel %vm1825_vm5, %v1826_v6, %v4738_v54  ;;  %v1420_v38 = vld [vmem:[#allocation8 + $0x78] sm:$0xff]  ;;  %v1419_v6 = vld [vmem:[#allocation8 + $0x70] sm:$0xff] }
 0x20e   : > { %1615 = vmatmul.f32.vlgmr.msra.gmra.mxu2 %v1472_v53  ;;  %1289 = vst [vmem:[#allocation2 + $0xa8] sm:$0x1] %v6957_v20  ;;  %1971 = vmatmul.f32.vlgmr.msrb.gmra.mxu0 %v1828_v30  ;;  %v4765_v37 = vld [vmem:[#allocation2 + $0x18] sm:$0xff] }
 0x20f   : > { %1290 = vst [vmem:[#allocation2 + $0xc0] sm:$0x1] %v6957_v20  ;;  %2133 = vmatmul.f32.vlgmr.msrb.gmra.mxu1 %v4765_v37  ;;  %v4801_v42 = vld [vmem:[#allocation2 + $0x30] sm:$0xff]  ;;  %v1475_v46 = vrot.slane %v4765_v37, 1  ;;  %v1831_v28 = vrot.slane %v4765_v37, 2  ;;  %1712 = vmatpush.msrb.mxu3 %v1420_v38  ;;  %v4860_v30 = vld [vmem:[#allocation2 + $0x158] sm:$0xff] }
 0x210   : > { %1291 = vst [vmem:[#allocation2 + $0xd8] sm:$0x1] %v6957_v20  ;;  %v4840_v59 = vld [vmem:[#allocation2 + $0x48] sm:$0xff] }
 0x211   : > { %1292 = vst [vmem:[#allocation2 + $0xf0] sm:$0x1] %v6957_v20  ;;  %v4787_v41 = vpop.f32.mrf.mxu1  ;;  %v4843_v57 = vsel %vm1469_vm4, %v1475_v46, %v1476_v40  ;;  %1713 = vmatpush.msrb.mxu3 %v1419_v6  ;;  %v1836_v46 = vrot.slane %v4801_v42, 2 }
 0x212   : > { %1293 = vst [vmem:[#allocation2 + $0x108] sm:$0x1] %v6957_v20 }
 0x213   : > { %1294 = vst [vmem:[#allocation2 + $0x120] sm:$0x1] %v6957_v20  ;;  %1714 = vmatpush.msrb.mxu3 %v1418_v47  ;;  %v1412_v47 = vld [vmem:[#allocation8 + $0x38] sm:$0xff] }
 0x214   : > { %1295 = vst [vmem:[#allocation2 + $0x138] sm:$0x1] %v6957_v20 }
 0x215   : > { %1296 = vst [vmem:[#allocation2 + $0x150] sm:$0x1] %v6957_v20  ;;  %1715 = vmatpush.msrb.mxu3 %v1417_v48 }
 0x216   : > { %7165 = vst [vmem:[#allocation29_spill] sm:$0xff] %v4762_v2 }
 0x217   : > { %1297 = vst [vmem:[#allocation2 + $0x168] sm:$0x1] %v6957_v20  ;;  %2136 = vmatmul.f32.gmra.mxu1 %v4790_v33  ;;  %1716 = vmatpush.msrb.mxu3 %v1416_v26  ;;  %v1410_v26 = vld [vmem:[#allocation8 + $0x28] sm:$0xff] }
 0x218   : > { %1298 = vst [vmem:[#allocation2 + $0x180] sm:$0x1] %v6957_v20 }
 0x219   : > { %1301 = vst [vmem:[#allocation2 + $0x29] sm:$0x1] %v6957_v20  ;;  %v4805_v56 = vpop.f32.mrf.mxu1 }
 0x21a   : > { %1302 = vst [vmem:[#allocation2 + $0x41] sm:$0x1] %v6957_v20  ;;  %v4775_v50 = vld [vmem:[#allocation2 + $0x120] sm:$0xff] }
 0x21b   : > { %1303 = vst [vmem:[#allocation2 + $0x59] sm:$0x1] %v6957_v20  ;;  %v1530_v14 = vrot.slane %v4775_v50, 1  ;;  %v4815_v34 = vld [vmem:[#allocation2 + $0x138] sm:$0xff] }
 0x21c   : > { %1304 = vst [vmem:[#allocation2 + $0x71] sm:$0x1] %v6957_v20  ;;  %v1535_v25 = vrot.slane %v4815_v34, 1  ;;  %v4858_v53 = vld [vmem:[#allocation2 + $0x150] sm:$0xff] }
 0x21d   : > { %1305 = vst [vmem:[#allocation2 + $0x89] sm:$0x1] %v6957_v20  ;;  %v4782_v22 = vsel %vm1469_vm4, %v1530_v14, %v1531_v3  ;;  %v1541_v14 = vrot.slane %v4860_v30, 1 }
 0x21e   : > { %1306 = vst [vmem:[#allocation2 + $0xa1] sm:$0x1] %v6957_v20  ;;  %1687 = vmatmul.f32.vlgmr.msra.gmra.mxu3 %v4782_v22  ;;  %v4835_v36 = vsel %vm1469_vm4, %v1535_v25, %v1536_v5  ;;  %v4903_v48 = vld [vmem:[#allocation2 + $0x168] sm:$0xff] }
 0x21f   : > { %7166 = vst [vmem:[#allocation30_spill] sm:$0xff] %v4782_v22  ;;  %2139 = vmatmul.f32.gmra.mxu1 %v4801_v42 }
 0x220   : > { %1307 = vst [vmem:[#allocation2 + $0xb9] sm:$0x1] %v6957_v20  ;;  %v1356_v16 = vld [vmem:[#allocation2 + $0x28] sm:$0x3] }
 0x221   : > { %1308 = vst [vmem:[#allocation2 + $0xd1] sm:$0x1] %v6957_v20  ;;  %v4828_v44 = vpop.f32.mrf.mxu1  ;;  %v1478_v24 = vrot.slane %v1356_v16, 1  ;;  %v1834_v13 = vrot.slane %v1356_v16, 2  ;;  %v1359_v6 = vld [vmem:[#allocation2 + $0x40] sm:$0x3] }
 0x222   : > { %7167 = vst [vmem:[#allocation31_spill] sm:$0xff] %v4787_v41  ;;  %v4952_v41 = vld [vmem:[#allocation2 + $0x80] sm:$0xff] }
 0x223   : > { %1309 = vst [vmem:[#allocation2 + $0xe9] sm:$0x1] %v6957_v20  ;;  %v4868_v12 = vsel %vm1469_vm4, %v1476_v40, %v1478_v24  ;;  %v1837_v40 = vrot.slane %v4819_v55, 2  ;;  %v1411_v24 = vld [vmem:[#allocation8 + $0x30] sm:$0xff] }
 0x224   : > { %1310 = vst [vmem:[#allocation2 + $0x101] sm:$0x1] %v6957_v20 }
 0x225   : > { %1311 = vst [vmem:[#allocation2 + $0x119] sm:$0x1] %v6957_v20  ;;  %v4895_v38 = vsel %vm1825_vm5, %v1836_v46, %v1837_v40  ;;  %v1545_v46 = vrot.slane %v4903_v48, 1 }
 0x226   : > { %1312 = vst [vmem:[#allocation2 + $0x131] sm:$0x1] %v6957_v20 }
 0x227   : > { %1313 = vst [vmem:[#allocation2 + $0x149] sm:$0x1] %v6957_v20  ;;  %2142 = vmatmul.f32.gmra.mxu1 %v4819_v55 }
 0x228   : > { %1314 = vst [vmem:[#allocation2 + $0x161] sm:$0x1] %v6957_v20 }
 0x229   : > { %1315 = vst [vmem:[#allocation2 + $0x179] sm:$0x1] %v6957_v20  ;;  %v4855_v4 = vpop.f32.mrf.mxu1 }
 0x22a   : > { %1316 = vst [vmem:[#allocation2 + $0x191] sm:$0x1] %v6957_v20 }
 0x22b   : > { %1299 = vst [vmem:[#allocation2 + $0x198] sm:$0x1] %v6957_v20 }
 0x22c   : > { %1300 = vst [vmem:[#allocation2 + $0x11] sm:$0x1] %v6957_v20 }
 0x22d   : > { %7168 = vst [vmem:[#allocation32_spill] sm:$0xff] %v4805_v56  ;;  %v4808_v58 = vld [vmem:[#allocation2 + $0x130] sm:$0x3] }
 0x22e   : > { %1317 = vst [vmem:[#allocation2 + $0x1a9] sm:$0x1] %v6957_v20  ;;  %v1533_v21 = vrot.slane %v4808_v58, 1  ;;  %v4838_v17 = vld [vmem:[#allocation2 + $0x148] sm:$0x3]  ;;  %v1407_v20 = vld [vmem:[#allocation8 + $0x10] sm:$0xff] }
 0x22f   : > { %7170 = vst [vmem:[#allocation34_spill] sm:$0xff] %v4828_v44  ;;  %2145 = vmatmul.f32.gmra.mxu1 %v4840_v59  ;;  %v4879_v25 = vld [vmem:[#allocation2 + $0x160] sm:$0x3] }
 0x230   : > { %v4812_v1 = vsel %vm1469_vm4, %v1531_v3, %v1533_v21  ;;  %7171 = vst [vmem:[#allocation35_spill] sm:$0xff] %v4835_v36  ;;  %v1540_v3 = vrot.slane %v4858_v53, 1  ;;  %v4871_v21 = vsel %vm1825_vm5, %v1832_v11, %v1834_v13  ;;  %v1543_v16 = vrot.slane %v4879_v25, 1 }
 0x231   : > { %7169 = vst [vmem:[#allocation33_spill] sm:$0xff] %v4812_v1  ;;  %1690 = vmatmul.f32.gmra.mxu3 %v4812_v1 }
 0x232   : > { %7173 = vst [vmem:[#allocation37_spill] sm:$0xff] %v4855_v4  ;;  %v4900_v13 = vsel %vm1469_vm4, %v1541_v14, %v1543_v16 }
 0x233   : > { %v1353_v15 = vld [vmem:[#allocation2 + $0x10] sm:$0x3]  ;;  %7174 = vst [vmem:[#allocation38_spill] sm:$0xff] %v4871_v21 }
 0x234   : > { %v1473_v61 = vrot.slane %v1353_v15, 1  ;;  %v1829_v23 = vrot.slane %v1353_v15, 2  ;;  %v1415_v15 = vld [vmem:[#allocation8 + $0x50] sm:$0xff]  ;;  %7177 = vst [vmem:[#allocation41_spill] sm:$0xff] %v4895_v38 }
 0x235   : > { %1717 = vmatpush.msrb.mxu3 %v1415_v15  ;;  %7178 = vst [vmem:[#allocation42_spill] sm:$0xff] %v4900_v13  ;;  %v1483_v15 = vrot.slane %v1359_v6, 1 }
 0x236   : > { %v1474_v45 = vsel %vm1469_vm4, %v4734_v39, %v1473_v61  ;;  %v1830_v8 = vsel %vm1825_vm5, %v4738_v54, %v1829_v23  ;;  %v4846_v39 = vsel %vm1825_vm5, %v1831_v28, %v1832_v11  ;;  %v1538_v54 = vrot.slane %v4838_v17, 1  ;;  %v2283_v61 = vld [vmem:[#allocation8 + $0x250] sm:$0xff]  ;;  %v4885_v28 = vpop.f32.mrf.mxu1 }
 0x237   : > { %1618 = vmatmul.f32.gmra.mxu2 %v1474_v45  ;;  %1974 = vmatmul.f32.gmra.mxu0 %v1830_v8  ;;  %v4876_v23 = vsel %vm1469_vm4, %v1540_v3, %v1541_v14  ;;  %v1480_v45 = vrot.slane %v4801_v42, 1  ;;  %v1481_v8 = vrot.slane %v4819_v55, 1  ;;  %7176 = vst [vmem:[#allocation40_spill] sm:$0xff] %v4885_v28  ;;  %v4887_v11 = vld [vmem:[#allocation2 + $0x60] sm:$0xff]  ;;  %v4905_v3 = vld [vmem:[#allocation2 + $0x170] sm:$0xff]  ;;  %v4934_v28 = vpop.f32.mrf.mxu3 }
 0x238   : > { %v4853_v19 = vsel %vm1469_vm4, %v1536_v5, %v1538_v54  ;;  %2148 = vmatmul.f32.gmra.mxu1 %v4862_v27  ;;  %7175 = vst [vmem:[#allocation39_spill] sm:$0xff] %v4876_v23  ;;  %2294 = vmatpush.msrb.mxu2 %v2283_v61  ;;  %v1414_v5 = vld [vmem:[#allocation8 + $0x48] sm:$0xff]  ;;  %v1413_v54 = vld [vmem:[#allocation8 + $0x40] sm:$0xff]  ;;  %v1839_v61 = vrot.slane %v1359_v6, 2 }
 0x239   : > { %1693 = vmatmul.f32.gmra.mxu3 %v4835_v36  ;;  %7172 = vst [vmem:[#allocation36_spill] sm:$0xff] %v4853_v19  ;;  %v4892_v62 = vsel %vm1469_vm4, %v1480_v45, %v1481_v8  ;;  %v1409_v45 = vld [vmem:[#allocation8 + $0x20] sm:$0xff]  ;;  %v4915_v16 = vsel %vm1469_vm4, %v1481_v8, %v1483_v15  ;;  %v2282_v6 = vld [vmem:[#allocation8 + $0x248] sm:$0xff] }
 0x23a   : > { %1718 = vmatpush.msrb.mxu3 %v1414_v5  ;;  %v4907_v5 = vld [vmem:[#allocation2 + $0x68] sm:$0xff]  ;;  %2295 = vmatpush.msrb.mxu2 %v2282_v6  ;;  %v4926_v8 = vld [vmem:[#allocation2 + $0x178] sm:$0x3]  ;;  %7182 = vst [vmem:[#allocation46_spill] sm:$0xff] %v4934_v28  ;;  %v2281_v28 = vld [vmem:[#allocation8 + $0x240] sm:$0xff] }
 0x23b   : > { %v1406_v15 = vld [vmem:[#allocation8 + $0x8] sm:$0xff]  ;;  %v1548_v6 = vrot.slane %v4926_v8, 1 }
 0x23c   : > { %1719 = vmatpush.msrb.mxu3 %v1413_v54  ;;  %v1546_v54 = vrot.slane %v4905_v3, 1  ;;  %2296 = vmatpush.msrb.mxu2 %v2281_v28 }
 0x23e   : > { %1720 = vmatpush.msrb.mxu3 %v1412_v47  ;;  %v4912_v14 = vpop.f32.mrf.mxu1  ;;  %v4918_v47 = vsel %vm1825_vm5, %v1837_v40, %v1839_v61  ;;  %v1485_v40 = vrot.slane %v4840_v59, 1  ;;  %v1486_v61 = vrot.slane %v4862_v27, 1  ;;  %v4949_v56 = vsel %vm1469_vm4, %v1546_v54, %v1548_v6 }
 0x23f   : > { %1621 = vmatmul.f32.gmra.mxu2 %v4843_v57  ;;  %1977 = vmatmul.f32.gmra.mxu0 %v4846_v39  ;;  %7179 = vst [vmem:[#allocation43_spill] sm:$0xff] %v4912_v14  ;;  %v4932_v14 = vld [vmem:[#allocation2 + $0x78] sm:$0xff]  ;;  %v1491_v6 = vrot.slane %v4907_v5, 1 }
 0x240   : > { %2151 = vmatmul.f32.gmra.mxu1 %v4887_v11  ;;  %1721 = vmatpush.msrb.mxu3 %v1411_v24  ;;  %7180 = vst [vmem:[#allocation44_spill] sm:$0xff] %v4918_v47  ;;  %v1408_v24 = vld [vmem:[#allocation8 + $0x18] sm:$0xff] }
 0x241   : > { %1696 = vmatmul.f32.gmra.mxu3 %v4853_v19  ;;  %7185 = vst [vmem:[#allocation49_spill] sm:$0xff] %v4949_v56  ;;  %v1377_v19 = vld [vmem:[#allocation2 + $0xd0] sm:$0x3] }
 0x242   : > { %1722 = vmatpush.msrb.mxu3 %v1410_v26  ;;  %v4923_v26 = vsel %vm1469_vm4, %v1545_v46, %v1546_v54  ;;  %v1405_v46 = vld [vmem:[#allocation8] sm:$0xff]  ;;  %v1490_v54 = vrot.slane %v4887_v11, 1  ;;  %v1513_v36 = vrot.slane %v1377_v19, 1 }
 0x243   : > { %7181 = vst [vmem:[#allocation45_spill] sm:$0xff] %v4923_v26 }
 0x244   : > { %1723 = vmatpush.msrb.mxu3 %v1409_v45  ;;  %v1841_v45 = vrot.slane %v4840_v59, 2 }
 0x246   : > { %1724 = vmatpush.msrb.mxu3 %v1408_v24  ;;  %v4939_v24 = vsel %vm1469_vm4, %v1485_v40, %v1486_v61  ;;  %v4942_v4 = vsel %vm1825_vm5, %v1841_v45, %v1842_v29  ;;  %v4944_v44 = vpop.f32.mrf.mxu1  ;;  %v4955_v45 = vpop.f32.mrf.mxu3 }
 0x247   : > { %1624 = vmatmul.f32.gmra.mxu2 %v4868_v12  ;;  %1980 = vmatmul.f32.gmra.mxu0 %v4871_v21  ;;  %7183 = vst [vmem:[#allocation47_spill] sm:$0xff] %v4942_v4 }
 0x248   : > { %2154 = vmatmul.f32.gmra.mxu1 %v4907_v5  ;;  %1725 = vmatpush.msrb.mxu3 %v1407_v20  ;;  %7184 = vst [vmem:[#allocation48_spill] sm:$0xff] %v4944_v44  ;;  %v1362_v20 = vld [vmem:[#allocation2 + $0x58] sm:$0x3] }
 0x249   : > { %1699 = vmatmul.f32.gmra.mxu3 %v4876_v23  ;;  %v1844_v40 = vrot.slane %v1362_v20, 2  ;;  %7186 = vst [vmem:[#allocation50_spill] sm:$0xff] %v4955_v45 }
 0x24a   : > { %1726 = vmatpush.msrb.mxu3 %v1406_v15  ;;  %v1488_v15 = vrot.slane %v1362_v20, 1  ;;  %v1846_v20 = vrot.slane %v4887_v11, 2 }
 0x24b   : > { %v4961_v44 = vsel %vm1825_vm5, %v1842_v29, %v1844_v40  ;;  %v4976_v29 = vsel %vm1469_vm4, %v1490_v54, %v1491_v6 }
 0x24c   : > { %1727 = vmatpush.msrb.mxu3 %v1405_v46  ;;  %v4958_v46 = vsel %vm1469_vm4, %v1486_v61, %v1488_v15  ;;  %7187 = vst [vmem:[#allocation51_spill] sm:$0xff] %v4961_v44  ;;  %v1847_v61 = vrot.slane %v4907_v5, 2  ;;  %v4972_v15 = vld [vmem:[#allocation2 + $0x90] sm:$0xff] }
 0x24e   : > { %v4965_v28 = vpop.f32.mrf.mxu1  ;;  %v4979_v40 = vsel %vm1825_vm5, %v1846_v20, %v1847_v61  ;;  %v4983_v45 = vpop.f32.mrf.mxu3 }
 0x24f   : > { %1627 = vmatmul.f32.gmra.mxu2 %v4892_v62  ;;  %1983 = vmatmul.f32.gmra.mxu0 %v4895_v38  ;;  %7188 = vst [vmem:[#allocation52_spill] sm:$0xff] %v4965_v28  ;;  %v7191_v28 = vmov 0.0   ;;  %v2619_v38 = vld [vmem:[#allocation8 + $0x378] sm:$0xff] }
 0x250   : > { %2157 = vmatmul.f32.gmra.mxu1 %v4932_v14  ;;  %7189 = vst [vmem:[#allocation53_spill] sm:$0xff] %v4979_v40  ;;  %2620 = vmatpush.msra.mxu0 %v2619_v38  ;;  %v2456_v38 = vld [vmem:[#allocation8 + $0x2f0] sm:$0xff] }
 0x251   : > { %1702 = vmatmul.f32.gmra.mxu3 %v4900_v13  ;;  %7190 = vst [vmem:[#allocation54_spill] sm:$0xff] %v4983_v45  ;;  %v1496_v45 = vrot.slane %v4952_v41, 1 }
 0x256   : > { %v4986_v60 = vpop.f32.mrf.mxu1 }
 0x257   : > { %1630 = vmatmul.f32.gmra.mxu2 %v4915_v16  ;;  %1986 = vmatmul.f32.gmra.mxu0 %v4918_v47  ;;  %7192 = vst [vmem:[#allocation55_spill] sm:$0xff] %v4986_v60  ;;  %v1851_v60 = vrot.slane %v4932_v14, 2  ;;  %v5174_v47 = vld [vmem:[#allocation2 + $0x110] sm:$0xff] }
 0x258   : > { %2160 = vmatmul.f32.gmra.mxu1 %v4952_v41 }
 0x259   : > { %1705 = vmatmul.f32.gmra.mxu3 %v4923_v26 }
 0x25f   : > { %1633 = vmatmul.f32.gmra.mxu2 %v4939_v24  ;;  %1989 = vmatmul.f32.gmra.mxu0 %v4942_v4  ;;  %v2273_v4 = vld [vmem:[#allocation8 + $0x200] sm:$0xff] }
 0x260   : > { %2163 = vmatmul.f32.gmra.mxu1 %v4972_v15 }
 0x261   : > { %1708 = vmatmul.f32.gmra.mxu3 %v4949_v56  ;;  %v5056_v56 = vld [vmem:[#allocation2 + $0xc8] sm:$0xff] }
 0x267   : > { %1636 = vmatmul.f32.gmra.mxu2 %v4958_v46  ;;  %1992 = vmatmul.f32.gmra.mxu0 %v4961_v44 }
 0x268   : > { %2166 = vmatmul.f32.gmra.mxu1 %v4988_v9 }
 0x269   : > { %1728 = vmatmul.f32.vlgmr.msrb.gmra.mxu3 %v4740_v52  ;;  %v1365_v52 = vld [vmem:[#allocation2 + $0x70] sm:$0x3] }
 0x26a   : > { %v1493_v2 = vrot.slane %v1365_v52, 1  ;;  %v1849_v18 = vrot.slane %v1365_v52, 2  ;;  %v1495_v52 = vrot.slane %v4932_v14, 1 }
 0x26c   : > { %v4992_v54 = vsel %vm1469_vm4, %v1491_v6, %v1493_v2  ;;  %v4995_v20 = vsel %vm1825_vm5, %v1847_v61, %v1849_v18  ;;  %v1852_v2 = vrot.slane %v4952_v41, 2  ;;  %v5006_v6 = vld [vmem:[#allocation2 + $0xa8] sm:$0xff]  ;;  %v5009_v18 = vpop.f32.mrf.mxu1  ;;  %v5012_v61 = vsel %vm1469_vm4, %v1495_v52, %v1496_v45 }
 0x26d   : > { %7193 = vst [vmem:[#allocation56_spill] sm:$0xff] %v4995_v20 }
 0x26e   : > { %7195 = vst [vmem:[#allocation58_spill] sm:$0xff] %v5009_v18 }
 0x26f   : > { %1639 = vmatmul.f32.gmra.mxu2 %v4976_v29  ;;  %1995 = vmatmul.f32.gmra.mxu0 %v4979_v40  ;;  %v1380_v40 = vld [vmem:[#allocation2 + $0xe8] sm:$0x3] }
 0x270   : > { %2169 = vmatmul.f32.gmra.mxu1 %v5006_v6 }
 0x271   : > { %1731 = vmatmul.f32.gmra.mxu3 %v7191_v28  ;;  %v5000_v28 = vpop.f32.mrf.mxu3 }
 0x272   : > { %7194 = vst [vmem:[#allocation57_spill] sm:$0xff] %v5000_v28  ;;  %v1368_v28 = vld [vmem:[#allocation2 + $0x88] sm:$0x3] }
 0x273   : > { %v1498_v31 = vrot.slane %v1368_v28, 1  ;;  %v1854_v63 = vrot.slane %v1368_v28, 2  ;;  %v2279_v28 = vld [vmem:[#allocation8 + $0x230] sm:$0xff] }
 0x274   : > { %v5031_v18 = vpop.f32.mrf.mxu1 }
 0x275   : > { %v5026_v52 = vsel %vm1469_vm4, %v1496_v45, %v1498_v31  ;;  %7199 = vst [vmem:[#allocation62_spill] sm:$0xff] %v5031_v18  ;;  %v1856_v31 = vrot.slane %v4972_v15, 2  ;;  %v1857_v45 = vrot.slane %v4988_v9, 2 }
 0x277   : > { %1642 = vmatmul.f32.gmra.mxu2 %v4992_v54  ;;  %1998 = vmatmul.f32.gmra.mxu0 %v4995_v20 }
 0x278   : > { %2172 = vmatmul.f32.gmra.mxu1 %v5020_v10 }
 0x279   : > { %1734 = vmatmul.f32.gmra.mxu3 %v4765_v37  ;;  %v5015_v37 = vsel %vm1825_vm5, %v1851_v60, %v1852_v2  ;;  %v5022_v0 = vpop.f32.mrf.mxu3  ;;  %v5029_v60 = vsel %vm1825_vm5, %v1852_v2, %v1854_v63  ;;  %v2278_v63 = vld [vmem:[#allocation8 + $0x228] sm:$0xff]  ;;  %v5040_v2 = vld [vmem:[#allocation2 + $0xc0] sm:$0xff] }
 0x27a   : > { %7196 = vst [vmem:[#allocation59_spill] sm:$0xff] %v5015_v37 }
 0x27b   : > { %7197 = vst [vmem:[#allocation60_spill] sm:$0xff] %v5022_v0  ;;  %v1500_v0 = vrot.slane %v4972_v15, 1 }
 0x27c   : > { %7198 = vst [vmem:[#allocation61_spill] sm:$0xff] %v5029_v60  ;;  %v5053_v7 = vpop.f32.mrf.mxu1 }
 0x27d   : > { %v5046_v49 = vsel %vm1469_vm4, %v1500_v0, %v1501_v32  ;;  %7202 = vst [vmem:[#allocation65_spill] sm:$0xff] %v5053_v7  ;;  %v5076_v7 = vld [vmem:[#allocation2 + $0xd8] sm:$0xff] }
 0x27f   : > { %1645 = vmatmul.f32.gmra.mxu2 %v5012_v61  ;;  %2001 = vmatmul.f32.gmra.mxu0 %v5015_v37  ;;  %v5130_v37 = vld [vmem:[#allocation2 + $0xf8] sm:$0xff] }
 0x280   : > { %2175 = vmatmul.f32.gmra.mxu1 %v5040_v2 }
 0x281   : > { %1737 = vmatmul.f32.gmra.mxu3 %v4790_v33  ;;  %v2280_v33 = vld [vmem:[#allocation8 + $0x238] sm:$0xff]  ;;  %v5043_v18 = vpop.f32.mrf.mxu3 }
 0x282   : > { %2297 = vmatpush.msrb.mxu2 %v2280_v33  ;;  %7200 = vst [vmem:[#allocation63_spill] sm:$0xff] %v5043_v18  ;;  %v1371_v33 = vld [vmem:[#allocation2 + $0xa0] sm:$0x3] }
 0x283   : > { %v1859_v18 = vrot.slane %v1371_v33, 2 }
 0x284   : > { %2298 = vmatpush.msrb.mxu2 %v2279_v28  ;;  %v1503_v28 = vrot.slane %v1371_v33, 1  ;;  %v1506_v33 = vrot.slane %v5020_v10, 1 }
 0x286   : > { %2299 = vmatpush.msrb.mxu2 %v2278_v63  ;;  %v5060_v0 = vsel %vm1469_vm4, %v1501_v32, %v1503_v28  ;;  %v1861_v32 = vrot.slane %v5006_v6, 2  ;;  %v1862_v28 = vrot.slane %v5020_v10, 2 }
 0x287   : > { %1648 = vmatmul.f32.gmra.mxu2 %v5026_v52  ;;  %2004 = vmatmul.f32.gmra.mxu0 %v5029_v60 }
 0x288   : > { %2300 = vmatpush.msrb.mxu2 %v2277_v43  ;;  %2178 = vmatmul.f32.gmra.mxu1 %v5056_v56 }
 0x289   : > { %1740 = vmatmul.f32.gmra.mxu3 %v4801_v42  ;;  %v5049_v42 = vsel %vm1825_vm5, %v1856_v31, %v1857_v45  ;;  %v5064_v31 = vsel %vm1825_vm5, %v1857_v45, %v1859_v18  ;;  %v5066_v63 = vpop.f32.mrf.mxu3  ;;  %v1374_v45 = vld [vmem:[#allocation2 + $0xb8] sm:$0x3] }
 0x28a   : > { %7201 = vst [vmem:[#allocation64_spill] sm:$0xff] %v5049_v42  ;;  %v1864_v23 = vrot.slane %v1374_v45, 2 }
 0x28b   : > { %7203 = vst [vmem:[#allocation66_spill] sm:$0xff] %v5064_v31 }
 0x28c   : > { %7204 = vst [vmem:[#allocation67_spill] sm:$0xff] %v5066_v63  ;;  %v5070_v43 = vpop.f32.mrf.mxu1  ;;  %v2276_v63 = vld [vmem:[#allocation8 + $0x218] sm:$0xff] }
 0x28d   : > { %7205 = vst [vmem:[#allocation68_spill] sm:$0xff] %v5070_v43  ;;  %2301 = vmatpush.msrb.mxu2 %v2276_v63  ;;  %v5106_v63 = vpop.f32.mrf.mxu0  ;;  %v2790_v43 = vld [vmem:[#allocation8 + $0x3f0] sm:$0xff] }
 0x28f   : > { %1651 = vmatmul.f32.gmra.mxu2 %v5046_v49  ;;  %2007 = vmatmul.f32.gmra.mxu0 %v5049_v42 }
 0x290   : > { %2181 = vmatmul.f32.gmra.mxu1 %v5076_v7 }
 0x291   : > { %1743 = vmatmul.f32.gmra.mxu3 %v4819_v55  ;;  %v1505_v55 = vrot.slane %v5006_v6, 1  ;;  %v5090_v13 = vpop.f32.mrf.mxu3  ;;  %v5125_v60 = vpop.f32.mrf.mxu2 }
 0x292   : > { %7208 = vst [vmem:[#allocation71_spill] sm:$0xff] %v5090_v13  ;;  %v1511_v13 = vrot.slane %v5056_v56, 1 }
 0x293   : > { %v5080_v18 = vsel %vm1469_vm4, %v1505_v55, %v1506_v33  ;;  %v5092_v55 = vld [vmem:[#allocation2 + $0xe0] sm:$0xff] }
 0x294   : > { %v5088_v26 = vpop.f32.mrf.mxu1  ;;  %v1872_v22 = vrot.slane %v5092_v55, 2 }
 0x295   : > { %7207 = vst [vmem:[#allocation70_spill] sm:$0xff] %v5088_v26 }
 0x297   : > { %1654 = vmatmul.f32.gmra.mxu2 %v5060_v0  ;;  %2010 = vmatmul.f32.gmra.mxu0 %v5064_v31  ;;  %v1508_v31 = vrot.slane %v1374_v45, 1  ;;  %v1510_v45 = vrot.slane %v5040_v2, 1 }
 0x298   : > { %2184 = vmatmul.f32.gmra.mxu1 %v5092_v55 }
 0x299   : > { %1746 = vmatmul.f32.gmra.mxu3 %v4840_v59  ;;  %v5084_v59 = vsel %vm1825_vm5, %v1861_v32, %v1862_v28  ;;  %v5096_v32 = vsel %vm1469_vm4, %v1506_v33, %v1508_v31  ;;  %v2275_v31 = vld [vmem:[#allocation8 + $0x210] sm:$0xff]  ;;  %v1866_v33 = vrot.slane %v5040_v2, 2 }
 0x29a   : > { %7206 = vst [vmem:[#allocation69_spill] sm:$0xff] %v5084_v59  ;;  %2302 = vmatpush.msrb.mxu2 %v2275_v31 }
 0x29f   : > { %1657 = vmatmul.f32.gmra.mxu2 %v5080_v18  ;;  %2013 = vmatmul.f32.gmra.mxu0 %v5084_v59  ;;  %v5100_v59 = vsel %vm1825_vm5, %v1862_v28, %v1864_v23  ;;  %v1867_v23 = vrot.slane %v5056_v56, 2  ;;  %v5114_v28 = vld [vmem:[#allocation2 + $0xf0] sm:$0xff] }
 0x2a0   : > { %7209 = vst [vmem:[#allocation72_spill] sm:$0xff] %v5100_v59  ;;  %2187 = vmatmul.f32.gmra.mxu1 %v5114_v28 }
 0x2a1   : > { %1749 = vmatmul.f32.gmra.mxu3 %v4862_v27  ;;  %v5104_v27 = vpop.f32.mrf.mxu1  ;;  %v5110_v42 = vpop.f32.mrf.mxu3 }
 0x2a2   : > { %7210 = vst [vmem:[#allocation73_spill] sm:$0xff] %v5104_v27 }
 0x2a3   : > { %7211 = vst [vmem:[#allocation74_spill] sm:$0xff] %v5110_v42  ;;  %v1869_v42 = vrot.slane %v1377_v19, 2 }
 0x2a7   : > { %1660 = vmatmul.f32.gmra.mxu2 %v5096_v32  ;;  %2016 = vmatmul.f32.gmra.mxu0 %v5100_v59  ;;  %v5122_v59 = vsel %vm1825_vm5, %v1866_v33, %v1867_v23  ;;  %v5138_v33 = vsel %vm1469_vm4, %v1511_v13, %v1513_v36  ;;  %v1516_v36 = vrot.slane %v5092_v55, 1 }
 0x2a8   : > { %7212 = vst [vmem:[#allocation75_spill] sm:$0xff] %v5122_v59  ;;  %2190 = vmatmul.f32.gmra.mxu1 %v5130_v37 }
 0x2a9   : > { %1752 = vmatmul.f32.gmra.mxu3 %v4887_v11  ;;  %v5118_v11 = vsel %vm1469_vm4, %v1510_v45, %v1511_v13  ;;  %v5128_v31 = vpop.f32.mrf.mxu1  ;;  %v1871_v13 = vrot.slane %v5076_v7, 2 }
 0x2aa   : > { %7213 = vst [vmem:[#allocation76_spill] sm:$0xff] %v5128_v31  ;;  %v1874_v31 = vrot.slane %v1380_v40, 2 }
 0x2af   : > { %1663 = vmatmul.f32.gmra.mxu2 %v5118_v11  ;;  %2019 = vmatmul.f32.gmra.mxu0 %v5122_v59  ;;  %v5142_v59 = vsel %vm1825_vm5, %v1867_v23, %v1869_v42  ;;  %v5154_v42 = vld [vmem:[#allocation2 + $0x108] sm:$0xff] }
 0x2b0   : > { %7215 = vst [vmem:[#allocation78_spill] sm:$0xff] %v5142_v59  ;;  %2193 = vmatmul.f32.gmra.mxu1 %v5154_v42 }
 0x2b1   : > { %1755 = vmatmul.f32.gmra.mxu3 %v4907_v5  ;;  %v2274_v5 = vld [vmem:[#allocation8 + $0x208] sm:$0xff]  ;;  %v5146_v19 = vpop.f32.mrf.mxu1 }
 0x2b2   : > { %2303 = vmatpush.msrb.mxu2 %v2274_v5  ;;  %7216 = vst [vmem:[#allocation79_spill] sm:$0xff] %v5146_v19  ;;  %v5166_v5 = vsel %vm1825_vm5, %v1871_v13, %v1872_v22 }
 0x2b3   : > { %7219 = vst [vmem:[#allocation82_spill] sm:$0xff] %v5166_v5 }
 0x2b4   : > { %v5132_v45 = vpop.f32.mrf.mxu0  ;;  %v5134_v1 = vpop.f32.mrf.mxu3  ;;  %2304 = vmatpush.msrb.mxu2 %v2273_v4 }
 0x2b5   : > { %7214 = vst [vmem:[#allocation77_spill] sm:$0xff] %v5134_v1  ;;  %v1515_v1 = vrot.slane %v5076_v7, 1 }
 0x2b7   : > { %1666 = vmatmul.f32.gmra.mxu2 %v5138_v33  ;;  %2022 = vmatmul.f32.gmra.mxu0 %v5142_v59 }
 0x2b8   : > { %2196 = vmatmul.f32.gmra.mxu1 %v5174_v47 }
 0x2b9   : > { %1758 = vmatmul.f32.gmra.mxu3 %v4932_v14  ;;  %v5162_v14 = vsel %vm1469_vm4, %v1515_v1, %v1516_v36  ;;  %v5170_v44 = vpop.f32.mrf.mxu1 }
 0x2ba   : > { %v5148_v20 = vpop.f32.mrf.mxu2  ;;  %7218 = vst [vmem:[#allocation81_spill] sm:$0xff] %v5162_v14 }
 0x2bb   : > { %7220 = vst [vmem:[#allocation83_spill] sm:$0xff] %v5170_v44  ;;  %v1521_v44 = vrot.slane %v5130_v37, 1 }
 0x2bc   : > { %v5156_v23 = vpop.f32.mrf.mxu0  ;;  %v5158_v59 = vpop.f32.mrf.mxu3 }
 0x2bd   : > { %7217 = vst [vmem:[#allocation80_spill] sm:$0xff] %v5158_v59  ;;  %v1518_v59 = vrot.slane %v1380_v40, 1  ;;  %v2457_v40 = vld [vmem:[#allocation8 + $0x2f8] sm:$0xff] }
 0x2be   : > { %2458 = vmatpush.msra.mxu3 %v2457_v40  ;;  %v2960_v40 = vld [vmem:[#allocation8 + $0x478] sm:$0xff] }
 0x2bf   : > { %1669 = vmatmul.f32.gmra.mxu2 %v5162_v14  ;;  %2025 = vmatmul.f32.gmra.mxu0 %v5166_v5  ;;  %v5182_v13 = vsel %vm1469_vm4, %v1516_v36, %v1518_v59  ;;  %v1876_v59 = vrot.slane %v5114_v28, 2  ;;  %v1877_v36 = vrot.slane %v5130_v37, 2 }
 0x2c0   : > { %7222 = vst [vmem:[#allocation85_spill] sm:$0xff] %v5182_v13  ;;  %2199 = vmatmul.f32.gmra.mxu1 %v4775_v50  ;;  %2961 = vmatpush.msra.mxu2 %v2960_v40  ;;  %v1525_v40 = vrot.slane %v5154_v42, 1 }
 0x2c1   : > { %1761 = vmatmul.f32.gmra.mxu3 %v4952_v41  ;;  %v5186_v41 = vsel %vm1825_vm5, %v1872_v22, %v1874_v31  ;;  %v5190_v4 = vpop.f32.mrf.mxu1 }
 0x2c2   : > { %v5172_v19 = vpop.f32.mrf.mxu2  ;;  %7223 = vst [vmem:[#allocation86_spill] sm:$0xff] %v5186_v41  ;;  %2459 = vmatpush.msra.mxu3 %v2456_v38  ;;  %v1386_v38 = vld [vmem:[#allocation2 + $0x118] sm:$0x3] }
 0x2c3   : > { %7224 = vst [vmem:[#allocation87_spill] sm:$0xff] %v5190_v4  ;;  %v1383_v4 = vld [vmem:[#allocation2 + $0x100] sm:$0x3] }
 0x2c4   : > { %v5176_v1 = vpop.f32.mrf.mxu0  ;;  %v5178_v27 = vpop.f32.mrf.mxu3  ;;  %v1879_v21 = vrot.slane %v1383_v4, 2 }
 0x2c5   : > { %7221 = vst [vmem:[#allocation84_spill] sm:$0xff] %v5178_v27  ;;  %v1520_v27 = vrot.slane %v5114_v28, 1 }
 0x2c7   : > { %1672 = vmatmul.f32.gmra.mxu2 %v5182_v13  ;;  %2028 = vmatmul.f32.gmra.mxu0 %v5186_v41  ;;  %v5208_v41 = vsel %vm1825_vm5, %v1876_v59, %v1877_v36  ;;  %v1523_v13 = vrot.slane %v1383_v4, 1 }
 0x2c8   : > { %7227 = vst [vmem:[#allocation90_spill] sm:$0xff] %v5208_v41  ;;  %2202 = vmatmul.f32.gmra.mxu1 %v4769_v51 }
 0x2c9   : > { %1764 = vmatmul.f32.gmra.mxu3 %v4972_v15  ;;  %v5204_v15 = vsel %vm1469_vm4, %v1520_v27, %v1521_v44  ;;  %v5212_v26 = vpop.f32.mrf.mxu1  ;;  %v2791_v27 = vld [vmem:[#allocation8 + $0x3f8] sm:$0xff] }
 0x2ca   : > { %v5192_v5 = vpop.f32.mrf.mxu2  ;;  %7226 = vst [vmem:[#allocation89_spill] sm:$0xff] %v5204_v15  ;;  %2792 = vmatpush.msra.mxu1 %v2791_v27  ;;  %v1526_v27 = vrot.slane %v5174_v47, 1 }
 0x2cb   : > { %7228 = vst [vmem:[#allocation91_spill] sm:$0xff] %v5212_v26  ;;  %v2959_v26 = vld [vmem:[#allocation8 + $0x470] sm:$0xff] }
 0x2cc   : > { %v5198_v22 = vpop.f32.mrf.mxu0  ;;  %v5200_v31 = vpop.f32.mrf.mxu3  ;;  %2962 = vmatpush.msra.mxu2 %v2959_v26  ;;  %2793 = vmatpush.msra.mxu1 %v2790_v43  ;;  %v2455_v26 = vld [vmem:[#allocation8 + $0x2e8] sm:$0xff] }
 0x2cd   : > { %7225 = vst [vmem:[#allocation88_spill] sm:$0xff] %v5200_v31  ;;  %2460 = vmatpush.msra.mxu3 %v2455_v26 }
 0x2cf   : > { %1675 = vmatmul.f32.gmra.mxu2 %v5204_v15  ;;  %2031 = vmatmul.f32.gmra.mxu0 %v5208_v41  ;;  %v5222_v41 = vsel %vm1469_vm4, %v1521_v44, %v1523_v13  ;;  %v1881_v44 = vrot.slane %v5154_v42, 2  ;;  %v1882_v13 = vrot.slane %v5174_v47, 2 }
 0x2d0   : > { %7230 = vst [vmem:[#allocation93_spill] sm:$0xff] %v5222_v41  ;;  %2205 = vmatmul.f32.gmra.mxu1 %v4815_v34 }
 0x2d1   : > { %1767 = vmatmul.f32.gmra.mxu3 %v4988_v9  ;;  %v5226_v9 = vsel %vm1825_vm5, %v1877_v36, %v1879_v21 }
 0x2d2   : > { %v5214_v31 = vpop.f32.mrf.mxu2  ;;  %7231 = vst [vmem:[#allocation94_spill] sm:$0xff] %v5226_v9 }
 0x2d4   : > { %v5216_v15 = vpop.f32.mrf.mxu0  ;;  %v5218_v59 = vpop.f32.mrf.mxu3 }
 0x2d5   : > { %7229 = vst [vmem:[#allocation92_spill] sm:$0xff] %v5218_v59  ;;  %v5236_v59 = vpop.f32.mrf.mxu1 }
 0x2d6   : > { %7232 = vst [vmem:[#allocation95_spill] sm:$0xff] %v5236_v59 }
 0x2d7   : > { %1678 = vmatmul.f32.gmra.mxu2 %v5222_v41  ;;  %2034 = vmatmul.f32.gmra.mxu0 %v5226_v9  ;;  %v5248_v9 = vsel %vm1825_vm5, %v1881_v44, %v1882_v13  ;;  %v2618_v41 = vld [vmem:[#allocation8 + $0x370] sm:$0xff] }
 0x2d8   : > { %7235 = vst [vmem:[#allocation98_spill] sm:$0xff] %v5248_v9  ;;  %2621 = vmatpush.msra.mxu0 %v2618_v41  ;;  %2208 = vmatmul.f32.gmra.mxu1 %v4817_v35  ;;  %v1886_v41 = vrot.slane %v4775_v50, 2  ;;  %v2617_v50 = vld [vmem:[#allocation8 + $0x368] sm:$0xff] }
 0x2d9   : > { %1770 = vmatmul.f32.gmra.mxu3 %v5006_v6  ;;  %v5244_v6 = vsel %vm1469_vm4, %v1525_v40, %v1526_v27  ;;  %v1884_v40 = vrot.slane %v1386_v38, 2 }
 0x2da   : > { %v5230_v4 = vpop.f32.mrf.mxu2  ;;  %7234 = vst [vmem:[#allocation97_spill] sm:$0xff] %v5244_v6  ;;  %2622 = vmatpush.msra.mxu0 %v2617_v50 }
 0x2dc   : > { %v5238_v21 = vpop.f32.mrf.mxu0  ;;  %v5240_v36 = vpop.f32.mrf.mxu3 }
 0x2dd   : > { %7233 = vst [vmem:[#allocation96_spill] sm:$0xff] %v5240_v36  ;;  %v1528_v36 = vrot.slane %v1386_v38, 1  ;;  %v5259_v44 = vpop.f32.mrf.mxu1  ;;  %v1887_v38 = vrot.slane %v4769_v51, 2  ;;  %v2958_v51 = vld [vmem:[#allocation8 + $0x468] sm:$0xff] }
 0x2de   : > { %2963 = vmatpush.msra.mxu2 %v2958_v51  ;;  %v2454_v51 = vld [vmem:[#allocation8 + $0x2e0] sm:$0xff] }
 0x2df   : > { %1681 = vmatmul.f32.gmra.mxu2 %v5244_v6  ;;  %2037 = vmatmul.f32.gmra.mxu0 %v5248_v9  ;;  %v5262_v9 = vsel %vm1469_vm4, %v1526_v27, %v1528_v36  ;;  %v5279_v36 = vsel %vm1825_vm5, %v1886_v41, %v1887_v38  ;;  %v1889_v41 = vrot.slane %v4808_v58, 2  ;;  %v2615_v58 = vld [vmem:[#allocation8 + $0x358] sm:$0xff] }
 0x2e0   : > { %2211 = vmatmul.f32.gmra.mxu1 %v4858_v53  ;;  %7238 = vst [vmem:[#allocation101_spill] sm:$0xff] %v5279_v36  ;;  %2461 = vmatpush.msra.mxu3 %v2454_v51 }
 0x2e1   : > { %1773 = vmatmul.f32.gmra.mxu3 %v5020_v10  ;;  %v5266_v10 = vsel %vm1825_vm5, %v1882_v13, %v1884_v40 }
 0x2e2   : > { %v5252_v59 = vpop.f32.mrf.mxu2  ;;  %7237 = vst [vmem:[#allocation100_spill] sm:$0xff] %v5266_v10 }
 0x2e4   : > { %v5254_v14 = vpop.f32.mrf.mxu0  ;;  %v5256_v6 = vpop.f32.mrf.mxu3 }
 0x2e5   : > { %7236 = vst [vmem:[#allocation99_spill] sm:$0xff] %v5256_v6  ;;  %v5285_v40 = vpop.f32.mrf.mxu1 }
 0x2e7   : > { %1684 = vmatmul.f32.gmra.mxu2 %v5262_v9  ;;  %2040 = vmatmul.f32.gmra.mxu0 %v5266_v10 }
 0x2e8   : > { %2214 = vmatmul.f32.gmra.mxu1 %v4860_v30 }
 0x2e9   : > { %1776 = vmatmul.f32.gmra.mxu3 %v5040_v2 }
 0x2ea   : > { %v5270_v43 = vpop.f32.mrf.mxu2 }
 0x2ec   : > { %v5274_v6 = vpop.f32.mrf.mxu0  ;;  %v1729_v27 = vpop.f32.mrf.mxu3 }
 0x2ed   : > { %v1730_v13 = vadd.f32 %v1729_v27, %v5125_v60  ;;  %v2789_v60 = vld [vmem:[#allocation8 + $0x3e8] sm:$0xff]  ;;  %v5305_v50 = vpop.f32.mrf.mxu1 }
 0x2ee   : > { %2794 = vmatpush.msra.mxu1 %v2789_v60  ;;  %v2614_v60 = vld [vmem:[#allocation8 + $0x350] sm:$0xff] }
 0x2ef   : > { %2305 = vmatmul.f32.vlgmr.msrb.gmra.mxu2 %v4843_v57  ;;  %v5283_v2 = vadd.f32 %v5106_v63, %v1730_v13  ;;  %2043 = vmatmul.f32.gmra.mxu0 %v5279_v36  ;;  %v2616_v13 = vld [vmem:[#allocation8 + $0x360] sm:$0xff]  ;;  %v5297_v36 = vsel %vm1825_vm5, %v1887_v38, %v1889_v41  ;;  %v1891_v38 = vrot.slane %v4815_v34, 2 }
 0x2f0   : > { %2623 = vmatpush.msra.mxu0 %v2616_v13  ;;  %7239 = vst [vmem:[#allocation102_spill] sm:$0xff] %v5297_v36  ;;  %2217 = vmatmul.f32.gmra.mxu1 %v4903_v48 }
 0x2f1   : > { %1779 = vmatmul.f32.gmra.mxu3 %v5056_v56 }
 0x2f2   : > { %v5289_v26 = vpop.f32.mrf.mxu2  ;;  %2624 = vmatpush.msra.mxu0 %v2615_v58  ;;  %v2611_v58 = vld [vmem:[#allocation8 + $0x338] sm:$0xff] }
 0x2f4   : > { %v5292_v57 = vpop.f32.mrf.mxu0  ;;  %v1732_v63 = vpop.f32.mrf.mxu3  ;;  %2625 = vmatpush.msra.mxu0 %v2614_v60  ;;  %v2788_v60 = vld [vmem:[#allocation8 + $0x3e0] sm:$0xff] }
 0x2f5   : > { %v1733_v27 = vadd.f32 %v1732_v63, %v5148_v20  ;;  %2795 = vmatpush.msra.mxu1 %v2788_v60  ;;  %v2607_v60 = vld [vmem:[#allocation8 + $0x318] sm:$0xff] }
 0x2f7   : > { %2308 = vmatmul.f32.gmra.mxu2 %v4868_v12  ;;  %v5301_v56 = vadd.f32 %v5132_v45, %v1733_v27  ;;  %2046 = vmatmul.f32.gmra.mxu0 %v5297_v36  ;;  %v1892_v12 = vrot.slane %v4817_v35, 2  ;;  %v2612_v27 = vld [vmem:[#allocation8 + $0x340] sm:$0xff]  ;;  %v2453_v36 = vld [vmem:[#allocation8 + $0x2d8] sm:$0xff] }
 0x2f8   : > { %v2957_v35 = vld [vmem:[#allocation8 + $0x460] sm:$0xff]  ;;  %2220 = vmatmul.f32.gmra.mxu1 %v4905_v3  ;;  %2462 = vmatpush.msra.mxu3 %v2453_v36  ;;  %v2783_v36 = vld [vmem:[#allocation8 + $0x3b8] sm:$0xff] }
 0x2f9   : > { %1782 = vmatmul.f32.gmra.mxu3 %v5076_v7  ;;  %v2613_v7 = vld [vmem:[#allocation8 + $0x348] sm:$0xff]  ;;  %v5316_v13 = vsel %vm1825_vm5, %v1891_v38, %v1892_v12  ;;  %2964 = vmatpush.msra.mxu2 %v2957_v35  ;;  %v1894_v38 = vrot.slane %v4838_v17, 2  ;;  %v2608_v35 = vld [vmem:[#allocation8 + $0x320] sm:$0xff] }
 0x2fa   : > { %v5307_v20 = vpop.f32.mrf.mxu2  ;;  %2626 = vmatpush.msra.mxu0 %v2613_v7  ;;  %7240 = vst [vmem:[#allocation103_spill] sm:$0xff] %v5316_v13 }
 0x2fc   : > { %v5311_v45 = vpop.f32.mrf.mxu0  ;;  %v1735_v41 = vpop.f32.mrf.mxu3  ;;  %2627 = vmatpush.msra.mxu0 %v2612_v27  ;;  %v2787_v27 = vld [vmem:[#allocation8 + $0x3d8] sm:$0xff] }
 0x2fd   : > { %v1736_v63 = vadd.f32 %v1735_v41, %v5172_v19  ;;  %v2610_v19 = vld [vmem:[#allocation8 + $0x330] sm:$0xff]  ;;  %v5327_v41 = vpop.f32.mrf.mxu1  ;;  %2796 = vmatpush.msra.mxu1 %v2787_v27 }
 0x2fe   : > { %2628 = vmatpush.msra.mxu0 %v2611_v58  ;;  %v2786_v58 = vld [vmem:[#allocation8 + $0x3d0] sm:$0xff] }
 0x2ff   : > { %2311 = vmatmul.f32.gmra.mxu2 %v4892_v62  ;;  %v5320_v34 = vadd.f32 %v5156_v23, %v1736_v63  ;;  %2049 = vmatmul.f32.gmra.mxu0 %v5316_v13  ;;  %v5334_v13 = vsel %vm1825_vm5, %v1892_v12, %v1894_v38  ;;  %v2606_v12 = vld [vmem:[#allocation8 + $0x310] sm:$0xff]  ;;  %v1896_v38 = vrot.slane %v4858_v53, 2  ;;  %v2604_v53 = vld [vmem:[#allocation8 + $0x300] sm:$0xff] }
 0x300   : > { %2629 = vmatpush.msra.mxu0 %v2610_v19  ;;  %7241 = vst [vmem:[#allocation104_spill] sm:$0xff] %v5334_v13  ;;  %2797 = vmatpush.msra.mxu1 %v2786_v58  ;;  %v5348_v27 = vld [vmem:[#allocation2 + $0x180] sm:$0xff]  ;;  %v2605_v58 = vld [vmem:[#allocation8 + $0x308] sm:$0xff] }
 0x301   : > { %1785 = vmatmul.f32.gmra.mxu3 %v5092_v55  ;;  %v2609_v55 = vld [vmem:[#allocation8 + $0x328] sm:$0xff]  ;;  %2223 = vmatmul.f32.gmra.mxu1 %v5348_v27 }
 0x302   : > { %v5324_v51 = vpop.f32.mrf.mxu2  ;;  %2630 = vmatpush.msra.mxu0 %v2609_v55 }
 0x304   : > { %v5329_v23 = vpop.f32.mrf.mxu0  ;;  %v1738_v63 = vpop.f32.mrf.mxu3  ;;  %2631 = vmatpush.msra.mxu0 %v2608_v35 }
 0x305   : > { %v1739_v7 = vadd.f32 %v1738_v63, %v5192_v5  ;;  %v2785_v5 = vld [vmem:[#allocation8 + $0x3c8] sm:$0xff]  ;;  %v2784_v63 = vld [vmem:[#allocation8 + $0x3c0] sm:$0xff] }
 0x306   : > { %2632 = vmatpush.msra.mxu0 %v2607_v60  ;;  %2798 = vmatpush.msra.mxu1 %v2785_v5  ;;  %v2956_v5 = vld [vmem:[#allocation8 + $0x458] sm:$0xff] }
 0x307   : > { %2314 = vmatmul.f32.gmra.mxu2 %v4915_v16  ;;  %v5338_v17 = vadd.f32 %v5176_v1, %v1739_v7  ;;  %2052 = vmatmul.f32.gmra.mxu0 %v5334_v13  ;;  %v1897_v1 = vrot.slane %v4860_v30, 2  ;;  %v5352_v13 = vpop.f32.mrf.mxu1 }
 0x308   : > { %2633 = vmatpush.msra.mxu0 %v2606_v12  ;;  %2799 = vmatpush.msra.mxu1 %v2784_v63  ;;  %v2781_v12 = vld [vmem:[#allocation8 + $0x3a8] sm:$0xff] }
 0x309   : > { %1788 = vmatmul.f32.gmra.mxu3 %v5114_v28  ;;  %v5355_v30 = vsel %vm1825_vm5, %v1896_v38, %v1897_v1  ;;  %2965 = vmatpush.msra.mxu2 %v2956_v5  ;;  %v1899_v38 = vrot.slane %v4879_v25, 2  ;;  %v2452_v5 = vld [vmem:[#allocation8 + $0x2d0] sm:$0xff] }
 0x30a   : > { %v5342_v19 = vpop.f32.mrf.mxu2  ;;  %7242 = vst [vmem:[#allocation105_spill] sm:$0xff] %v5355_v30  ;;  %2634 = vmatpush.msra.mxu0 %v2605_v58  ;;  %2800 = vmatpush.msra.mxu1 %v2783_v36 }
 0x30b   : > { %v5373_v36 = vsel %vm1825_vm5, %v1897_v1, %v1899_v38  ;;  %2463 = vmatpush.msra.mxu3 %v2452_v5  ;;  %v1901_v1 = vrot.slane %v4903_v48, 2  ;;  %v2955_v48 = vld [vmem:[#allocation8 + $0x450] sm:$0xff]  ;;  %v1904_v5 = vrot.slane %v4926_v8, 2 }
 0x30c   : > { %v5346_v7 = vpop.f32.mrf.mxu0  ;;  %v1741_v55 = vpop.f32.mrf.mxu3  ;;  %2635 = vmatpush.msra.mxu0 %v2604_v53  ;;  %7243 = vst [vmem:[#allocation106_spill] sm:$0xff] %v5373_v36  ;;  %2966 = vmatpush.msra.mxu2 %v2955_v48 }
 0x30d   : > { %v1742_v35 = vadd.f32 %v1741_v55, %v5214_v31  ;;  %v2782_v31 = vld [vmem:[#allocation8 + $0x3b0] sm:$0xff]  ;;  %v2780_v55 = vld [vmem:[#allocation8 + $0x3a0] sm:$0xff] }
 0x30e   : > { %2801 = vmatpush.msra.mxu1 %v2782_v31  ;;  %v2778_v31 = vld [vmem:[#allocation8 + $0x390] sm:$0xff] }
 0x30f   : > { %2317 = vmatmul.f32.gmra.mxu2 %v4939_v24  ;;  %v5359_v60 = vadd.f32 %v5198_v22, %v1742_v35  ;;  %2055 = vmatmul.f32.gmra.mxu0 %v5355_v30  ;;  %v5366_v22 = vld [vmem:[#allocation2 + $0x188] sm:$0xff]  ;;  %v5380_v53 = vpop.f32.mrf.mxu1  ;;  %v5462_v30 = vld [vmem:[#allocation2 + $0x140] sm:$0xff] }
 0x310   : > { %2802 = vmatpush.msra.mxu1 %v2781_v12  ;;  %v1902_v12 = vrot.slane %v4905_v3, 2 }
 0x311   : > { %1791 = vmatmul.f32.gmra.mxu3 %v5130_v37  ;;  %2226 = vmatmul.f32.gmra.mxu1 %v5366_v22  ;;  %v2779_v37 = vld [vmem:[#allocation8 + $0x398] sm:$0xff] }
 0x312   : > { %v5363_v63 = vpop.f32.mrf.mxu2  ;;  %2803 = vmatpush.msra.mxu1 %v2780_v55 }
 0x314   : > { %v1744_v10 = vpop.f32.mrf.mxu3  ;;  %v5368_v35 = vpop.f32.mrf.mxu0  ;;  %2804 = vmatpush.msra.mxu1 %v2779_v37  ;;  %v5391_v37 = vsel %vm1825_vm5, %v1901_v1, %v1902_v12 }
 0x315   : > { %v1745_v58 = vadd.f32 %v1744_v10, %v5230_v4  ;;  %v2777_v4 = vld [vmem:[#allocation8 + $0x388] sm:$0xff]  ;;  %7244 = vst [vmem:[#allocation107_spill] sm:$0xff] %v5391_v37 }
 0x316   : > { %2805 = vmatpush.msra.mxu1 %v2778_v31 }
 0x317   : > { %2320 = vmatmul.f32.gmra.mxu2 %v4958_v46  ;;  %v5377_v25 = vadd.f32 %v5216_v15, %v1745_v58  ;;  %2058 = vmatmul.f32.gmra.mxu0 %v5373_v36  ;;  %v2776_v15 = vld [vmem:[#allocation8 + $0x380] sm:$0xff] }
 0x318   : > { %2806 = vmatpush.msra.mxu1 %v2777_v4 }
 0x319   : > { %1794 = vmatmul.f32.gmra.mxu3 %v5154_v42 }
 0x31a   : > { %v5383_v10 = vpop.f32.mrf.mxu2  ;;  %2807 = vmatpush.msra.mxu1 %v2776_v15  ;;  %v5409_v15 = vsel %vm1825_vm5, %v1902_v12, %v1904_v5  ;;  %v3746_v5 = vld [vmem:[#allocation2 + $0x30] sm:$0xff] }
 0x31b   : > { %2808 = vmatmul.f32.vlgmr.msra.gmra.mxu1 %v4892_v62  ;;  %7245 = vst [vmem:[#allocation108_spill] sm:$0xff] %v5409_v15 }
 0x31c   : > { %v1747_v38 = vpop.f32.mrf.mxu3  ;;  %v5387_v55 = vpop.f32.mrf.mxu0 }
 0x31d   : > { %v1748_v58 = vadd.f32 %v1747_v38, %v5252_v59  ;;  %v5402_v59 = vpop.f32.mrf.mxu1  ;;  %v2451_v38 = vld [vmem:[#allocation8 + $0x2c8] sm:$0xff] }
 0x31e   : > { %2464 = vmatpush.msra.mxu3 %v2451_v38 }
 0x31f   : > { %2323 = vmatmul.f32.gmra.mxu2 %v4976_v29  ;;  %v5395_v31 = vadd.f32 %v5238_v21, %v1748_v58  ;;  %2061 = vmatmul.f32.gmra.mxu0 %v5391_v37  ;;  %v5417_v58 = vld [vmem:[#allocation2 + $0x120] sm:$0xff] }
 0x321   : > { %1797 = vmatmul.f32.gmra.mxu3 %v5174_v47 }
 0x322   : > { %v5400_v3 = vpop.f32.mrf.mxu2 }
 0x323   : > { %2811 = vmatmul.f32.gmra.mxu1 %v4915_v16 }
 0x324   : > { %v1750_v4 = vpop.f32.mrf.mxu3  ;;  %v5405_v1 = vpop.f32.mrf.mxu0 }
 0x325   : > { %v1751_v21 = vadd.f32 %v1750_v4, %v5270_v43  ;;  %v5422_v43 = vpop.f32.mrf.mxu1  ;;  %v2954_v4 = vld [vmem:[#allocation8 + $0x448] sm:$0xff] }
 0x326   : > { %7246 = vst [vmem:[#allocation109_spill] sm:$0xff] %v5422_v43  ;;  %2967 = vmatpush.msra.mxu2 %v2954_v4 }
 0x327   : > { %2326 = vmatmul.f32.gmra.mxu2 %v4992_v54  ;;  %v5413_v62 = vadd.f32 %v5254_v14, %v1751_v21  ;;  %2064 = vmatmul.f32.gmra.mxu0 %v5409_v15  ;;  %v5432_v21 = vld [vmem:[#allocation2 + $0x128] sm:$0xff] }
 0x329   : > { %1800 = vmatmul.f32.gmra.mxu3 %v5417_v58 }
 0x32a   : > { %v5420_v8 = vpop.f32.mrf.mxu2 }
 0x32b   : > { %2814 = vmatmul.f32.gmra.mxu1 %v4939_v24 }
 0x32c   : > { %v1753_v12 = vpop.f32.mrf.mxu3  ;;  %v5424_v48 = vpop.f32.mrf.mxu0 }
 0x32d   : > { %v1754_v14 = vadd.f32 %v1753_v12, %v5289_v26  ;;  %v5440_v12 = vpop.f32.mrf.mxu1 }
 0x32e   : > { %7247 = vst [vmem:[#allocation110_spill] sm:$0xff] %v5440_v12 }
 0x32f   : > { %2329 = vmatmul.f32.gmra.mxu2 %v5012_v61  ;;  %v5429_v16 = vadd.f32 %v5274_v6, %v1754_v14  ;;  %2636 = vmatmul.f32.vlgmr.msra.gmra.mxu0 %v3746_v5  ;;  %v3748_v6 = vld [vmem:[#allocation2 + $0x38] sm:$0xff]  ;;  %v2450_v14 = vld [vmem:[#allocation8 + $0x2c0] sm:$0xff] }
 0x330   : > { %v5447_v5 = vld [vmem:[#allocation2 + $0x138] sm:$0xff]  ;;  %2465 = vmatpush.msra.mxu3 %v2450_v14 }
 0x331   : > { %1803 = vmatmul.f32.gmra.mxu3 %v5432_v21 }
 0x332   : > { %v5435_v38 = vpop.f32.mrf.mxu2 }
 0x333   : > { %2817 = vmatmul.f32.gmra.mxu1 %v4958_v46  ;;  %v3750_v46 = vld [vmem:[#allocation2 + $0x48] sm:$0xff] }
 0x334   : > { %v1756_v15 = vpop.f32.mrf.mxu3  ;;  %v5437_v37 = vpop.f32.mrf.mxu0 }
 0x335   : > { %v1757_v26 = vadd.f32 %v1756_v15, %v5307_v20 }
 0x337   : > { %2332 = vmatmul.f32.gmra.mxu2 %v5026_v52  ;;  %v5444_v24 = vadd.f32 %v5292_v57, %v1757_v26  ;;  %2639 = vmatmul.f32.gmra.mxu0 %v3748_v6  ;;  %v5460_v26 = vpop.f32.mrf.mxu1  ;;  %v2953_v6 = vld [vmem:[#allocation8 + $0x440] sm:$0xff] }
 0x338   : > { %7248 = vst [vmem:[#allocation111_spill] sm:$0xff] %v5460_v26  ;;  %2968 = vmatpush.msra.mxu2 %v2953_v6  ;;  %v5475_v26 = vld [vmem:[#allocation2 + $0x150] sm:$0xff] }
 0x339   : > { %1806 = vmatmul.f32.gmra.mxu3 %v5447_v5  ;;  %7249 = vst [vmem:[#allocation112_spill] sm:$0xff] %v5475_v26 }
 0x33a   : > { %v5450_v4 = vpop.f32.mrf.mxu2 }
 0x33b   : > { %2820 = vmatmul.f32.gmra.mxu1 %v4976_v29 }
 0x33c   : > { %v1759_v20 = vpop.f32.mrf.mxu3  ;;  %v5452_v15 = vpop.f32.mrf.mxu0 }
 0x33d   : > { %v1760_v36 = vadd.f32 %v1759_v20, %v5324_v51 }
 0x33f   : > { %2335 = vmatmul.f32.gmra.mxu2 %v5046_v49  ;;  %v5457_v57 = vadd.f32 %v5311_v45, %v1760_v36  ;;  %2642 = vmatmul.f32.gmra.mxu0 %v3750_v46  ;;  %v3752_v36 = vld [vmem:[#allocation2 + $0x50] sm:$0xff]  ;;  %v2449_v46 = vld [vmem:[#allocation8 + $0x2b8] sm:$0xff]  ;;  %v5480_v12 = vpop.f32.mrf.mxu1 }
 0x340   : > { %7250 = vst [vmem:[#allocation113_spill] sm:$0xff] %v5480_v12  ;;  %2466 = vmatpush.msra.mxu3 %v2449_v46 }
 0x341   : > { %1809 = vmatmul.f32.gmra.mxu3 %v5462_v30 }
 0x342   : > { %v5465_v14 = vpop.f32.mrf.mxu2 }
 0x343   : > { %2823 = vmatmul.f32.gmra.mxu1 %v4992_v54 }
 0x344   : > { %v1762_v51 = vpop.f32.mrf.mxu3  ;;  %v5467_v20 = vpop.f32.mrf.mxu0 }
 0x345   : > { %v1763_v45 = vadd.f32 %v1762_v51, %v5342_v19 }
 0x347   : > { %2338 = vmatmul.f32.gmra.mxu2 %v5060_v0  ;;  %v5472_v29 = vadd.f32 %v5329_v23, %v1763_v45  ;;  %2645 = vmatmul.f32.gmra.mxu0 %v3752_v36  ;;  %v3754_v23 = vld [vmem:[#allocation2 + $0x60] sm:$0xff]  ;;  %v2952_v45 = vld [vmem:[#allocation8 + $0x438] sm:$0xff]  ;;  %v5490_v36 = vld [vmem:[#allocation2 + $0x158] sm:$0xff] }
 0x348   : > { %7251 = vst [vmem:[#allocation114_spill] sm:$0xff] %v5490_v36  ;;  %2969 = vmatpush.msra.mxu2 %v2952_v45  ;;  %v3756_v45 = vld [vmem:[#allocation2 + $0x68] sm:$0xff] }
 0x349   : > { %1812 = vmatmul.f32.gmra.mxu3 %v5475_v26  ;;  %v2446_v26 = vld [vmem:[#allocation8 + $0x2a0] sm:$0xff] }
 0x34a   : > { %v5478_v6 = vpop.f32.mrf.mxu2 }
 0x34b   : > { %2826 = vmatmul.f32.gmra.mxu1 %v5012_v61 }
 0x34c   : > { %v1765_v19 = vpop.f32.mrf.mxu3  ;;  %v5483_v43 = vpop.f32.mrf.mxu0 }
 0x34d   : > { %v1766_v51 = vadd.f32 %v1765_v19, %v5363_v63  ;;  %v2448_v63 = vld [vmem:[#allocation8 + $0x2b0] sm:$0xff]  ;;  %v5495_v19 = vpop.f32.mrf.mxu1 }
 0x34e   : > { %7252 = vst [vmem:[#allocation115_spill] sm:$0xff] %v5495_v19  ;;  %2467 = vmatpush.msra.mxu3 %v2448_v63  ;;  %v2445_v19 = vld [vmem:[#allocation8 + $0x298] sm:$0xff] }
 0x34f   : > { %2341 = vmatmul.f32.gmra.mxu2 %v5080_v18  ;;  %v5487_v54 = vadd.f32 %v5346_v7, %v1766_v51  ;;  %2648 = vmatmul.f32.gmra.mxu0 %v3754_v23  ;;  %v2447_v51 = vld [vmem:[#allocation8 + $0x2a8] sm:$0xff] }
 0x350   : > { %2468 = vmatpush.msra.mxu3 %v2447_v51 }
 0x351   : > { %1815 = vmatmul.f32.gmra.mxu3 %v5490_v36  ;;  %v5505_v36 = vld [vmem:[#allocation2 + $0x168] sm:$0xff] }
 0x352   : > { %v5493_v46 = vpop.f32.mrf.mxu2  ;;  %2469 = vmatpush.msra.mxu3 %v2446_v26  ;;  %7253 = vst [vmem:[#allocation116_spill] sm:$0xff] %v5505_v36 }
 0x353   : > { %2829 = vmatmul.f32.gmra.mxu1 %v5026_v52  ;;  %v2442_v52 = vld [vmem:[#allocation8 + $0x280] sm:$0xff] }
 0x354   : > { %v1768_v12 = vpop.f32.mrf.mxu3  ;;  %v5503_v23 = vpop.f32.mrf.mxu0  ;;  %2470 = vmatpush.msra.mxu3 %v2445_v19  ;;  %v2951_v19 = vld [vmem:[#allocation8 + $0x430] sm:$0xff] }
 0x355   : > { %v1769_v7 = vadd.f32 %v1768_v12, %v5383_v10  ;;  %v2444_v12 = vld [vmem:[#allocation8 + $0x290] sm:$0xff]  ;;  %v5511_v51 = vpop.f32.mrf.mxu1  ;;  %2970 = vmatpush.msra.mxu2 %v2951_v19 }
 0x356   : > { %2471 = vmatpush.msra.mxu3 %v2444_v12  ;;  %7254 = vst [vmem:[#allocation117_spill] sm:$0xff] %v5511_v51 }
 0x357   : > { %2344 = vmatmul.f32.gmra.mxu2 %v5096_v32  ;;  %v5500_v61 = vadd.f32 %v5368_v35, %v1769_v7  ;;  %2651 = vmatmul.f32.gmra.mxu0 %v3756_v45  ;;  %v2443_v7 = vld [vmem:[#allocation8 + $0x288] sm:$0xff] }
 0x358   : > { %2472 = vmatpush.msra.mxu3 %v2443_v7  ;;  %v3758_v45 = vld [vmem:[#allocation2 + $0x78] sm:$0xff] }
 0x359   : > { %1818 = vmatmul.f32.gmra.mxu3 %v5505_v36  ;;  %v5518_v36 = vld [vmem:[#allocation2 + $0x170] sm:$0xff] }
 0x35a   : > { %v5508_v10 = vpop.f32.mrf.mxu2  ;;  %2473 = vmatpush.msra.mxu3 %v2442_v52  ;;  %7255 = vst [vmem:[#allocation118_spill] sm:$0xff] %v5518_v36 }
 0x35b   : > { %2832 = vmatmul.f32.gmra.mxu1 %v5046_v49 }
 0x35c   : > { %v1771_v63 = vpop.f32.mrf.mxu3 }
 0x35d   : > { %v1772_v35 = vadd.f32 %v1771_v63, %v5400_v3  ;;  %v5521_v3 = vpop.f32.mrf.mxu0 }
 0x35f   : > { %2347 = vmatmul.f32.gmra.mxu2 %v5118_v11  ;;  %v5515_v26 = vadd.f32 %v5387_v55, %v1772_v35  ;;  %2654 = vmatmul.f32.gmra.mxu0 %v3758_v45  ;;  %v3760_v55 = vld [vmem:[#allocation2 + $0x80] sm:$0xff]  ;;  %v5531_v35 = vpop.f32.mrf.mxu1 }
 0x360   : > { %7256 = vst [vmem:[#allocation119_spill] sm:$0xff] %v5531_v35  ;;  %v7260_v35 = vld [vmem:[#allocation38_spill] sm:$0xff] }
 0x361   : > { %1821 = vmatmul.f32.gmra.mxu3 %v5518_v36 }
 0x362   : > { %v5523_v12 = vpop.f32.mrf.mxu2 }
 0x363   : > { %2835 = vmatmul.f32.gmra.mxu1 %v5060_v0  ;;  %v3761_v0 = vld [vmem:[#allocation2 + $0x90] sm:$0xff] }
 0x364   : > { %v1774_v63 = vpop.f32.mrf.mxu3 }
 0x365   : > { %v1775_v7 = vadd.f32 %v1774_v63, %v5420_v8  ;;  %v5536_v45 = vpop.f32.mrf.mxu0  ;;  %v7257_v63 = vld [vmem:[#allocation81_spill] sm:$0xff] }
 0x367   : > { %2350 = vmatmul.f32.gmra.mxu2 %v5138_v33  ;;  %v5528_v49 = vadd.f32 %v5405_v1, %v1775_v7  ;;  %2657 = vmatmul.f32.gmra.mxu0 %v3760_v55  ;;  %v2950_v7 = vld [vmem:[#allocation8 + $0x428] sm:$0xff]  ;;  %v7259_v55 = vld [vmem:[#allocation68_spill] sm:$0xff]  ;;  %v5547_v51 = vpop.f32.mrf.mxu1 }
 0x368   : > { %2971 = vmatpush.msra.mxu2 %v2950_v7  ;;  %7261 = vst [vmem:[#allocation68_spill] sm:$0xff] %v5547_v51 }
 0x369   : > { %2474 = vmatmul.f32.vlgmr.msra.gmra.mxu3 %v4846_v39  ;;  %v2230_v39 = vadd.f32 %v7259_v55, %v5283_v2  ;;  %v3762_v2 = vld [vmem:[#allocation2 + $0x98] sm:$0xff]  ;;  %v7264_v55 = vld [vmem:[#allocation41_spill] sm:$0xff] }
 0x36a   : > { %v5534_v52 = vpop.f32.mrf.mxu2 }
 0x36b   : > { %2838 = vmatmul.f32.gmra.mxu1 %v5080_v18  ;;  %v7262_v18 = vld [vmem:[#allocation85_spill] sm:$0xff] }
 0x36c   : > { %v1777_v19 = vpop.f32.mrf.mxu3 }
 0x36d   : > { %v1778_v8 = vadd.f32 %v1777_v19, %v5435_v38 }
 0x36f   : > { %2353 = vmatmul.f32.gmra.mxu2 %v7257_v63  ;;  %v5541_v1 = vadd.f32 %v5424_v48, %v1778_v8  ;;  %2660 = vmatmul.f32.gmra.mxu0 %v3761_v0  ;;  %v5552_v8 = vpop.f32.mrf.mxu0 }
 0x371   : > { %7258 = vst [vmem:[#allocation81_spill] sm:$0xff] %v5541_v1  ;;  %2477 = vmatmul.f32.gmra.mxu3 %v7260_v35  ;;  %v7263_v35 = vld [vmem:[#allocation70_spill] sm:$0xff]  ;;  %v7266_v1 = vld [vmem:[#allocation89_spill] sm:$0xff] }
 0x372   : > { %v2306_v36 = vpop.f32.mrf.mxu2  ;;  %v2231_v7 = vadd.f32 %v7263_v35, %v5301_v56  ;;  %v3763_v56 = vld [vmem:[#allocation2 + $0xa8] sm:$0xff] }
 0x373   : > { %v5549_v38 = vadd.f32 %v2306_v36, %v2230_v39  ;;  %2841 = vmatmul.f32.gmra.mxu1 %v5096_v32 }
 0x374   : > { %v1780_v19 = vpop.f32.mrf.mxu3 }
 0x375   : > { %v1781_v48 = vadd.f32 %v1780_v19, %v5450_v4  ;;  %v5564_v4 = vpop.f32.mrf.mxu1 }
 0x376   : > { %7265 = vst [vmem:[#allocation38_spill] sm:$0xff] %v5564_v4 }
 0x377   : > { %2356 = vmatmul.f32.gmra.mxu2 %v7262_v18  ;;  %v5556_v0 = vadd.f32 %v5437_v37, %v1781_v48  ;;  %2663 = vmatmul.f32.gmra.mxu0 %v3762_v2  ;;  %v5572_v32 = vpop.f32.mrf.mxu0  ;;  %v2949_v48 = vld [vmem:[#allocation8 + $0x420] sm:$0xff] }
 0x378   : > { %v7268_v2 = vld [vmem:[#allocation73_spill] sm:$0xff]  ;;  %2972 = vmatpush.msra.mxu2 %v2949_v48 }
 0x379   : > { %2480 = vmatmul.f32.gmra.mxu3 %v7264_v55  ;;  %v2232_v35 = vadd.f32 %v7268_v2, %v5320_v34  ;;  %v7272_v34 = vld [vmem:[#allocation76_spill] sm:$0xff]  ;;  %v7273_v2 = vld [vmem:[#allocation47_spill] sm:$0xff] }
 0x37a   : > { %v2309_v36 = vpop.f32.mrf.mxu2  ;;  %v2233_v48 = vadd.f32 %v7272_v34, %v5338_v17  ;;  %v3765_v17 = vld [vmem:[#allocation2 + $0xc0] sm:$0xff] }
 0x37b   : > { %v5562_v39 = vadd.f32 %v2309_v36, %v2231_v7  ;;  %2844 = vmatmul.f32.gmra.mxu1 %v5118_v11  ;;  %v7269_v7 = vld [vmem:[#allocation44_spill] sm:$0xff]  ;;  %v7271_v11 = vld [vmem:[#allocation93_spill] sm:$0xff] }
 0x37c   : > { %v1783_v19 = vpop.f32.mrf.mxu3 }
 0x37d   : > { %v1784_v51 = vadd.f32 %v1783_v19, %v5465_v14 }
 0x37f   : > { %2359 = vmatmul.f32.gmra.mxu2 %v7266_v1  ;;  %v5569_v37 = vadd.f32 %v5452_v15, %v1784_v51  ;;  %2666 = vmatmul.f32.gmra.mxu0 %v3763_v56  ;;  %v5580_v51 = vpop.f32.mrf.mxu1  ;;  %v3764_v56 = vld [vmem:[#allocation2 + $0xb0] sm:$0xff] }
 0x380   : > { %7270 = vst [vmem:[#allocation70_spill] sm:$0xff] %v5580_v51 }
 0x381   : > { %7267 = vst [vmem:[#allocation85_spill] sm:$0xff] %v5569_v37  ;;  %2483 = vmatmul.f32.gmra.mxu3 %v7269_v7  ;;  %v7274_v37 = vld [vmem:[#allocation97_spill] sm:$0xff] }
 0x382   : > { %v2312_v36 = vpop.f32.mrf.mxu2 }
 0x383   : > { %v5577_v14 = vadd.f32 %v2312_v36, %v2232_v35  ;;  %2847 = vmatmul.f32.gmra.mxu1 %v5138_v33  ;;  %v5590_v35 = vpop.f32.mrf.mxu0 }
 0x384   : > { %v1786_v19 = vpop.f32.mrf.mxu3 }
 0x385   : > { %v1787_v15 = vadd.f32 %v1786_v19, %v5478_v6 }
 0x387   : > { %2362 = vmatmul.f32.gmra.mxu2 %v7271_v11  ;;  %v5584_v4 = vadd.f32 %v5467_v20, %v1787_v15  ;;  %2669 = vmatmul.f32.gmra.mxu0 %v3764_v56  ;;  %v5600_v33 = vpop.f32.mrf.mxu1  ;;  %v2948_v15 = vld [vmem:[#allocation8 + $0x418] sm:$0xff]  ;;  %v7277_v56 = vld [vmem:[#allocation79_spill] sm:$0xff] }
 0x388   : > { %7276 = vst [vmem:[#allocation89_spill] sm:$0xff] %v5600_v33  ;;  %v2234_v34 = vadd.f32 %v7277_v56, %v5359_v60  ;;  %2973 = vmatpush.msra.mxu2 %v2948_v15  ;;  %v7279_v60 = vld [vmem:[#allocation83_spill] sm:$0xff]  ;;  %v7280_v56 = vld [vmem:[#allocation53_spill] sm:$0xff] }
 0x389   : > { %2486 = vmatmul.f32.gmra.mxu3 %v7273_v2  ;;  %v2235_v15 = vadd.f32 %v7279_v60, %v5377_v25  ;;  %v3767_v25 = vld [vmem:[#allocation2 + $0xd8] sm:$0xff] }
 0x38a   : > { %v2315_v36 = vpop.f32.mrf.mxu2 }
 0x38b   : > { %v5592_v6 = vadd.f32 %v2315_v36, %v2233_v48  ;;  %2850 = vmatmul.f32.gmra.mxu1 %v7257_v63  ;;  %v7278_v48 = vld [vmem:[#allocation51_spill] sm:$0xff] }
 0x38c   : > { %v1789_v19 = vpop.f32.mrf.mxu3 }
 0x38d   : > { %v1790_v51 = vadd.f32 %v1789_v19, %v5493_v46  ;;  %v5607_v19 = vpop.f32.mrf.mxu0 }
 0x38f   : > { %2365 = vmatmul.f32.gmra.mxu2 %v7274_v37  ;;  %v5597_v20 = vadd.f32 %v5483_v43, %v1790_v51  ;;  %2672 = vmatmul.f32.gmra.mxu0 %v3765_v17  ;;  %v3766_v17 = vld [vmem:[#allocation2 + $0xc8] sm:$0xff] }
 0x391   : > { %7275 = vst [vmem:[#allocation41_spill] sm:$0xff] %v5597_v20  ;;  %2489 = vmatmul.f32.gmra.mxu3 %v7278_v48 }
 0x392   : > { %v2318_v36 = vpop.f32.mrf.mxu2 }
 0x393   : > { %v5605_v46 = vadd.f32 %v2318_v36, %v2234_v34  ;;  %2853 = vmatmul.f32.gmra.mxu1 %v7262_v18  ;;  %v5618_v34 = vpop.f32.mrf.mxu1 }
 0x394   : > { %v1792_v43 = vpop.f32.mrf.mxu3  ;;  %7281 = vst [vmem:[#allocation73_spill] sm:$0xff] %v5618_v34 }
 0x395   : > { %v1793_v51 = vadd.f32 %v1792_v43, %v5508_v10  ;;  %v5623_v20 = vpop.f32.mrf.mxu0 }
 0x397   : > { %2368 = vmatmul.f32.gmra.mxu2 %v5262_v9  ;;  %v5612_v63 = vadd.f32 %v5503_v23, %v1793_v51  ;;  %2675 = vmatmul.f32.gmra.mxu0 %v3766_v17  ;;  %v7282_v23 = vld [vmem:[#allocation30_spill] sm:$0xff]  ;;  %v2947_v51 = vld [vmem:[#allocation8 + $0x410] sm:$0xff] }
 0x398   : > { %v7284_v17 = vld [vmem:[#allocation87_spill] sm:$0xff]  ;;  %2974 = vmatpush.msra.mxu2 %v2947_v51 }
 0x399   : > { %2492 = vmatmul.f32.gmra.mxu3 %v7280_v56  ;;  %v2236_v60 = vadd.f32 %v7284_v17, %v5395_v31  ;;  %v3768_v31 = vld [vmem:[#allocation2 + $0xe0] sm:$0xff] }
 0x39a   : > { %v2321_v36 = vpop.f32.mrf.mxu2  ;;  %v7289_v51 = vld [vmem:[#allocation91_spill] sm:$0xff] }
 0x39b   : > { %v5620_v33 = vadd.f32 %v2321_v36, %v2235_v15  ;;  %2856 = vmatmul.f32.gmra.mxu1 %v7266_v1  ;;  %v7285_v15 = vld [vmem:[#allocation56_spill] sm:$0xff]  ;;  %v2237_v17 = vadd.f32 %v7289_v51, %v5413_v62  ;;  %v2946_v62 = vld [vmem:[#allocation8 + $0x408] sm:$0xff]  ;;  %v7296_v51 = vld [vmem:[#allocation61_spill] sm:$0xff] }
 0x39c   : > { %v1795_v10 = vpop.f32.mrf.mxu3  ;;  %2975 = vmatpush.msra.mxu2 %v2946_v62  ;;  %v2239_v62 = vadd.f32 %v5259_v44, %v5444_v24  ;;  %v2945_v44 = vld [vmem:[#allocation8 + $0x400] sm:$0xff]  ;;  %v2240_v24 = vadd.f32 %v5285_v40, %v5457_v57  ;;  %v2241_v40 = vadd.f32 %v5305_v50, %v5472_v29  ;;  %v2242_v50 = vadd.f32 %v5327_v41, %v5487_v54  ;;  %v7312_v29 = vld [vmem:[#allocation72_spill] sm:$0xff] }
 0x39d   : > { %v1796_v43 = vadd.f32 %v1795_v10, %v5523_v12  ;;  %v5635_v10 = vpop.f32.mrf.mxu1  ;;  %v7308_v57 = vld [vmem:[#allocation69_spill] sm:$0xff]  ;;  %v2243_v41 = vadd.f32 %v5352_v13, %v5500_v61 }
 0x39e   : > { %7287 = vst [vmem:[#allocation76_spill] sm:$0xff] %v5635_v10  ;;  %2976 = vmatpush.msra.mxu2 %v2945_v44 }
 0x39f   : > { %2371 = vmatmul.f32.gmra.mxu2 %v7282_v23  ;;  %v5627_v18 = vadd.f32 %v5521_v3, %v1796_v43  ;;  %2678 = vmatmul.f32.gmra.mxu0 %v3767_v25  ;;  %v7288_v43 = vld [vmem:[#allocation33_spill] sm:$0xff]  ;;  %v5643_v25 = vpop.f32.mrf.mxu0 }
 0x3a1   : > { %7283 = vst [vmem:[#allocation44_spill] sm:$0xff] %v5627_v18  ;;  %2495 = vmatmul.f32.gmra.mxu3 %v7285_v15 }
 0x3a2   : > { %v2324_v36 = vpop.f32.mrf.mxu2 }
 0x3a3   : > { %v5633_v12 = vadd.f32 %v2324_v36, %v2236_v60  ;;  %2859 = vmatmul.f32.gmra.mxu1 %v7271_v11  ;;  %v7290_v60 = vld [vmem:[#allocation59_spill] sm:$0xff] }
 0x3a4   : > { %v1798_v34 = vpop.f32.mrf.mxu3 }
 0x3a5   : > { %7286 = vst [vmem:[#allocation93_spill] sm:$0xff] %v5633_v12  ;;  %v1799_v3 = vadd.f32 %v1798_v34, %v5534_v52  ;;  %v7291_v34 = vld [vmem:[#allocation74_spill] sm:$0xff]  ;;  %v5651_v12 = vpop.f32.mrf.mxu1 }
 0x3a6   : > { %7292 = vst [vmem:[#allocation47_spill] sm:$0xff] %v5651_v12  ;;  %v7297_v12 = vld [vmem:[#allocation77_spill] sm:$0xff] }
 0x3a7   : > { %2374 = vmatmul.f32.gmra.mxu2 %v7288_v43  ;;  %v5640_v1 = vadd.f32 %v5536_v45, %v1799_v3  ;;  %2681 = vmatmul.f32.gmra.mxu0 %v3768_v31  ;;  %v7293_v45 = vld [vmem:[#allocation35_spill] sm:$0xff] }
 0x3a8   : > { %v7295_v3 = vld [vmem:[#allocation95_spill] sm:$0xff] }
 0x3a9   : > { %2498 = vmatmul.f32.gmra.mxu3 %v7290_v60  ;;  %v2238_v31 = vadd.f32 %v7295_v3, %v5429_v16  ;;  %v3769_v16 = vld [vmem:[#allocation2 + $0xf8] sm:$0xff]  ;;  %v7300_v3 = vld [vmem:[#allocation64_spill] sm:$0xff] }
 0x3aa   : > { %v2327_v36 = vpop.f32.mrf.mxu2 }
 0x3ab   : > { %v5648_v10 = vadd.f32 %v2327_v36, %v2237_v17  ;;  %2862 = vmatmul.f32.gmra.mxu1 %v7274_v37  ;;  %v5662_v17 = vpop.f32.mrf.mxu0 }
 0x3ac   : > { %v1801_v52 = vpop.f32.mrf.mxu3 }
 0x3ad   : > { %v1802_v18 = vadd.f32 %v1801_v52, %v7291_v34 }
 0x3af   : > { %2377 = vmatmul.f32.gmra.mxu2 %v7293_v45  ;;  %v5655_v11 = vadd.f32 %v5552_v8, %v1802_v18  ;;  %2684 = vmatmul.f32.gmra.mxu0 %v5114_v28  ;;  %v7298_v18 = vld [vmem:[#allocation36_spill] sm:$0xff]  ;;  %v5672_v28 = vpop.f32.mrf.mxu1 }
 0x3b0   : > { %7299 = vst [vmem:[#allocation79_spill] sm:$0xff] %v5672_v28  ;;  %v7306_v28 = vld [vmem:[#allocation84_spill] sm:$0xff] }
 0x3b1   : > { %7294 = vst [vmem:[#allocation97_spill] sm:$0xff] %v5655_v11  ;;  %2501 = vmatmul.f32.gmra.mxu3 %v7296_v51  ;;  %v7301_v11 = vld [vmem:[#allocation80_spill] sm:$0xff] }
 0x3b2   : > { %v2330_v36 = vpop.f32.mrf.mxu2 }
 0x3b3   : > { %v5664_v52 = vadd.f32 %v2330_v36, %v2238_v31  ;;  %2865 = vmatmul.f32.gmra.mxu1 %v5262_v9 }
 0x3b4   : > { %v1804_v34 = vpop.f32.mrf.mxu3 }
 0x3b5   : > { %v1805_v8 = vadd.f32 %v1804_v34, %v7297_v12  ;;  %v5679_v12 = vpop.f32.mrf.mxu0 }
 0x3b7   : > { %2380 = vmatmul.f32.gmra.mxu2 %v7298_v18  ;;  %v5669_v37 = vadd.f32 %v5572_v32, %v1805_v8  ;;  %2687 = vmatmul.f32.gmra.mxu0 %v3769_v16  ;;  %v7302_v8 = vld [vmem:[#allocation39_spill] sm:$0xff]  ;;  %v7304_v16 = vld [vmem:[#allocation66_spill] sm:$0xff] }
 0x3b9   : > { %2504 = vmatmul.f32.gmra.mxu3 %v7300_v3 }
 0x3ba   : > { %v2333_v31 = vpop.f32.mrf.mxu2 }
 0x3bb   : > { %v5677_v36 = vadd.f32 %v2333_v31, %v2239_v62  ;;  %2868 = vmatmul.f32.gmra.mxu1 %v7282_v23  ;;  %v5691_v62 = vpop.f32.mrf.mxu1  ;;  %v7307_v23 = vld [vmem:[#allocation42_spill] sm:$0xff] }
 0x3bc   : > { %v1807_v34 = vpop.f32.mrf.mxu3  ;;  %7305 = vst [vmem:[#allocation83_spill] sm:$0xff] %v5691_v62 }
 0x3bd   : > { %v1808_v32 = vadd.f32 %v1807_v34, %v7301_v11 }
 0x3bf   : > { %2383 = vmatmul.f32.gmra.mxu2 %v7302_v8  ;;  %v5684_v9 = vadd.f32 %v5590_v35, %v1808_v32  ;;  %2690 = vmatmul.f32.gmra.mxu0 %v5154_v42  ;;  %v5696_v32 = vpop.f32.mrf.mxu0 }
 0x3c1   : > { %7303 = vst [vmem:[#allocation51_spill] sm:$0xff] %v5684_v9  ;;  %2507 = vmatmul.f32.gmra.mxu3 %v7304_v16  ;;  %v7311_v9 = vld [vmem:[#allocation45_spill] sm:$0xff] }
 0x3c2   : > { %v2336_v31 = vpop.f32.mrf.mxu2 }
 0x3c3   : > { %v5693_v11 = vadd.f32 %v2336_v31, %v2240_v24  ;;  %2871 = vmatmul.f32.gmra.mxu1 %v7288_v43 }
 0x3c4   : > { %v1810_v34 = vpop.f32.mrf.mxu3 }
 0x3c5   : > { %v1811_v35 = vadd.f32 %v1810_v34, %v7306_v28  ;;  %v5709_v28 = vpop.f32.mrf.mxu1  ;;  %v7310_v34 = vld [vmem:[#allocation88_spill] sm:$0xff] }
 0x3c6   : > { %7309 = vst [vmem:[#allocation53_spill] sm:$0xff] %v5709_v28 }
 0x3c7   : > { %2386 = vmatmul.f32.gmra.mxu2 %v7307_v23  ;;  %v5700_v42 = vadd.f32 %v5607_v19, %v1811_v35  ;;  %2693 = vmatmul.f32.gmra.mxu0 %v5174_v47  ;;  %v2640_v47 = vpop.f32.mrf.mxu0 }
 0x3c9   : > { %2510 = vmatmul.f32.gmra.mxu3 %v7308_v57 }
 0x3ca   : > { %v2339_v44 = vpop.f32.mrf.mxu2 }
 0x3cb   : > { %v5707_v24 = vadd.f32 %v2339_v44, %v2241_v40  ;;  %2874 = vmatmul.f32.gmra.mxu1 %v7293_v45  ;;  %v7313_v44 = vld [vmem:[#allocation92_spill] sm:$0xff] }
 0x3cc   : > { %v1813_v31 = vpop.f32.mrf.mxu3 }
 0x3cd   : > { %v1814_v62 = vadd.f32 %v1813_v31, %v7310_v34  ;;  %v5724_v34 = vpop.f32.mrf.mxu1 }
 0x3ce   : > { %7314 = vst [vmem:[#allocation30_spill] sm:$0xff] %v5724_v34 }
 0x3cf   : > { %2389 = vmatmul.f32.gmra.mxu2 %v7311_v9  ;;  %v5714_v19 = vadd.f32 %v5623_v20, %v1814_v62  ;;  %2696 = vmatmul.f32.gmra.mxu0 %v5417_v58  ;;  %v7315_v20 = vld [vmem:[#allocation49_spill] sm:$0xff]  ;;  %v7316_v58 = vld [vmem:[#allocation75_spill] sm:$0xff]  ;;  %v2643_v54 = vpop.f32.mrf.mxu0 }
 0x3d1   : > { %2513 = vmatmul.f32.gmra.mxu3 %v7312_v29 }
 0x3d2   : > { %v2342_v43 = vpop.f32.mrf.mxu2 }
 0x3d3   : > { %v5721_v35 = vadd.f32 %v2342_v43, %v2242_v50  ;;  %2877 = vmatmul.f32.gmra.mxu1 %v7298_v18  ;;  %v2265_v50 = vrot.slane %v5348_v27, 1  ;;  %v2266_v43 = vrot.slane %v5366_v22, 1 }
 0x3d4   : > { %v1816_v40 = vpop.f32.mrf.mxu3 }
 0x3d5   : > { %v1817_v31 = vadd.f32 %v1816_v40, %v7313_v44  ;;  %v2267_v18 = vsel %vm1469_vm4, %v2265_v50, %v2266_v43  ;;  %v5747_v61 = vpop.f32.mrf.mxu1 }
 0x3d6   : > { %7318 = vst [vmem:[#allocation87_spill] sm:$0xff] %v5747_v61 }
 0x3d7   : > { %2392 = vmatmul.f32.gmra.mxu2 %v7315_v20  ;;  %v5728_v45 = vadd.f32 %v5643_v25, %v1817_v31  ;;  %2699 = vmatmul.f32.gmra.mxu0 %v5432_v21  ;;  %v7317_v25 = vld [vmem:[#allocation96_spill] sm:$0xff]  ;;  %v5741_v21 = vld [vmem:[#allocation2 + $0x190] sm:$0x3]  ;;  %v2646_v34 = vpop.f32.mrf.mxu0 }
 0x3d8   : > { %v2268_v50 = vrot.slane %v5741_v21, 1 }
 0x3d9   : > { %2516 = vmatmul.f32.gmra.mxu3 %v7316_v58 }
 0x3da   : > { %v2345_v62 = vpop.f32.mrf.mxu2 }
 0x3db   : > { %v5737_v40 = vadd.f32 %v2345_v62, %v2243_v41  ;;  %2880 = vmatmul.f32.gmra.mxu1 %v7302_v8  ;;  %v2244_v41 = vadd.f32 %v5380_v53, %v5515_v26  ;;  %v7319_v62 = vld [vmem:[#allocation78_spill] sm:$0xff]  ;;  %v2269_v8 = vsel %vm1469_vm4, %v2266_v43, %v2268_v50  ;;  %v2245_v53 = vadd.f32 %v5402_v59, %v5528_v49  ;;  %v7323_v59 = vld [vmem:[#allocation81_spill] sm:$0xff] }
 0x3dc   : > { %v1819_v44 = vpop.f32.mrf.mxu3  ;;  %v7324_v49 = vld [vmem:[#allocation109_spill] sm:$0xff] }
 0x3dd   : > { %v1820_v31 = vadd.f32 %v1819_v44, %v7317_v25  ;;  %v5766_v26 = vpop.f32.mrf.mxu1 }
 0x3df   : > { %2395 = vmatmul.f32.gmra.mxu2 %v2267_v18  ;;  %v5744_v13 = vadd.f32 %v5662_v17, %v1820_v31  ;;  %2702 = vmatmul.f32.gmra.mxu0 %v5447_v5  ;;  %v7320_v17 = vld [vmem:[#allocation99_spill] sm:$0xff]  ;;  %v7321_v5 = vld [vmem:[#allocation82_spill] sm:$0xff]  ;;  %v2649_v50 = vpop.f32.mrf.mxu0 }
 0x3e1   : > { %2519 = vmatmul.f32.gmra.mxu3 %v7319_v62 }
 0x3e2   : > { %v2348_v44 = vpop.f32.mrf.mxu2 }
 0x3e3   : > { %v5754_v25 = vadd.f32 %v2348_v44, %v2244_v41  ;;  %2883 = vmatmul.f32.gmra.mxu1 %v7307_v23  ;;  %v2246_v23 = vadd.f32 %v7324_v49, %v7323_v59  ;;  %v7328_v59 = vld [vmem:[#allocation90_spill] sm:$0xff] }
 0x3e4   : > { %v1822_v28 = vpop.f32.mrf.mxu3 }
 0x3e5   : > { %v1823_v31 = vadd.f32 %v1822_v28, %v7320_v17  ;;  %v7325_v17 = vld [vmem:[#allocation86_spill] sm:$0xff] }
 0x3e7   : > { %2398 = vmatmul.f32.gmra.mxu2 %v2269_v8  ;;  %v5759_v61 = vadd.f32 %v5679_v12, %v1823_v31  ;;  %2705 = vmatmul.f32.gmra.mxu0 %v5462_v30  ;;  %v7322_v30 = vld [vmem:[#allocation112_spill] sm:$0xff] }
 0x3e9   : > { %2522 = vmatmul.f32.gmra.mxu3 %v7321_v5 }
 0x3ea   : > { %v2351_v41 = vpop.f32.mrf.mxu2 }
 0x3eb   : > { %v5768_v44 = vadd.f32 %v2351_v41, %v2245_v53  ;;  %2886 = vmatmul.f32.gmra.mxu1 %v7311_v9  ;;  %v5782_v41 = vpop.f32.mrf.mxu1  ;;  %v2652_v9 = vpop.f32.mrf.mxu0 }
 0x3ec   : > { %v2475_v28 = vpop.f32.mrf.mxu3 }
 0x3ed   : > { %v2571_v43 = vadd.f32 %v2475_v28, %v5549_v38  ;;  %v7326_v28 = vld [vmem:[#allocation114_spill] sm:$0xff] }
 0x3ef   : > { %2977 = vmatmul.f32.vlgmr.msra.gmra.mxu2 %v7264_v55  ;;  %v5773_v12 = vadd.f32 %v5696_v32, %v2571_v43  ;;  %2708 = vmatmul.f32.gmra.mxu0 %v7322_v30  ;;  %v7327_v43 = vld [vmem:[#allocation110_spill] sm:$0xff] }
 0x3f0   : > { %v2247_v30 = vadd.f32 %v7327_v43, %v5556_v0 }
 0x3f1   : > { %2525 = vmatmul.f32.gmra.mxu3 %v7325_v17 }
 0x3f2   : > { %v2354_v31 = vpop.f32.mrf.mxu2 }
 0x3f3   : > { %v5780_v53 = vadd.f32 %v2354_v31, %v2246_v23  ;;  %2889 = vmatmul.f32.gmra.mxu1 %v7315_v20  ;;  %v7330_v20 = vld [vmem:[#allocation85_spill] sm:$0xff]  ;;  %v5805_v43 = vpop.f32.mrf.mxu0 }
 0x3f4   : > { %v2478_v38 = vpop.f32.mrf.mxu3 }
 0x3f5   : > { %v2572_v55 = vadd.f32 %v2478_v38, %v5562_v39  ;;  %v5796_v38 = vpop.f32.mrf.mxu1 }
 0x3f7   : > { %2980 = vmatmul.f32.gmra.mxu2 %v7269_v7  ;;  %v5786_v32 = vadd.f32 %v2640_v47, %v2572_v55  ;;  %2711 = vmatmul.f32.gmra.mxu0 %v7326_v28  ;;  %v7329_v47 = vld [vmem:[#allocation116_spill] sm:$0xff]  ;;  %v7331_v55 = vld [vmem:[#allocation111_spill] sm:$0xff]  ;;  %v7332_v28 = vld [vmem:[#allocation94_spill] sm:$0xff] }
 0x3f8   : > { %v2248_v0 = vadd.f32 %v7331_v55, %v7330_v20  ;;  %v7336_v20 = vld [vmem:[#allocation98_spill] sm:$0xff] }
 0x3f9   : > { %2528 = vmatmul.f32.gmra.mxu3 %v7328_v59 }
 0x3fa   : > { %v2357_v49 = vpop.f32.mrf.mxu2 }
 0x3fb   : > { %v5793_v23 = vadd.f32 %v2357_v49, %v2247_v30  ;;  %2892 = vmatmul.f32.gmra.mxu1 %v2267_v18  ;;  %v7334_v18 = vld [vmem:[#allocation118_spill] sm:$0xff] }
 0x3fc   : > { %v2481_v31 = vpop.f32.mrf.mxu3 }
 0x3fd   : > { %v2573_v39 = vadd.f32 %v2481_v31, %v5577_v14 }
 0x3ff   : > { %2983 = vmatmul.f32.gmra.mxu2 %v7273_v2  ;;  %v5799_v7 = vadd.f32 %v2643_v54, %v2573_v39  ;;  %2714 = vmatmul.f32.gmra.mxu0 %v7329_v47  ;;  %v5813_v54 = vpop.f32.mrf.mxu1  ;;  %v7335_v39 = vld [vmem:[#allocation113_spill] sm:$0xff] }
 0x400   : > { %7333 = vst [vmem:[#allocation56_spill] sm:$0xff] %v5813_v54  ;;  %v2249_v47 = vadd.f32 %v7335_v39, %v5584_v4  ;;  %v7340_v4 = vld [vmem:[#allocation100_spill] sm:$0xff] }
 0x401   : > { %2531 = vmatmul.f32.gmra.mxu3 %v7332_v28 }
 0x402   : > { %v2360_v30 = vpop.f32.mrf.mxu2 }
 0x403   : > { %v5807_v49 = vadd.f32 %v2360_v30, %v2248_v0  ;;  %2895 = vmatmul.f32.gmra.mxu1 %v2269_v8  ;;  %v5821_v30 = vpop.f32.mrf.mxu0  ;;  %v7338_v8 = vld [vmem:[#allocation41_spill] sm:$0xff] }
 0x404   : > { %v2484_v14 = vpop.f32.mrf.mxu3  ;;  %7337 = vst [vmem:[#allocation33_spill] sm:$0xff] %v5821_v30 }
 0x405   : > { %v2574_v31 = vadd.f32 %v2484_v14, %v5592_v6  ;;  %v7339_v14 = vld [vmem:[#allocation115_spill] sm:$0xff] }
 0x407   : > { %2986 = vmatmul.f32.gmra.mxu2 %v7278_v48  ;;  %v5811_v2 = vadd.f32 %v2646_v34, %v2574_v31  ;;  %2717 = vmatmul.f32.gmra.mxu0 %v7334_v18  ;;  %v2250_v31 = vadd.f32 %v7339_v14, %v7338_v8  ;;  %v5831_v18 = vpop.f32.mrf.mxu1 }
 0x408   : > { %7341 = vst [vmem:[#allocation91_spill] sm:$0xff] %v5831_v18  ;;  %v7349_v18 = vld [vmem:[#allocation102_spill] sm:$0xff] }
 0x409   : > { %2534 = vmatmul.f32.gmra.mxu3 %v7336_v20 }
 0x40a   : > { %v2363_v55 = vpop.f32.mrf.mxu2 }
 0x40b   : > { %v5819_v0 = vadd.f32 %v2363_v55, %v2249_v47 }
 0x40c   : > { %v2487_v6 = vpop.f32.mrf.mxu3 }
 0x40d   : > { %v2575_v48 = vadd.f32 %v2487_v6, %v5605_v46  ;;  %v2661_v46 = vpop.f32.mrf.mxu0  ;;  %v7343_v6 = vld [vmem:[#allocation101_spill] sm:$0xff] }
 0x40f   : > { %2989 = vmatmul.f32.gmra.mxu2 %v7280_v56  ;;  %v5825_v34 = vadd.f32 %v2649_v50, %v2575_v48  ;;  %2720 = vmatmul.f32.gmra.mxu0 %v5348_v27  ;;  %v7342_v27 = vld [vmem:[#allocation117_spill] sm:$0xff]  ;;  %v5845_v14 = vpop.f32.mrf.mxu1 }
 0x410   : > { %v2251_v50 = vadd.f32 %v7342_v27, %v5612_v63  ;;  %7345 = vst [vmem:[#allocation74_spill] sm:$0xff] %v5845_v14 }
 0x411   : > { %2537 = vmatmul.f32.gmra.mxu3 %v7340_v4 }
 0x412   : > { %v2366_v39 = vpop.f32.mrf.mxu2 }
 0x413   : > { %v5833_v47 = vadd.f32 %v2366_v39, %v2250_v31  ;;  %v7346_v39 = vld [vmem:[#allocation93_spill] sm:$0xff] }
 0x414   : > { %v2490_v55 = vpop.f32.mrf.mxu3 }
 0x415   : > { %v2576_v30 = vadd.f32 %v2490_v55, %v5620_v33 }
 0x417   : > { %2992 = vmatmul.f32.gmra.mxu2 %v7285_v15  ;;  %v5837_v56 = vadd.f32 %v2652_v9, %v2576_v30  ;;  %2723 = vmatmul.f32.gmra.mxu0 %v5366_v22  ;;  %v2664_v15 = vpop.f32.mrf.mxu0  ;;  %v7347_v9 = vld [vmem:[#allocation44_spill] sm:$0xff]  ;;  %v7348_v30 = vld [vmem:[#allocation119_spill] sm:$0xff] }
 0x418   : > { %v2252_v55 = vadd.f32 %v7348_v30, %v7347_v9 }
 0x419   : > { %2540 = vmatmul.f32.gmra.mxu3 %v7343_v6 }
 0x41a   : > { %v2369_v48 = vpop.f32.mrf.mxu2 }
 0x41b   : > { %v5843_v8 = vadd.f32 %v2369_v48, %v2251_v50  ;;  %v5859_v48 = vpop.f32.mrf.mxu1 }
 0x41c   : > { %v2493_v31 = vpop.f32.mrf.mxu3  ;;  %7352 = vst [vmem:[#allocation61_spill] sm:$0xff] %v5859_v48  ;;  %v7358_v48 = vld [vmem:[#allocation104_spill] sm:$0xff] }
 0x41d   : > { %7344 = vst [vmem:[#allocation59_spill] sm:$0xff] %v5843_v8  ;;  %v5848_v33 = vadd.f32 %v2493_v31, %v7346_v39  ;;  %v7353_v31 = vld [vmem:[#allocation68_spill] sm:$0xff]  ;;  %v7354_v39 = vld [vmem:[#allocation103_spill] sm:$0xff] }
 0x41f   : > { %2995 = vmatmul.f32.gmra.mxu2 %v7290_v60  ;;  %v2253_v60 = vadd.f32 %v7353_v31, %v5640_v1  ;;  %v2667_v8 = vpop.f32.mrf.mxu0 }
 0x421   : > { %2543 = vmatmul.f32.gmra.mxu3 %v7349_v18 }
 0x422   : > { %v2372_v63 = vpop.f32.mrf.mxu2 }
 0x423   : > { %v5854_v27 = vadd.f32 %v2372_v63, %v2252_v55  ;;  %v7356_v63 = vld [vmem:[#allocation97_spill] sm:$0xff] }
 0x424   : > { %v2496_v54 = vpop.f32.mrf.mxu3 }
 0x425   : > { %7350 = vst [vmem:[#allocation35_spill] sm:$0xff] %v5854_v27  ;;  %v5857_v50 = vadd.f32 %v2496_v54, %v5648_v10  ;;  %v5871_v54 = vpop.f32.mrf.mxu1 }
 0x427   : > { %7351 = vst [vmem:[#allocation95_spill] sm:$0xff] %v5857_v50  ;;  %2998 = vmatmul.f32.gmra.mxu2 %v7296_v51  ;;  %v7357_v51 = vld [vmem:[#allocation38_spill] sm:$0xff]  ;;  %v2670_v50 = vpop.f32.mrf.mxu0 }
 0x428   : > { %v2254_v27 = vadd.f32 %v7357_v51, %v7356_v63 }
 0x429   : > { %2546 = vmatmul.f32.gmra.mxu3 %v7354_v39 }
 0x42a   : > { %v2375_v9 = vpop.f32.mrf.mxu2 }
 0x42b   : > { %v5865_v30 = vadd.f32 %v2375_v9, %v2253_v60 }
 0x42c   : > { %v2499_v14 = vpop.f32.mrf.mxu3 }
 0x42d   : > { %7355 = vst [vmem:[#allocation77_spill] sm:$0xff] %v5865_v30  ;;  %v2579_v55 = vadd.f32 %v2499_v14, %v5664_v52  ;;  %v7361_v14 = vld [vmem:[#allocation105_spill] sm:$0xff] }
 0x42f   : > { %3001 = vmatmul.f32.gmra.mxu2 %v7300_v3  ;;  %v5869_v10 = vadd.f32 %v2661_v46, %v2579_v55  ;;  %v7360_v3 = vld [vmem:[#allocation70_spill] sm:$0xff]  ;;  %v5885_v55 = vpop.f32.mrf.mxu1 }
 0x430   : > { %v2255_v46 = vadd.f32 %v7360_v3, %v5669_v37 }
 0x431   : > { %2549 = vmatmul.f32.gmra.mxu3 %v7358_v48 }
 0x432   : > { %v2378_v1 = vpop.f32.mrf.mxu2 }
 0x433   : > { %v5876_v31 = vadd.f32 %v2378_v1, %v2254_v27 }
 0x434   : > { %v2502_v60 = vpop.f32.mrf.mxu3 }
 0x435   : > { %7359 = vst [vmem:[#allocation36_spill] sm:$0xff] %v5876_v31  ;;  %v2580_v9 = vadd.f32 %v2502_v60, %v5677_v36  ;;  %v2673_v31 = vpop.f32.mrf.mxu0 }
 0x437   : > { %3004 = vmatmul.f32.gmra.mxu2 %v7304_v16  ;;  %v5880_v52 = vadd.f32 %v2664_v15, %v2580_v9  ;;  %v7363_v16 = vld [vmem:[#allocation51_spill] sm:$0xff]  ;;  %v7364_v15 = vld [vmem:[#allocation89_spill] sm:$0xff]  ;;  %v7365_v9 = vld [vmem:[#allocation106_spill] sm:$0xff]  ;;  %v5898_v30 = vpop.f32.mrf.mxu1 }
 0x438   : > { %v2256_v60 = vadd.f32 %v7364_v15, %v7363_v16 }
 0x439   : > { %2552 = vmatmul.f32.gmra.mxu3 %v7361_v14 }
 0x43a   : > { %v2381_v63 = vpop.f32.mrf.mxu2 }
 0x43b   : > { %v5887_v51 = vadd.f32 %v2381_v63, %v2255_v46 }
 0x43c   : > { %v2505_v27 = vpop.f32.mrf.mxu3 }
 0x43d   : > { %7362 = vst [vmem:[#allocation64_spill] sm:$0xff] %v5887_v51  ;;  %v2581_v1 = vadd.f32 %v2505_v27, %v5693_v11  ;;  %v5922_v51 = vld [vmem:[#allocation2 + $0x198] sm:$0xff] }
 0x43e   : > { %2726 = vmatmul.f32.gmra.mxu0 %v5922_v51 }
 0x43f   : > { %3007 = vmatmul.f32.gmra.mxu2 %v7308_v57  ;;  %v5891_v36 = vadd.f32 %v2667_v8, %v2581_v1  ;;  %v2676_v57 = vpop.f32.mrf.mxu0  ;;  %v7367_v8 = vld [vmem:[#allocation73_spill] sm:$0xff]  ;;  %v7368_v1 = vld [vmem:[#allocation107_spill] sm:$0xff] }
 0x440   : > { %v2257_v27 = vadd.f32 %v7367_v8, %v5700_v42 }
 0x441   : > { %2555 = vmatmul.f32.gmra.mxu3 %v7365_v9 }
 0x442   : > { %v2384_v37 = vpop.f32.mrf.mxu2 }
 0x443   : > { %v5896_v3 = vadd.f32 %v2384_v37, %v2256_v60 }
 0x444   : > { %v2508_v46 = vpop.f32.mrf.mxu3 }
 0x445   : > { %7366 = vst [vmem:[#allocation80_spill] sm:$0xff] %v5896_v3  ;;  %v2582_v63 = vadd.f32 %v2508_v46, %v5707_v24  ;;  %v5910_v3 = vpop.f32.mrf.mxu1  ;;  %v7371_v46 = vld [vmem:[#allocation108_spill] sm:$0xff] }
 0x447   : > { %3010 = vmatmul.f32.gmra.mxu2 %v7312_v29  ;;  %v5902_v11 = vadd.f32 %v2670_v50, %v2582_v63  ;;  %v7370_v29 = vld [vmem:[#allocation76_spill] sm:$0xff]  ;;  %v2679_v42 = vpop.f32.mrf.mxu0 }
 0x448   : > { %v2258_v50 = vadd.f32 %v7370_v29, %v5714_v19 }
 0x449   : > { %2558 = vmatmul.f32.gmra.mxu3 %v7368_v1 }
 0x44a   : > { %v2387_v16 = vpop.f32.mrf.mxu2 }
 0x44b   : > { %v5907_v15 = vadd.f32 %v2387_v16, %v2257_v27  ;;  %v3770_v16 = vld [vmem:[#allocation2 + $0x180] sm:$0xff] }
 0x44c   : > { %v2511_v60 = vpop.f32.mrf.mxu3 }
 0x44d   : > { %7369 = vst [vmem:[#allocation39_spill] sm:$0xff] %v5907_v15  ;;  %v2583_v37 = vadd.f32 %v2511_v60, %v5721_v35  ;;  %v2434_v15 = vrot.slane %v3770_v16, 2  ;;  %v2435_v35 = vrot.slane %v5366_v22, 2  ;;  %v5932_v29 = vpop.f32.mrf.mxu1 }
 0x44f   : > { %3013 = vmatmul.f32.gmra.mxu2 %v7316_v58  ;;  %v5913_v24 = vadd.f32 %v2673_v31, %v2583_v37  ;;  %v2768_v58 = vrot.slane %v5922_v51, 1  ;;  %v5929_v31 = vld [vmem:[#allocation2 + $0x8] sm:$0xff]  ;;  %v5935_v22 = vsel %vm1825_vm5, %v2434_v15, %v2435_v35 }
 0x450   : > { %v2769_v37 = vrot.slane %v5929_v31, 1  ;;  %2729 = vmatmul.f32.gmra.mxu0 %v5929_v31 }
 0x451   : > { %2561 = vmatmul.f32.gmra.mxu3 %v7371_v46 }
 0x452   : > { %v2390_v63 = vpop.f32.mrf.mxu2 }
 0x453   : > { %v5918_v8 = vadd.f32 %v2390_v63, %v2258_v50  ;;  %v2770_v63 = vsel %vm1469_vm4, %v2768_v58, %v2769_v37 }
 0x454   : > { %v2514_v27 = vpop.f32.mrf.mxu3  ;;  %2898 = vmatmul.f32.gmra.mxu1 %v2770_v63 }
 0x455   : > { %7372 = vst [vmem:[#allocation66_spill] sm:$0xff] %v5918_v8  ;;  %v2584_v60 = vadd.f32 %v2514_v27, %v5737_v40  ;;  %v7373_v40 = vld [vmem:[#allocation47_spill] sm:$0xff] }
 0x456   : > { %v2259_v50 = vadd.f32 %v7373_v40, %v5728_v45  ;;  %v5949_v45 = vld [vmem:[#allocation2 + $0x1a8] sm:$0x3] }
 0x457   : > { %3016 = vmatmul.f32.gmra.mxu2 %v7319_v62  ;;  %v5927_v19 = vadd.f32 %v2676_v57, %v2584_v60  ;;  %v2682_v57 = vpop.f32.mrf.mxu0  ;;  %v2437_v60 = vrot.slane %v5741_v21, 2  ;;  %v2771_v40 = vrot.slane %v5949_v45, 1  ;;  %v5958_v21 = vpop.f32.mrf.mxu1 }
 0x458   : > { %7376 = vst [vmem:[#allocation42_spill] sm:$0xff] %v5958_v21 }
 0x459   : > { %2564 = vmatmul.f32.gmra.mxu3 %v5935_v22  ;;  %v5952_v58 = vsel %vm1825_vm5, %v2435_v35, %v2437_v60 }
 0x45a   : > { %v2393_v27 = vpop.f32.mrf.mxu2 }
 0x45b   : > { %v5941_v62 = vadd.f32 %v2393_v27, %v2259_v50  ;;  %v7375_v50 = vld [vmem:[#allocation79_spill] sm:$0xff]  ;;  %v2772_v27 = vsel %vm1469_vm4, %v2769_v37, %v2771_v40 }
 0x45c   : > { %v2517_v16 = vpop.f32.mrf.mxu3  ;;  %v2260_v63 = vadd.f32 %v7375_v50, %v5744_v13  ;;  %2901 = vmatmul.f32.gmra.mxu1 %v2772_v27  ;;  %v7377_v13 = vld [vmem:[#allocation83_spill] sm:$0xff] }
 0x45d   : > { %7374 = vst [vmem:[#allocation84_spill] sm:$0xff] %v5941_v62  ;;  %v2585_v8 = vadd.f32 %v2517_v16, %v5754_v25  ;;  %v2261_v60 = vadd.f32 %v7377_v13, %v5759_v61 }
 0x45f   : > { %3019 = vmatmul.f32.gmra.mxu2 %v7321_v5  ;;  %v5947_v15 = vadd.f32 %v2679_v42, %v2585_v8  ;;  %v2685_v35 = vpop.f32.mrf.mxu0  ;;  %v5971_v21 = vpop.f32.mrf.mxu1 }
 0x461   : > { %2567 = vmatmul.f32.gmra.mxu3 %v5952_v58 }
 0x462   : > { %v2396_v25 = vpop.f32.mrf.mxu2 }
 0x463   : > { %v5961_v5 = vadd.f32 %v2396_v25, %v2260_v63 }
 0x464   : > { %v2520_v42 = vpop.f32.mrf.mxu3 }
 0x465   : > { %v2586_v8 = vadd.f32 %v2520_v42, %v5768_v44 }
 0x467   : > { %3022 = vmatmul.f32.gmra.mxu2 %v7325_v17  ;;  %v5965_v16 = vadd.f32 %v2682_v57, %v2586_v8  ;;  %v2688_v44 = vpop.f32.mrf.mxu0  ;;  %v7378_v17 = vld [vmem:[#allocation53_spill] sm:$0xff]  ;;  %v5982_v8 = vpop.f32.mrf.mxu1 }
 0x468   : > { %v2905_v57 = vadd.f32 %v7378_v17, %v5773_v12 }
 0x46a   : > { %v2399_v50 = vpop.f32.mrf.mxu2 }
 0x46b   : > { %v5969_v62 = vadd.f32 %v2399_v50, %v2261_v60 }
 0x46c   : > { %v2523_v37 = vpop.f32.mrf.mxu3 }
 0x46d   : > { %v2587_v40 = vadd.f32 %v2523_v37, %v5780_v53  ;;  %v7380_v53 = vld [vmem:[#allocation30_spill] sm:$0xff] }
 0x46f   : > { %3025 = vmatmul.f32.gmra.mxu2 %v7328_v59  ;;  %v5975_v63 = vadd.f32 %v2685_v35, %v2587_v40  ;;  %v2906_v59 = vadd.f32 %v7380_v53, %v5786_v32  ;;  %v2691_v35 = vpop.f32.mrf.mxu0 }
 0x472   : > { %v2978_v25 = vpop.f32.mrf.mxu2 }
 0x473   : > { %v5979_v27 = vadd.f32 %v2978_v25, %v2905_v57 }
 0x474   : > { %v2526_v61 = vpop.f32.mrf.mxu3 }
 0x475   : > { %7379 = vst [vmem:[#allocation69_spill] sm:$0xff] %v5979_v27  ;;  %v2588_v42 = vadd.f32 %v2526_v61, %v5793_v23  ;;  %v5995_v23 = vpop.f32.mrf.mxu1 }
 0x477   : > { %3028 = vmatmul.f32.gmra.mxu2 %v7332_v28  ;;  %v5985_v13 = vadd.f32 %v2688_v44, %v2588_v42  ;;  %v7382_v28 = vld [vmem:[#allocation87_spill] sm:$0xff]  ;;  %v2694_v32 = vpop.f32.mrf.mxu0 }
 0x478   : > { %v2907_v44 = vadd.f32 %v7382_v28, %v5799_v7 }
 0x47a   : > { %v2981_v60 = vpop.f32.mrf.mxu2 }
 0x47b   : > { %v5989_v50 = vadd.f32 %v2981_v60, %v2906_v59 }
 0x47c   : > { %v2529_v12 = vpop.f32.mrf.mxu3 }
 0x47d   : > { %7381 = vst [vmem:[#allocation88_spill] sm:$0xff] %v5989_v50  ;;  %v2589_v37 = vadd.f32 %v2529_v12, %v5807_v49  ;;  %v2908_v49 = vadd.f32 %v5766_v26, %v5811_v2  ;;  %v2910_v2 = vadd.f32 %v5796_v38, %v5837_v56 }
 0x47f   : > { %3031 = vmatmul.f32.gmra.mxu2 %v7336_v20  ;;  %v5993_v40 = vadd.f32 %v2691_v35, %v2589_v37  ;;  %v6007_v20 = vpop.f32.mrf.mxu1  ;;  %v2697_v60 = vpop.f32.mrf.mxu0 }
 0x482   : > { %v2984_v17 = vpop.f32.mrf.mxu2 }
 0x483   : > { %v5999_v57 = vadd.f32 %v2984_v17, %v2907_v44 }
 0x484   : > { %v2532_v25 = vpop.f32.mrf.mxu3 }
 0x485   : > { %7383 = vst [vmem:[#allocation45_spill] sm:$0xff] %v5999_v57  ;;  %v2590_v61 = vadd.f32 %v2532_v25, %v5819_v0  ;;  %v2909_v0 = vadd.f32 %v5782_v41, %v5825_v34  ;;  %v7387_v41 = vld [vmem:[#allocation56_spill] sm:$0xff]  ;;  %v7389_v25 = vld [vmem:[#allocation95_spill] sm:$0xff] }
 0x487   : > { %3034 = vmatmul.f32.gmra.mxu2 %v7340_v4  ;;  %v6003_v42 = vadd.f32 %v2694_v32, %v2590_v61  ;;  %v2869_v28 = vpop.f32.mrf.mxu1  ;;  %v7390_v61 = vld [vmem:[#allocation33_spill] sm:$0xff] }
 0x48a   : > { %v2987_v53 = vpop.f32.mrf.mxu2 }
 0x48b   : > { %v6009_v59 = vadd.f32 %v2987_v53, %v2908_v49  ;;  %v2740_v49 = vadd.f32 %v7390_v61, %v7389_v25  ;;  %v7400_v61 = vld [vmem:[#allocation61_spill] sm:$0xff] }
 0x48c   : > { %v2535_v7 = vpop.f32.mrf.mxu3 }
 0x48d   : > { %7384 = vst [vmem:[#allocation72_spill] sm:$0xff] %v6009_v59  ;;  %v2591_v35 = vadd.f32 %v2535_v7, %v5833_v47  ;;  %v7393_v7 = vld [vmem:[#allocation17_spill] sm:$0xff] }
 0x48f   : > { %3037 = vmatmul.f32.gmra.mxu2 %v7343_v6  ;;  %v2753_v12 = vadd.f32 %v2697_v60, %v2591_v35  ;;  %v2739_v6 = vadd.f32 %v5805_v43, %v5848_v33  ;;  %v7394_v35 = vld [vmem:[#allocation19_spill] sm:$0xff]  ;;  %v1057_v33 = vmul.f32 %v7393_v7, %v7393_v7  ;;  %v7395_v60 = vld [vmem:[#allocation20_spill] sm:$0xff] }
 0x490   : > { %v1019_v43 = vadd.f32 %v7394_v35, %v7393_v7 }
 0x491   : > { %v6017_v26 = vadd.f32 %v2869_v28, %v2753_v12  ;;  %v2911_v34 = vadd.f32 %v7387_v41, %v2739_v6  ;;  %v1059_v28 = vmul.f32 %v7395_v60, %v7395_v60  ;;  %v7398_v6 = vld [vmem:[#allocation21_spill] sm:$0xff] }
 0x492   : > { %v2990_v4 = vpop.f32.mrf.mxu2  ;;  %v1020_v12 = vadd.f32 %v1019_v43, %v7395_v60  ;;  %v7402_v43 = vld [vmem:[#allocation23_spill] sm:$0xff] }
 0x493   : > { %v6015_v37 = vadd.f32 %v2990_v4, %v2909_v0 }
 0x494   : > { %v1021_v41 = vadd.f32 %v1020_v12, %v7398_v6  ;;  %v1062_v12 = vmul.f32 %v7402_v43, %v7402_v43 }
 0x495   : > { %7385 = vst [vmem:[#allocation92_spill] sm:$0xff] %v6015_v37 }
 0x497   : > { %3040 = vmatmul.f32.gmra.mxu2 %v7349_v18  ;;  %v7391_v18 = vld [vmem:[#allocation91_spill] sm:$0xff] }
 0x498   : > { %v2912_v38 = vadd.f32 %v7391_v18, %v2740_v49 }
 0x49a   : > { %v2993_v44 = vpop.f32.mrf.mxu2 }
 0x49b   : > { %v6022_v47 = vadd.f32 %v2993_v44, %v2910_v2 }
 0x49d   : > { %7386 = vst [vmem:[#allocation49_spill] sm:$0xff] %v6022_v47 }
 0x49f   : > { %3043 = vmatmul.f32.gmra.mxu2 %v7354_v39  ;;  %v1058_v39 = vmul.f32 %v7394_v35, %v7394_v35 }
 0x4a1   : > { %v1089_v4 = vadd.f32 %v1058_v39, %v1057_v33 }
 0x4a2   : > { %v2996_v17 = vpop.f32.mrf.mxu2 }
 0x4a3   : > { %v6028_v32 = vadd.f32 %v2996_v17, %v2911_v34  ;;  %v1090_v34 = vadd.f32 %v1089_v4, %v1059_v28  ;;  %v1060_v17 = vmul.f32 %v7398_v6, %v7398_v6 }
 0x4a5   : > { %7388 = vst [vmem:[#allocation75_spill] sm:$0xff] %v6028_v32  ;;  %v1091_v49 = vadd.f32 %v1090_v34, %v1060_v17 }
 0x4a7   : > { %3046 = vmatmul.f32.gmra.mxu2 %v7358_v48  ;;  %v7396_v48 = vld [vmem:[#allocation74_spill] sm:$0xff] }
 0x4a8   : > { %v2913_v0 = vadd.f32 %v7396_v48, %v5869_v10  ;;  %v2914_v10 = vadd.f32 %v7400_v61, %v5880_v52  ;;  %v2915_v52 = vadd.f32 %v5871_v54, %v5891_v36  ;;  %v2916_v54 = vadd.f32 %v5885_v55, %v5902_v11 }
 0x4a9   : > { %v2917_v55 = vadd.f32 %v5898_v30, %v5913_v24  ;;  %v2938_v30 = vrot.slane %v5929_v31, 2  ;;  %v2918_v24 = vadd.f32 %v5910_v3, %v5927_v19  ;;  %v7414_v31 = vld [vmem:[#allocation34_spill] sm:$0xff]  ;;  %v2940_v3 = vrot.slane %v5949_v45, 2  ;;  %v7416_v45 = vld [vmem:[#allocation40_spill] sm:$0xff] }
 0x4aa   : > { %v2999_v56 = vpop.f32.mrf.mxu2  ;;  %v2919_v19 = vadd.f32 %v5932_v29, %v5947_v15  ;;  %v7417_v29 = vld [vmem:[#allocation42_spill] sm:$0xff] }
 0x4ab   : > { %v6034_v53 = vadd.f32 %v2999_v56, %v2912_v38  ;;  %v2920_v15 = vadd.f32 %v7417_v29, %v5965_v16  ;;  %v7423_v29 = vld [vmem:[#allocation55_spill] sm:$0xff] }
 0x4ad   : > { %7392 = vst [vmem:[#allocation96_spill] sm:$0xff] %v6034_v53 }
 0x4af   : > { %3049 = vmatmul.f32.gmra.mxu2 %v7361_v14  ;;  %v7399_v14 = vld [vmem:[#allocation22_spill] sm:$0xff] }
 0x4b0   : > { %v1022_v25 = vadd.f32 %v1021_v41, %v7399_v14  ;;  %v1061_v18 = vmul.f32 %v7399_v14, %v7399_v14  ;;  %v7405_v41 = vld [vmem:[#allocation25_spill] sm:$0xff] }
 0x4b2   : > { %v3002_v2 = vpop.f32.mrf.mxu2  ;;  %v1023_v33 = vadd.f32 %v1022_v25, %v7402_v43  ;;  %v1092_v39 = vadd.f32 %v1091_v49, %v1061_v18  ;;  %v1064_v25 = vmul.f32 %v7405_v41, %v7405_v41 }
 0x4b3   : > { %v6048_v44 = vadd.f32 %v3002_v2, %v2913_v0 }
 0x4b4   : > { %v1093_v0 = vadd.f32 %v1092_v39, %v1062_v12 }
 0x4b5   : > { %7397 = vst [vmem:[#allocation78_spill] sm:$0xff] %v6048_v44 }
 0x4b7   : > { %3052 = vmatmul.f32.gmra.mxu2 %v7365_v9  ;;  %v7403_v9 = vld [vmem:[#allocation24_spill] sm:$0xff] }
 0x4b8   : > { %v1024_v48 = vadd.f32 %v1023_v33, %v7403_v9  ;;  %v1063_v4 = vmul.f32 %v7403_v9, %v7403_v9 }
 0x4ba   : > { %v3005_v38 = vpop.f32.mrf.mxu2  ;;  %v1025_v34 = vadd.f32 %v1024_v48, %v7405_v41  ;;  %v1094_v17 = vadd.f32 %v1093_v0, %v1063_v4 }
 0x4bb   : > { %v6059_v56 = vadd.f32 %v3005_v38, %v2914_v10  ;;  %v7408_v38 = vld [vmem:[#allocation27_spill] sm:$0xff] }
 0x4bc   : > { %v1095_v36 = vadd.f32 %v1094_v17, %v1064_v25  ;;  %v1066_v12 = vmul.f32 %v7408_v38, %v7408_v38 }
 0x4bd   : > { %7401 = vst [vmem:[#allocation99_spill] sm:$0xff] %v6059_v56 }
 0x4bf   : > { %3055 = vmatmul.f32.gmra.mxu2 %v7368_v1  ;;  %v7406_v1 = vld [vmem:[#allocation26_spill] sm:$0xff] }
 0x4c0   : > { %v1026_v61 = vadd.f32 %v1025_v34, %v7406_v1  ;;  %v1065_v10 = vmul.f32 %v7406_v1, %v7406_v1 }
 0x4c2   : > { %v3008_v28 = vpop.f32.mrf.mxu2  ;;  %v1027_v33 = vadd.f32 %v1026_v61, %v7408_v38  ;;  %v1096_v39 = vadd.f32 %v1095_v36, %v1065_v10 }
 0x4c3   : > { %v6070_v2 = vadd.f32 %v3008_v28, %v2915_v52  ;;  %v7411_v28 = vld [vmem:[#allocation29_spill] sm:$0xff] }
 0x4c4   : > { %v1097_v11 = vadd.f32 %v1096_v39, %v1066_v12  ;;  %v1068_v25 = vmul.f32 %v7411_v28, %v7411_v28  ;;  %v7413_v39 = vld [vmem:[#allocation32_spill] sm:$0xff] }
 0x4c5   : > { %7404 = vst [vmem:[#allocation82_spill] sm:$0xff] %v6070_v2 }
 0x4c7   : > { %3058 = vmatmul.f32.gmra.mxu2 %v7371_v46  ;;  %v7409_v46 = vld [vmem:[#allocation28_spill] sm:$0xff] }
 0x4c8   : > { %v1028_v48 = vadd.f32 %v1027_v33, %v7409_v46  ;;  %v1067_v52 = vmul.f32 %v7409_v46, %v7409_v46 }
 0x4ca   : > { %v3011_v49 = vpop.f32.mrf.mxu2  ;;  %v1029_v34 = vadd.f32 %v1028_v48, %v7411_v28  ;;  %v1098_v17 = vadd.f32 %v1097_v11, %v1067_v52  ;;  %v1071_v52 = vmul.f32 %v7414_v31, %v7414_v31 }
 0x4cb   : > { %v6081_v18 = vadd.f32 %v3011_v49, %v2916_v54  ;;  %v2937_v54 = vrot.slane %v5922_v51, 2  ;;  %v1070_v51 = vmul.f32 %v7413_v39, %v7413_v39 }
 0x4cc   : > { %v1099_v36 = vadd.f32 %v1098_v17, %v1068_v25  ;;  %v7415_v17 = vld [vmem:[#allocation37_spill] sm:$0xff] }
 0x4cd   : > { %7407 = vst [vmem:[#allocation112_spill] sm:$0xff] %v6081_v18 }
 0x4cf   : > { %3061 = vmatmul.f32.gmra.mxu2 %v5935_v22  ;;  %v7412_v22 = vld [vmem:[#allocation31_spill] sm:$0xff] }
 0x4d0   : > { %v1030_v61 = vadd.f32 %v1029_v34, %v7412_v22  ;;  %v1069_v10 = vmul.f32 %v7412_v22, %v7412_v22 }
 0x4d2   : > { %v3014_v0 = vpop.f32.mrf.mxu2  ;;  %v1031_v12 = vadd.f32 %v1030_v61, %v7413_v39  ;;  %v1100_v48 = vadd.f32 %v1099_v36, %v1069_v10  ;;  %v2941_v61 = vsel %vm1825_vm5, %v2938_v30, %v2940_v3  ;;  %v7420_v3 = vld [vmem:[#allocation48_spill] sm:$0xff] }
 0x4d3   : > { %v6092_v4 = vadd.f32 %v3014_v0, %v2917_v55  ;;  %v1075_v16 = vmul.f32 %v7420_v3, %v7420_v3 }
 0x4d4   : > { %v1032_v55 = vadd.f32 %v1031_v12, %v7414_v31  ;;  %v1101_v11 = vadd.f32 %v1100_v48, %v1070_v51  ;;  %v7419_v48 = vld [vmem:[#allocation43_spill] sm:$0xff] }
 0x4d5   : > { %7410 = vst [vmem:[#allocation81_spill] sm:$0xff] %v6092_v4 }
 0x4d6   : > { %v1033_v25 = vadd.f32 %v1032_v55, %v7415_v17  ;;  %v1074_v55 = vmul.f32 %v7419_v48, %v7419_v48 }
 0x4d7   : > { %3064 = vmatmul.f32.gmra.mxu2 %v5952_v58  ;;  %v2939_v58 = vsel %vm1825_vm5, %v2937_v54, %v2938_v30  ;;  %v1102_v54 = vadd.f32 %v1101_v11, %v1071_v52  ;;  %v2921_v11 = vadd.f32 %v5971_v21, %v5975_v63  ;;  %v1077_v21 = vmul.f32 %v7423_v29, %v7423_v29  ;;  %v6148_v63 = vpop.f32.mrf.mxu3 }
 0x4d8   : > { %v1034_v36 = vadd.f32 %v1033_v25, %v7416_v45 }
 0x4da   : > { %v3017_v49 = vpop.f32.mrf.mxu2  ;;  %v1035_v51 = vadd.f32 %v1034_v36, %v7419_v48  ;;  %v3149_v48 = vmul.f32 %v6009_v59, %v6009_v59 }
 0x4db   : > { %v6105_v33 = vadd.f32 %v3017_v49, %v2918_v24  ;;  %v1072_v24 = vmul.f32 %v7415_v17, %v7415_v17  ;;  %v1073_v49 = vmul.f32 %v7416_v45, %v7416_v45  ;;  %v7435_v45 = vld [vmem:[#allocation63_spill] sm:$0xff] }
 0x4dd   : > { %v1103_v10 = vadd.f32 %v1102_v54, %v1072_v24 }
 0x4df   : > { %3067 = vmatmul.f32.gmra.mxu2 %v2939_v58  ;;  %v1104_v30 = vadd.f32 %v1103_v10, %v1073_v49  ;;  %v2922_v10 = vadd.f32 %v5982_v8, %v5985_v13  ;;  %v2923_v8 = vadd.f32 %v5995_v23, %v5993_v40  ;;  %v2924_v40 = vadd.f32 %v6007_v20, %v6003_v42  ;;  %v7431_v42 = vld [vmem:[#allocation54_spill] sm:$0xff] }
 0x4e1   : > { %v1105_v52 = vadd.f32 %v1104_v30, %v1074_v55  ;;  %v7424_v30 = vld [vmem:[#allocation58_spill] sm:$0xff] }
 0x4e2   : > { %v3020_v0 = vpop.f32.mrf.mxu2 }
 0x4e3   : > { %v6117_v34 = vadd.f32 %v3020_v0, %v2919_v19  ;;  %v1036_v19 = vadd.f32 %v1035_v51, %v7420_v3  ;;  %v1106_v24 = vadd.f32 %v1105_v52, %v1075_v16  ;;  %v7425_v52 = vld [vmem:[#allocation62_spill] sm:$0xff]  ;;  %v7434_v3 = vld [vmem:[#allocation60_spill] sm:$0xff] }
 0x4e7   : > { %3070 = vmatmul.f32.gmra.mxu2 %v2941_v61  ;;  %v7422_v61 = vld [vmem:[#allocation52_spill] sm:$0xff] }
 0x4e8   : > { %v1037_v54 = vadd.f32 %v1036_v19, %v7422_v61  ;;  %v1076_v36 = vmul.f32 %v7422_v61, %v7422_v61 }
 0x4ea   : > { %v3023_v12 = vpop.f32.mrf.mxu2  ;;  %v1107_v49 = vadd.f32 %v1106_v24, %v1076_v36  ;;  %v6162_v36 = vpop.f32.mrf.mxu1 }
 0x4eb   : > { %v6128_v58 = vadd.f32 %v3023_v12, %v2920_v15  ;;  %v1038_v15 = vadd.f32 %v1037_v54, %v7423_v29  ;;  %v1079_v54 = vmul.f32 %v7425_v52, %v7425_v52 }
 0x4ec   : > { %v1108_v19 = vadd.f32 %v1107_v49, %v1077_v21  ;;  %v6167_v21 = vpop.f32.mrf.mxu3 }
 0x4ed   : > { %7418 = vst [vmem:[#allocation109_spill] sm:$0xff] %v6128_v58  ;;  %v1039_v55 = vadd.f32 %v1038_v15, %v7424_v30  ;;  %v7427_v15 = vld [vmem:[#allocation65_spill] sm:$0xff] }
 0x4ef   : > { %v1040_v16 = vadd.f32 %v1039_v55, %v7425_v52  ;;  %v1080_v55 = vmul.f32 %v7427_v15, %v7427_v15 }
 0x4f1   : > { %v1041_v49 = vadd.f32 %v1040_v16, %v7427_v15  ;;  %v7430_v16 = vld [vmem:[#allocation50_spill] sm:$0xff] }
 0x4f2   : > { %v3026_v0 = vpop.f32.mrf.mxu2 }
 0x4f3   : > { %v6138_v25 = vadd.f32 %v3026_v0, %v2921_v11  ;;  %v1078_v11 = vmul.f32 %v7424_v30, %v7424_v30  ;;  %v6156_v0 = vpop.f32.mrf.mxu0  ;;  %v7428_v30 = vld [vmem:[#allocation46_spill] sm:$0xff] }
 0x4f4   : > { %v1042_v29 = vadd.f32 %v1041_v49, %v7428_v30  ;;  %v1081_v23 = vmul.f32 %v7428_v30, %v7428_v30  ;;  %v6185_v15 = vpop.f32.mrf.mxu3 }
 0x4f5   : > { %7421 = vst [vmem:[#allocation86_spill] sm:$0xff] %v6138_v25  ;;  %v1109_v13 = vadd.f32 %v1108_v19, %v1078_v11 }
 0x4f6   : > { %v1043_v52 = vadd.f32 %v1042_v29, %v7430_v16 }
 0x4f8   : > { %v1044_v20 = vadd.f32 %v1043_v52, %v7431_v42  ;;  %v3147_v52 = vmul.f32 %v5989_v50, %v5989_v50 }
 0x4fa   : > { %v3029_v12 = vpop.f32.mrf.mxu2 }
 0x4fb   : > { %v6150_v51 = vadd.f32 %v3029_v12, %v2922_v10  ;;  %v1110_v12 = vadd.f32 %v1109_v13, %v1079_v54  ;;  %v6176_v11 = vpop.f32.mrf.mxu0  ;;  %v6181_v13 = vpop.f32.mrf.mxu1  ;;  %v1082_v54 = vmul.f32 %v7430_v16, %v7430_v16 }
 0x4fd   : > { %v1111_v19 = vadd.f32 %v1110_v12, %v1080_v55  ;;  %v1083_v12 = vmul.f32 %v7431_v42, %v7431_v42 }
 0x4ff   : > { %v1112_v49 = vadd.f32 %v1111_v19, %v1081_v23 }
 0x501   : > { %v1113_v55 = vadd.f32 %v1112_v49, %v1082_v54  ;;  %v6203_v54 = vpop.f32.mrf.mxu3  ;;  %v3148_v49 = vmul.f32 %v5999_v57, %v5999_v57 }
 0x502   : > { %v3032_v24 = vpop.f32.mrf.mxu2 }
 0x503   : > { %v6164_v10 = vadd.f32 %v3032_v24, %v2923_v8  ;;  %v6194_v61 = vpop.f32.mrf.mxu0  ;;  %v1114_v23 = vadd.f32 %v1113_v55, %v1083_v12  ;;  %v6198_v19 = vpop.f32.mrf.mxu1 }
 0x505   : > { %7426 = vst [vmem:[#allocation114_spill] sm:$0xff] %v6164_v10 }
 0x50a   : > { %v3035_v8 = vpop.f32.mrf.mxu2 }
 0x50b   : > { %v6178_v24 = vadd.f32 %v3035_v8, %v2924_v40  ;;  %v7433_v8 = vld [vmem:[#allocation57_spill] sm:$0xff] }
 0x50c   : > { %v1045_v29 = vadd.f32 %v1044_v20, %v7433_v8  ;;  %v1084_v16 = vmul.f32 %v7433_v8, %v7433_v8  ;;  %v1085_v20 = vmul.f32 %v7434_v3, %v7434_v3 }
 0x50d   : > { %7429 = vst [vmem:[#allocation110_spill] sm:$0xff] %v6178_v24 }
 0x50e   : > { %v1046_v42 = vadd.f32 %v1045_v29, %v7434_v3  ;;  %v1115_v12 = vadd.f32 %v1114_v23, %v1084_v16  ;;  %v1086_v3 = vmul.f32 %v7435_v45, %v7435_v45  ;;  %v6224_v23 = vpop.f32.mrf.mxu0 }
 0x510   : > { %v1047_v17 = vadd.f32 %v1046_v42, %v7435_v45  ;;  %v1116_v16 = vadd.f32 %v1115_v12, %v1085_v20 }
 0x512   : > { %v3038_v30 = vpop.f32.mrf.mxu2  ;;  %v1117_v45 = vadd.f32 %v1116_v16, %v1086_v3  ;;  %v3154_v3 = vmul.f32 %v6048_v44, %v6048_v44 }
 0x513   : > { %v6191_v40 = vadd.f32 %v3038_v30, %v6017_v26  ;;  %v3146_v26 = vmul.f32 %v5979_v27, %v5979_v27  ;;  %v3108_v30 = vadd.f32 %v5989_v50, %v5979_v27  ;;  %v3150_v27 = vmul.f32 %v6015_v37, %v6015_v37 }
 0x515   : > { %7432 = vst [vmem:[#allocation90_spill] sm:$0xff] %v6191_v40  ;;  %v3178_v8 = vadd.f32 %v3147_v52, %v3146_v26  ;;  %v3109_v29 = vadd.f32 %v3108_v30, %v5999_v57  ;;  %v3151_v30 = vmul.f32 %v6022_v47, %v6022_v47  ;;  %v7436_v57 = vld [vmem:[#allocation67_spill] sm:$0xff] }
 0x516   : > { %v1048_v42 = vadd.f32 %v1047_v17, %v7436_v57  ;;  %v1087_v20 = vmul.f32 %v7436_v57, %v7436_v57  ;;  %v3153_v17 = vmul.f32 %v6034_v53, %v6034_v53 }
 0x517   : > { %v3179_v31 = vadd.f32 %v3178_v8, %v3148_v49  ;;  %v3110_v50 = vadd.f32 %v3109_v29, %v6009_v59  ;;  %v6230_v8 = vpop.f32.mrf.mxu1  ;;  %v3152_v59 = vmul.f32 %v6028_v32, %v6028_v32 }
 0x518   : > { %v1118_v16 = vadd.f32 %v1117_v45, %v1087_v20 }
 0x519   : > { %v3180_v52 = vadd.f32 %v3179_v31, %v3149_v48  ;;  %v3111_v26 = vadd.f32 %v3110_v50, %v6015_v37  ;;  %v2550_v31 = vpop.f32.mrf.mxu3  ;;  %v7437_v37 = vld [vmem:[#allocation71_spill] sm:$0xff] }
 0x51a   : > { %v6213_v55 = vpop.f32.mrf.mxu2 }
 0x51b   : > { %v3181_v49 = vadd.f32 %v3180_v52, %v3150_v27  ;;  %v3112_v29 = vadd.f32 %v3111_v26, %v6022_v47  ;;  %v1049_v27 = vadd.f32 %v1048_v42, %v7437_v37  ;;  %v1088_v47 = vmul.f32 %v7437_v37, %v7437_v37 }
 0x51c   : > { %v3156_v42 = vmul.f32 %v6070_v2, %v6070_v2 }
 0x51d   : > { %v3182_v50 = vadd.f32 %v3181_v49, %v3151_v30  ;;  %v3113_v12 = vadd.f32 %v3112_v29, %v6028_v32  ;;  %v3155_v49 = vmul.f32 %v6059_v56, %v6059_v56  ;;  %v1050_v29 = vrot.slane %v1049_v27, 4  ;;  %v2712_v32 = vpop.f32.mrf.mxu0 }
 0x51f   : > { %v3183_v52 = vadd.f32 %v3182_v50, %v3152_v59  ;;  %v3114_v26 = vadd.f32 %v3113_v12, %v6034_v53  ;;  %v1119_v50 = vadd.f32 %v1118_v16, %v1088_v47  ;;  %v6256_v45 = vpop.f32.mrf.mxu1 }
 0x521   : > { %v3184_v57 = vadd.f32 %v3183_v52, %v3153_v17  ;;  %v3115_v30 = vadd.f32 %v3114_v26, %v6048_v44  ;;  %v3157_v52 = vmul.f32 %v6081_v18, %v6081_v18  ;;  %v1051_v26 = vadd.f32 %v1050_v29, %v1049_v27  ;;  %v2553_v44 = vpop.f32.mrf.mxu3 }
 0x522   : > { %v6237_v48 = vpop.f32.mrf.mxu2  ;;  %v3160_v29 = vmul.f32 %v6117_v34, %v6117_v34 }
 0x523   : > { %v3185_v39 = vadd.f32 %v3184_v57, %v3154_v3  ;;  %v3116_v59 = vadd.f32 %v3115_v30, %v6059_v56  ;;  %v3158_v3 = vmul.f32 %v6092_v4, %v6092_v4  ;;  %v1120_v30 = vrot.slane %v1119_v50, 4 }
 0x525   : > { %v3186_v20 = vadd.f32 %v3185_v39, %v3155_v49  ;;  %v3117_v17 = vadd.f32 %v3116_v59, %v6070_v2  ;;  %v3159_v39 = vmul.f32 %v6105_v33, %v6105_v33  ;;  %v1052_v49 = vrot.slane %v1051_v26, 2  ;;  %v7438_v59 = vld [vmem:[#allocation59_spill] sm:$0xff] }
 0x526   : > { %v2592_v2 = vadd.f32 %v6148_v63, %v7438_v59  ;;  %v7440_v63 = vld [vmem:[#allocation77_spill] sm:$0xff] }
 0x527   : > { %v3187_v53 = vadd.f32 %v3186_v20, %v3156_v42  ;;  %v3118_v57 = vadd.f32 %v3117_v17, %v6081_v18  ;;  %v1121_v42 = vadd.f32 %v1120_v30, %v1119_v50  ;;  %v2715_v20 = vpop.f32.mrf.mxu0  ;;  %v7439_v17 = vld [vmem:[#allocation35_spill] sm:$0xff]  ;;  %v3161_v18 = vmul.f32 %v6128_v58, %v6128_v58 }
 0x528   : > { %v1053_v22 = vadd.f32 %v1052_v49, %v1051_v26 }
 0x529   : > { %v3188_v47 = vadd.f32 %v3187_v53, %v3157_v52  ;;  %v3119_v16 = vadd.f32 %v3118_v57, %v6092_v4  ;;  %v2593_v53 = vadd.f32 %v6167_v21, %v7439_v17  ;;  %v3162_v21 = vmul.f32 %v6138_v25, %v6138_v25  ;;  %v2556_v17 = vpop.f32.mrf.mxu3 }
 0x52a   : > { %v6254_v12 = vpop.f32.mrf.mxu2  ;;  %v1122_v30 = vrot.slane %v1121_v42, 2 }
 0x52b   : > { %v3189_v56 = vadd.f32 %v3188_v47, %v3158_v3  ;;  %v3120_v27 = vadd.f32 %v3119_v16, %v6105_v33  ;;  %v2594_v3 = vadd.f32 %v6185_v15, %v7440_v63  ;;  %v2887_v47 = vpop.f32.mrf.mxu1  ;;  %v2754_v16 = vadd.f32 %v6156_v0, %v2592_v2 }
 0x52c   : > { %v3163_v15 = vmul.f32 %v6150_v51, %v6150_v51  ;;  %v1054_v2 = vrot.slane %v1053_v22, 1 }
 0x52d   : > { %v3190_v57 = vadd.f32 %v3189_v56, %v3159_v39  ;;  %v3121_v4 = vadd.f32 %v3120_v27, %v6117_v34  ;;  %v2755_v56 = vadd.f32 %v6176_v11, %v2593_v53  ;;  %v7441_v39 = vld [vmem:[#allocation36_spill] sm:$0xff]  ;;  %v2756_v0 = vadd.f32 %v6194_v61, %v2594_v3 }
 0x52e   : > { %v2595_v27 = vadd.f32 %v6203_v54, %v7441_v39  ;;  %v3164_v11 = vmul.f32 %v6164_v10, %v6164_v10  ;;  %v2926_v54 = vadd.f32 %v6162_v36, %v2754_v16  ;;  %v1123_v53 = vadd.f32 %v1122_v30, %v1121_v42 }
 0x52f   : > { %v3191_v59 = vadd.f32 %v3190_v57, %v3160_v29  ;;  %v3122_v50 = vadd.f32 %v3121_v4, %v6128_v58  ;;  %v7442_v4 = vld [vmem:[#allocation64_spill] sm:$0xff]  ;;  %v2927_v39 = vadd.f32 %v6181_v13, %v2755_v56  ;;  %v2928_v36 = vadd.f32 %v6198_v19, %v2756_v0 }
 0x530   : > { %v2596_v29 = vadd.f32 %v2550_v31, %v7442_v4  ;;  %v3165_v31 = vmul.f32 %v6178_v24, %v6178_v24  ;;  %v6302_v3 = vadd.f32 %v6213_v55, %v2926_v54  ;;  %v1055_v16 = vadd.f32 %v1054_v2, %v1053_v22 }
 0x531   : > { %v3192_v26 = vadd.f32 %v3191_v59, %v3161_v18  ;;  %v3123_v49 = vadd.f32 %v3122_v50, %v6138_v25  ;;  %v2757_v18 = vadd.f32 %v6224_v23, %v2595_v27  ;;  %v7443_v59 = vld [vmem:[#allocation80_spill] sm:$0xff]  ;;  %v6309_v13 = vadd.f32 %v6237_v48, %v2927_v39  ;;  %v2559_v4 = vpop.f32.mrf.mxu3 }
 0x532   : > { %v3050_v52 = vpop.f32.mrf.mxu2  ;;  %v2597_v50 = vadd.f32 %v2553_v44, %v7443_v59  ;;  %7444 = vst [vmem:[#allocation116_spill] sm:$0xff] %v6302_v3  ;;  %v3166_v44 = vmul.f32 %v6191_v40, %v6191_v40  ;;  %v1124_v30 = vrot.slane %v1123_v53, 1  ;;  %v6316_v19 = vadd.f32 %v6254_v12, %v2928_v36 }
 0x533   : > { %v3193_v57 = vadd.f32 %v3192_v26, %v3162_v21  ;;  %v3124_v63 = vadd.f32 %v3123_v49, %v6150_v51  ;;  %v2718_v21 = vpop.f32.mrf.mxu0  ;;  %v2758_v26 = vadd.f32 %v2712_v32, %v2596_v29  ;;  %7445 = vst [vmem:[#allocation85_spill] sm:$0xff] %v6309_v13  ;;  %v2929_v27 = vadd.f32 %v6230_v8, %v2757_v18  ;;  %v2890_v55 = vpop.f32.mrf.mxu1  ;;  %v7449_v29 = vld [vmem:[#allocation18_spill] sm:$0xff] }
 0x534   : > { %v2759_v56 = vadd.f32 %v2715_v20, %v2597_v50  ;;  %7446 = vst [vmem:[#allocation111_spill] sm:$0xff] %v6316_v19  ;;  %v3168_v8 = vmul.f32 %v6309_v13, %v6309_v13 }
 0x535   : > { %v3194_v58 = vadd.f32 %v3193_v57, %v3163_v15  ;;  %v3125_v61 = vadd.f32 %v3124_v63, %v6164_v10  ;;  %v7447_v15 = vld [vmem:[#allocation39_spill] sm:$0xff]  ;;  %v2930_v48 = vadd.f32 %v6256_v45, %v2758_v26  ;;  %v6323_v2 = vadd.f32 %v3050_v52, %v2929_v27 }
 0x536   : > { %v2598_v0 = vadd.f32 %v2556_v17, %v7447_v15  ;;  %v6326_v57 = vmul.f32 %v1055_v16, %v7449_v29  ;;  %v1125_v63 = vadd.f32 %v1124_v30, %v1123_v53  ;;  %v3169_v45 = vmul.f32 %v6316_v19, %v6316_v19 }
 0x537   : > { %v3195_v42 = vadd.f32 %v3194_v58, %v3164_v11  ;;  %v3126_v23 = vadd.f32 %v3125_v61, %v6178_v24  ;;  %v3167_v58 = vmul.f32 %v6302_v3, %v6302_v3  ;;  %7448 = vst [vmem:[#allocation94_spill] sm:$0xff] %v6323_v2  ;;  %v2931_v11 = vadd.f32 %v2887_v47, %v2759_v56 }
 0x538   : > { %v2760_v59 = vadd.f32 %v2718_v21, %v2598_v0  ;;  %v3170_v52 = vmul.f32 %v6323_v2, %v6323_v2  ;;  %v1126_v47 = vmul.f32 %v1125_v63, %v7449_v29  ;;  %v1127_v53 = vmul.f32 %v6326_v57, %v6326_v57  ;;  %v7451_v21 = vld [vmem:[#allocation66_spill] sm:$0xff] }
 0x539   : > { %v3196_v49 = vadd.f32 %v3195_v42, %v3165_v31  ;;  %v3127_v32 = vadd.f32 %v3126_v23, %v6191_v40  ;;  %v2599_v42 = vadd.f32 %v2559_v4, %v7451_v21 }
 0x53a   : > { %v3053_v25 = vpop.f32.mrf.mxu2  ;;  %v2932_v56 = vadd.f32 %v2890_v55, %v2760_v59  ;;  %v1128_v27 = vsub.f32 %v1126_v47, %v1127_v53 }
 0x53b   : > { %v3197_v22 = vadd.f32 %v3196_v49, %v3166_v44  ;;  %v3128_v20 = vadd.f32 %v3127_v32, %v6302_v3  ;;  %v6331_v18 = vadd.f32 %v3053_v25, %v2930_v48  ;;  %v2721_v31 = vpop.f32.mrf.mxu0  ;;  %v2893_v23 = vpop.f32.mrf.mxu1 }
 0x53c   : > { %v2562_v49 = vpop.f32.mrf.mxu3  ;;  %v2761_v48 = vadd.f32 %v2721_v31, %v2599_v42 }
 0x53d   : > { %v3198_v54 = vadd.f32 %v3197_v22, %v3167_v58  ;;  %v3129_v17 = vadd.f32 %v3128_v20, %v6309_v13  ;;  %7450 = vst [vmem:[#allocation118_spill] sm:$0xff] %v6331_v18  ;;  %v3171_v25 = vmul.f32 %v6331_v18, %v6331_v18 }
 0x53f   : > { %v3199_v50 = vadd.f32 %v3198_v54, %v3168_v8  ;;  %v3130_v39 = vadd.f32 %v3129_v17, %v6316_v19  ;;  %v1129_v8 = vmax.f32 %v1128_v27, 0.0  ;;  %v2933_v54 = vadd.f32 %v2893_v23, %v2761_v48 }
 0x541   : > { %v3200_v26 = vadd.f32 %v3199_v50, %v3169_v45  ;;  %v3131_v36 = vadd.f32 %v3130_v39, %v6323_v2  ;;  %v1162_v17 = vadd.f32 1e-05, %v1129_v8 }
 0x542   : > { %v3056_v12 = vpop.f32.mrf.mxu2 }
 0x543   : > { %v6336_v61 = vadd.f32 %v3056_v12, %v2931_v11  ;;  %v3201_v44 = vadd.f32 %v3200_v26, %v3170_v52  ;;  %v3132_v16 = vadd.f32 %v3131_v36, %v6331_v18  ;;  %v2724_v11 = vpop.f32.mrf.mxu0  ;;  %v7452_v12 = vld [vmem:[#allocation84_spill] sm:$0xff]  ;;  %v2896_v50 = vpop.f32.mrf.mxu1  ;;  %3741 = vrsqrt.f32 %v1162_v17 }
 0x544   : > { %v2600_v55 = vadd.f32 %v2562_v49, %v7452_v12  ;;  %v2565_v39 = vpop.f32.mrf.mxu3  ;;  %vm1169_vm6 = vweird.f32 %v1162_v17 }
 0x545   : > { %v3172_v30 = vmul.f32 %v6336_v61, %v6336_v61  ;;  %v3202_v58 = vadd.f32 %v3201_v44, %v3171_v25  ;;  %v3133_v15 = vadd.f32 %v3132_v16, %v6336_v61  ;;  %v2601_v36 = vadd.f32 %v2565_v39, %v5961_v5 }
 0x546   : > { %v2762_v52 = vadd.f32 %v2724_v11, %v2600_v55 }
 0x547   : > { %v3203_v22 = vadd.f32 %v3202_v58, %v3172_v30 }
 0x548   : > { %v2934_v25 = vadd.f32 %v2896_v50, %v2762_v52  ;;  %v1131_v52 = vsub.f32 %v7394_v35, %v6326_v57 }
 0x549   : > { %v3742_v23 = vpop.eup %3741 }
 0x54a   : > { %v3059_v32 = vpop.f32.mrf.mxu2  ;;  %v1164_v49 = vmul.f32 %v3742_v23, %v1162_v17  ;;  %vm1170_vm7 = vweird.f32 %v3742_v23  ;;  %v1141_v17 = vsub.f32 %v7411_v28, %v6326_v57  ;;  %v7458_v28 = vld [vmem:[#allocation43_spill] sm:$0xff] }
 0x54b   : > { %v6349_v0 = vadd.f32 %v3059_v32, %v2932_v56  ;;  %v2727_v26 = vpop.f32.mrf.mxu0  ;;  %v2899_v44 = vpop.f32.mrf.mxu1  ;;  %vm1171_vm8 = vmor %vm1169_vm6, %vm1170_vm7 }
 0x54c   : > { %v2763_v16 = vadd.f32 %v2727_v26, %v2601_v36  ;;  %v2568_v27 = vpop.f32.mrf.mxu3  ;;  %v1134_v26 = vsub.f32 %v7399_v14, %v6326_v57  ;;  %v1137_v36 = vsub.f32 %v7405_v41, %v6326_v57  ;;  %v1139_v14 = vsub.f32 %v7408_v38, %v6326_v57  ;;  %v7454_v41 = vld [vmem:[#allocation32_spill] sm:$0xff]  ;;  %v7456_v38 = vld [vmem:[#allocation37_spill] sm:$0xff] }
 0x54d   : > { %v3134_v4 = vadd.f32 %v3133_v15, %v6349_v0  ;;  %v3173_v20 = vmul.f32 %v6349_v0, %v6349_v0  ;;  %v2602_v15 = vadd.f32 %v2568_v27, %v5969_v62  ;;  %v1130_v62 = vsub.f32 %v7393_v7, %v6326_v57 }
 0x54e   : > { %v2935_v58 = vadd.f32 %v2899_v44, %v2763_v16  ;;  %v1136_v7 = vsub.f32 %v7403_v9, %v6326_v57  ;;  %v7453_v44 = vld [vmem:[#allocation31_spill] sm:$0xff]  ;;  %v1145_v27 = vsub.f32 %v7456_v38, %v6326_v57  ;;  %v7466_v38 = vld [vmem:[#allocation50_spill] sm:$0xff] }
 0x54f   : > { %v3204_v63 = vadd.f32 %v3203_v22, %v3173_v20  ;;  %v1165_v22 = vmul.f32 %v3742_v23, %v1164_v49  ;;  %v1142_v16 = vsub.f32 %v7453_v44, %v6326_v57 }
 0x551   : > { %v1166_v12 = vmul.f32 0.5, %v1165_v22  ;;  %v7460_v22 = vld [vmem:[#allocation52_spill] sm:$0xff] }
 0x552   : > { %v3062_v45 = vpop.f32.mrf.mxu2 }
 0x553   : > { %v6355_v59 = vadd.f32 %v3062_v45, %v2933_v54  ;;  %v2730_v48 = vpop.f32.mrf.mxu0  ;;  %v2902_v11 = vpop.f32.mrf.mxu1  ;;  %v1161_v45 = vsub.f32 %v7437_v37, %v6326_v57  ;;  %v1167_v39 = vsub.f32 1.5, %v1166_v12  ;;  %v1135_v37 = vsub.f32 %v7402_v43, %v6326_v57 }
 0x554   : > { %v2764_v20 = vadd.f32 %v2730_v48, %v2602_v15  ;;  %v1140_v43 = vsub.f32 %v7409_v46, %v6326_v57  ;;  %v7457_v46 = vld [vmem:[#allocation40_spill] sm:$0xff] }
 0x555   : > { %v3135_v47 = vadd.f32 %v3134_v4, %v6355_v59  ;;  %v3174_v53 = vmul.f32 %v6355_v59, %v6355_v59  ;;  %v1168_v9 = vmul.f32 %v3742_v23, %v1167_v39  ;;  %v1146_v49 = vsub.f32 %v7457_v46, %v6326_v57  ;;  %v7459_v48 = vld [vmem:[#allocation48_spill] sm:$0xff] }
 0x556   : > { %v2936_v54 = vadd.f32 %v2902_v11, %v2764_v20  ;;  %v1149_v20 = vsub.f32 %v7460_v22, %v6326_v57  ;;  %v7462_v11 = vld [vmem:[#allocation58_spill] sm:$0xff]  ;;  %v1155_v46 = vsub.f32 %v7466_v38, %v6326_v57 }
 0x557   : > { %v3205_v31 = vadd.f32 %v3204_v63, %v3174_v53  ;;  %v1151_v12 = vsub.f32 %v7462_v11, %v6326_v57  ;;  %v7470_v11 = vld [vmem:[#allocation63_spill] sm:$0xff] }
 0x55a   : > { %v3065_v21 = vpop.f32.mrf.mxu2 }
 0x55b   : > { %v6361_v42 = vadd.f32 %v3065_v21, %v2934_v25 }
 0x55d   : > { %v3136_v30 = vadd.f32 %v3135_v47, %v6361_v42  ;;  %v3175_v56 = vmul.f32 %v6361_v42, %v6361_v42  ;;  %v1132_v47 = vsub.f32 %v7395_v60, %v6326_v57 }
 0x55f   : > { %v3206_v32 = vadd.f32 %v3205_v31, %v3175_v56  ;;  %v1133_v31 = vsub.f32 %v7398_v6, %v6326_v57  ;;  %v1138_v6 = vsub.f32 %v7406_v1, %v6326_v57  ;;  %v7455_v1 = vld [vmem:[#allocation34_spill] sm:$0xff] }
 0x560   : > { %v1144_v56 = vsub.f32 %v7455_v1, %v6326_v57 }
 0x562   : > { %v3068_v5 = vpop.f32.mrf.mxu2 }
 0x563   : > { %v6367_v4 = vadd.f32 %v3068_v5, %v2935_v58  ;;  %v1148_v5 = vsub.f32 %v7459_v48, %v6326_v57 }
 0x565   : > { %v3137_v8 = vadd.f32 %v3136_v30, %v6367_v4  ;;  %v3176_v63 = vmul.f32 %v6367_v4, %v6367_v4  ;;  %v1143_v30 = vsub.f32 %v7454_v41, %v6326_v57  ;;  %v7465_v41 = vld [vmem:[#allocation46_spill] sm:$0xff] }
 0x566   : > { %v1154_v1 = vsub.f32 %v7465_v41, %v6326_v57 }
 0x567   : > { %v3207_v55 = vadd.f32 %v3206_v32, %v3176_v63  ;;  %v1147_v32 = vsub.f32 %v7458_v28, %v6326_v57  ;;  %v7467_v28 = vld [vmem:[#allocation54_spill] sm:$0xff] }
 0x568   : > { %v1156_v48 = vsub.f32 %v7467_v28, %v6326_v57 }
 0x56a   : > { %v3071_v50 = vpop.f32.mrf.mxu2 }
 0x56b   : > { %v6380_v53 = vadd.f32 %v3071_v50, %v2936_v54  ;;  %v7463_v54 = vld [vmem:[#allocation62_spill] sm:$0xff] }
 0x56c   : > { %v1152_v50 = vsub.f32 %v7463_v54, %v6326_v57  ;;  %v1159_v54 = vsub.f32 %v7470_v11, %v6326_v57  ;;  %v6450_v11 = vld [vmem:[%s6953_s9] ss:$0 sm:$0xff] }
 0x56d   : > { %v3138_v35 = vadd.f32 %v3137_v8, %v6380_v53  ;;  %v3177_v60 = vmul.f32 %v6380_v53, %v6380_v53  ;;  %v7461_v8 = vld [vmem:[#allocation55_spill] sm:$0xff] }
 0x56e   : > { %v1150_v63 = vsub.f32 %v7461_v8, %v6326_v57 }
 0x56f   : > { %v3139_v25 = vrot.slane %v3138_v35, 4  ;;  %v3208_v21 = vadd.f32 %v3207_v55, %v3177_v60  ;;  %v1172_v55 = vsel %vm1171_vm8, %v3742_v23, %v1168_v9  ;;  %v7468_v23 = vld [vmem:[#allocation57_spill] sm:$0xff] }
 0x570   : > { %v1157_v9 = vsub.f32 %v7468_v23, %v6326_v57  ;;  %v1173_v38 = vmul.f32 %v1172_v55, %v1130_v62  ;;  %v1174_v28 = vmul.f32 %v1172_v55, %v1131_v52  ;;  %v1175_v18 = vmul.f32 %v1172_v55, %v1132_v47 }
 0x571   : > { %v3140_v58 = vadd.f32 %v3139_v25, %v3138_v35  ;;  %v3209_v15 = vrot.slane %v3208_v21, 4  ;;  %v1204_v35 = vmul.f32 %v1172_v55, %v1161_v45  ;;  %v7464_v25 = vld [vmem:[#allocation65_spill] sm:$0xff]  ;;  %v6438_v45 = vld [vmem:[%s6952_s8] ss:$0 sm:$0xff]  ;;  %v1176_v2 = vmul.f32 %v1172_v55, %v1133_v31 }
 0x572   : > { %v1153_v44 = vsub.f32 %v7464_v25, %v6326_v57  ;;  %v7471_v25 = vld [vmem:[#allocation67_spill] sm:$0xff]  ;;  %v1177_v19 = vmul.f32 %v1172_v55, %v1134_v26  ;;  %v1178_v13 = vmul.f32 %v1172_v55, %v1135_v37  ;;  %v1179_v3 = vmul.f32 %v1172_v55, %v1136_v7 }
 0x573   : > { %v3141_v39 = vrot.slane %v3140_v58, 2  ;;  %v3210_v60 = vadd.f32 %v3209_v15, %v3208_v21  ;;  %v7469_v21 = vld [vmem:[#allocation60_spill] sm:$0xff]  ;;  %v1160_v41 = vsub.f32 %v7471_v25, %v6326_v57  ;;  %v1180_v40 = vmul.f32 %v1172_v55, %v1137_v36 }
 0x574   : > { %v1158_v15 = vsub.f32 %v7469_v21, %v6326_v57  ;;  %v1181_v57 = vmul.f32 %v1172_v55, %v1138_v6  ;;  %v1182_v62 = vmul.f32 %v1172_v55, %v1139_v14  ;;  %v1183_v52 = vmul.f32 %v1172_v55, %v1140_v43 }
 0x575   : > { %v3142_v22 = vadd.f32 %v3141_v39, %v3140_v58  ;;  %v3211_v8 = vrot.slane %v3210_v60, 2  ;;  %v1239_v39 = vmul.f32 %v6438_v45, %v1204_v35  ;;  %v1184_v47 = vmul.f32 %v1172_v55, %v1141_v17 }
 0x576   : > { %v1185_v25 = vmul.f32 %v1172_v55, %v1142_v16  ;;  %v1187_v37 = vmul.f32 %v1172_v55, %v1144_v56  ;;  %v1188_v7 = vmul.f32 %v1172_v55, %v1145_v27  ;;  %v1189_v36 = vmul.f32 %v1172_v55, %v1146_v49 }
 0x577   : > { %v3143_v23 = vrot.slane %v3142_v22, 1  ;;  %v3212_v58 = vadd.f32 %v3211_v8, %v3210_v60  ;;  %v1186_v60 = vmul.f32 %v1172_v55, %v1143_v30  ;;  %v6456_v26 = vadd.f32 %v6450_v11, %v1239_v39 }
 0x578   : > { %v1191_v43 = vmul.f32 %v1172_v55, %v1148_v5  ;;  %v1192_v17 = vmul.f32 %v1172_v55, %v1149_v20  ;;  %v1194_v16 = vmul.f32 %v1172_v55, %v1151_v12  ;;  %v1195_v30 = vmul.f32 %v1172_v55, %v1152_v50 }
 0x579   : > { %v3144_v24 = vadd.f32 %v3143_v23, %v3142_v22  ;;  %v3213_v21 = vrot.slane %v3212_v58, 1  ;;  %7472 = vst [vmem:[#allocation113_spill] sm:$0xff] %v6456_v26  ;;  %v1190_v22 = vmul.f32 %v1172_v55, %v1147_v32  ;;  %v1196_v23 = vmul.f32 %v1172_v55, %v1153_v44 }
 0x57a   : > { %v1198_v56 = vmul.f32 %v1172_v55, %v1155_v46  ;;  %v1199_v27 = vmul.f32 %v1172_v55, %v1156_v48  ;;  %v1200_v49 = vmul.f32 %v1172_v55, %v1157_v9  ;;  %v1201_v32 = vmul.f32 %v1172_v55, %v1158_v15 }
 0x57b   : > { %v6453_v35 = vmul.f32 %v3144_v24, %v7449_v29  ;;  %v3214_v31 = vadd.f32 %v3213_v21, %v3212_v58  ;;  %v1193_v24 = vmul.f32 %v1172_v55, %v1150_v63  ;;  %v1197_v58 = vmul.f32 %v1172_v55, %v1154_v1 }
 0x57c   : > { %v1202_v21 = vmul.f32 %v1172_v55, %v1159_v54  ;;  %v1209_v10 = vmul.f32 %v6438_v45, %v1174_v28  ;;  %v1210_v5 = vmul.f32 %v6438_v45, %v1175_v18  ;;  %v1211_v20 = vmul.f32 %v6438_v45, %v1176_v2 }
 0x57d   : > { %v3215_v8 = vmul.f32 %v3214_v31, %v7449_v29  ;;  %v3216_v6 = vmul.f32 %v6453_v35, %v6453_v35  ;;  %v1203_v29 = vmul.f32 %v1172_v55, %v1160_v41  ;;  %v1208_v31 = vmul.f32 %v6438_v45, %v1173_v38 }
 0x57e   : > { %v1212_v63 = vmul.f32 %v6438_v45, %v1177_v19  ;;  %v1213_v12 = vmul.f32 %v6438_v45, %v1178_v13  ;;  %v1214_v50 = vmul.f32 %v6438_v45, %v1179_v3  ;;  %v1215_v44 = vmul.f32 %v6438_v45, %v1180_v40 }
 0x57f   : > { %v3217_v39 = vsub.f32 %v3215_v8, %v3216_v6  ;;  %v1216_v55 = vmul.f32 %v6438_v45, %v1181_v57  ;;  %v6475_v46 = vmul.f32 %v6438_v45, %v1182_v62  ;;  %v6478_v48 = vmul.f32 %v6438_v45, %v1183_v52 }
 0x580   : > { %v6481_v2 = vmul.f32 %v6438_v45, %v1184_v47  ;;  %v6484_v19 = vmul.f32 %v6438_v45, %v1185_v25  ;;  %v6492_v13 = vmul.f32 %v6438_v45, %v1186_v60  ;;  %v6501_v54 = vmul.f32 %v6438_v45, %v1187_v37 }
 0x581   : > { %v3218_v26 = vmax.f32 %v3217_v39, 0.0  ;;  %7473 = vst [vmem:[#allocation98_spill] sm:$0xff] %v6475_v46  ;;  %v1223_v41 = vmul.f32 %v6438_v45, %v1188_v7  ;;  %v1224_v38 = vmul.f32 %v6438_v45, %v1189_v36  ;;  %v1225_v28 = vmul.f32 %v6438_v45, %v1190_v22 }
 0x582   : > { %7474 = vst [vmem:[#allocation41_spill] sm:$0xff] %v6478_v48  ;;  %v1226_v57 = vmul.f32 %v6438_v45, %v1191_v43  ;;  %v6508_v62 = vmul.f32 %v6438_v45, %v1192_v17  ;;  %v6511_v52 = vmul.f32 %v6438_v45, %v1193_v24  ;;  %v6514_v47 = vmul.f32 %v6438_v45, %v1194_v16 }
 0x583   : > { %v6471_v1 = vadd.f32 1e-05, %v3218_v26  ;;  %7475 = vst [vmem:[#allocation115_spill] sm:$0xff] %v6481_v2  ;;  %v6517_v25 = vmul.f32 %v6438_v45, %v1195_v30  ;;  %v6520_v60 = vmul.f32 %v6438_v45, %v1196_v23  ;;  %v6523_v26 = vmul.f32 %v6438_v45, %v1197_v58 }
 0x584   : > { %7476 = vst [vmem:[#allocation100_spill] sm:$0xff] %v6484_v19  ;;  %v6526_v37 = vmul.f32 %v6438_v45, %v1198_v56  ;;  %v6529_v7 = vmul.f32 %v6438_v45, %v1199_v27  ;;  %v6532_v36 = vmul.f32 %v6438_v45, %v1200_v49  ;;  %v6535_v22 = vmul.f32 %v6438_v45, %v1201_v32  ;;  %v7510_v19 = vld [vmem:[#allocation86_spill] sm:$0xff] }
 0x585   : > { %3743 = vrsqrt.f32 %v6471_v1  ;;  %7477 = vst [vmem:[#allocation117_spill] sm:$0xff] %v6492_v13  ;;  %v6538_v8 = vmul.f32 %v6438_v45, %v1202_v21  ;;  %v6541_v43 = vmul.f32 %v6438_v45, %v1203_v29  ;;  %v6544_v17 = vadd.f32 %v6450_v11, %v1208_v31  ;;  %v7496_v31 = vld [vmem:[#allocation69_spill] sm:$0xff] }
 0x586   : > { %7478 = vst [vmem:[#allocation101_spill] sm:$0xff] %v6501_v54  ;;  %v6547_v24 = vadd.f32 %v6450_v11, %v1209_v10  ;;  %v6550_v16 = vadd.f32 %v6450_v11, %v1210_v5  ;;  %v6553_v30 = vadd.f32 %v6450_v11, %v1211_v20  ;;  %v6556_v23 = vadd.f32 %v6450_v11, %v1212_v63  ;;  %v7497_v20 = vld [vmem:[#allocation88_spill] sm:$0xff]  ;;  %v7508_v54 = vld [vmem:[#allocation81_spill] sm:$0xff] }
 0x587   : > { %7479 = vst [vmem:[#allocation93_spill] sm:$0xff] %v6532_v36  ;;  %v6559_v58 = vadd.f32 %v6450_v11, %v1213_v12  ;;  %v6563_v39 = vadd.f32 %v6450_v11, %v1214_v50  ;;  %v6566_v10 = vadd.f32 %v6450_v11, %v1215_v44  ;;  %v6569_v56 = vadd.f32 %v6450_v11, %v1216_v55  ;;  %v7498_v12 = vld [vmem:[#allocation45_spill] sm:$0xff]  ;;  %v7499_v44 = vld [vmem:[#allocation72_spill] sm:$0xff] }
 0x588   : > { %7480 = vst [vmem:[#allocation44_spill] sm:$0xff] %v6535_v22  ;;  %v6572_v27 = vadd.f32 %v6450_v11, %v1223_v41  ;;  %v6575_v49 = vadd.f32 %v6450_v11, %v1224_v38  ;;  %v6578_v32 = vadd.f32 %v6450_v11, %v1225_v28  ;;  %v6581_v21 = vadd.f32 %v6450_v11, %v1226_v57  ;;  %v7500_v38 = vld [vmem:[#allocation92_spill] sm:$0xff]  ;;  %v7501_v57 = vld [vmem:[#allocation49_spill] sm:$0xff] }
 0x589   : > { %7481 = vst [vmem:[#allocation119_spill] sm:$0xff] %v6538_v8  ;;  %v3219_v5 = vsub.f32 %v7496_v31, %v6453_v35  ;;  %v3220_v63 = vsub.f32 %v7497_v20, %v6453_v35  ;;  %v3221_v50 = vsub.f32 %v7498_v12, %v6453_v35  ;;  %v3222_v55 = vsub.f32 %v7499_v44, %v6453_v35  ;;  %v7503_v31 = vld [vmem:[#allocation96_spill] sm:$0xff]  ;;  %v7504_v20 = vld [vmem:[#allocation78_spill] sm:$0xff]  ;;  %v7505_v12 = vld [vmem:[#allocation99_spill] sm:$0xff] }
 0x58a   : > { %7482 = vst [vmem:[#allocation102_spill] sm:$0xff] %v6541_v43  ;;  %v3223_v28 = vsub.f32 %v7500_v38, %v6453_v35  ;;  %v3224_v15 = vsub.f32 %v7501_v57, %v6453_v35  ;;  %v3226_v18 = vsub.f32 %v7503_v31, %v6453_v35  ;;  %v3227_v3 = vsub.f32 %v7504_v20, %v6453_v35  ;;  %v7507_v38 = vld [vmem:[#allocation112_spill] sm:$0xff]  ;;  %v7509_v13 = vld [vmem:[#allocation109_spill] sm:$0xff] }
 0x58b   : > { %v3744_v6 = vpop.eup %3743  ;;  %7483 = vst [vmem:[#allocation68_spill] sm:$0xff] %v6544_v17  ;;  %v3228_v40 = vsub.f32 %v7505_v12, %v6453_v35  ;;  %v3230_v57 = vsub.f32 %v7507_v38, %v6453_v35  ;;  %v3232_v31 = vsub.f32 %v6105_v33, %v6453_v35  ;;  %v3233_v20 = vsub.f32 %v6117_v34, %v6453_v35  ;;  %v6625_v33 = vld [vmem:[%s6949_s5] ss:$0 sm:$0xff]  ;;  %v7512_v34 = vld [vmem:[#allocation110_spill] sm:$0xff] }
 0x58c   : > { %7484 = vst [vmem:[#allocation103_spill] sm:$0xff] %v6547_v24  ;;  %v3253_v45 = vmul.f32 %v3744_v6, %v6471_v1  ;;  %vm3259_vm9 = vweird.f32 %v3744_v6  ;;  %v3234_v12 = vsub.f32 %v7509_v13, %v6453_v35  ;;  %vm3258_vm10 = vweird.f32 %v6471_v1  ;;  %v7514_v1 = vld [vmem:[#allocation116_spill] sm:$0xff] }
 0x58d   : > { %7485 = vst [vmem:[#allocation97_spill] sm:$0xff] %v6550_v16  ;;  %v3236_v38 = vsub.f32 %v6150_v51, %v6453_v35  ;;  %vm3260_vm11 = vmor %vm3258_vm10, %vm3259_vm9  ;;  %v3238_v13 = vsub.f32 %v7512_v34, %v6453_v35  ;;  %v7515_v51 = vld [vmem:[#allocation85_spill] sm:$0xff]  ;;  %v6644_v34 = vld [vmem:[%s6950_s6] ss:$0 sm:$0xff] }
 0x58e   : > { %7486 = vst [vmem:[#allocation38_spill] sm:$0xff] %v6553_v30  ;;  %v3254_v29 = vmul.f32 %v3744_v6, %v3253_v45  ;;  %v7502_v45 = vld [vmem:[#allocation75_spill] sm:$0xff]  ;;  %v3241_v48 = vsub.f32 %v7515_v51, %v6453_v35 }
 0x58f   : > { %7487 = vst [vmem:[#allocation104_spill] sm:$0xff] %v6556_v23  ;;  %v3225_v9 = vsub.f32 %v7502_v45, %v6453_v35  ;;  %v3231_v45 = vsub.f32 %v7508_v54, %v6453_v35  ;;  %v7511_v54 = vld [vmem:[#allocation114_spill] sm:$0xff] }
 0x590   : > { %7488 = vst [vmem:[#allocation70_spill] sm:$0xff] %v6559_v58  ;;  %v3255_v41 = vmul.f32 0.5, %v3254_v29  ;;  %v7506_v29 = vld [vmem:[#allocation82_spill] sm:$0xff]  ;;  %v3237_v2 = vsub.f32 %v7511_v54, %v6453_v35  ;;  %v7516_v54 = vld [vmem:[#allocation111_spill] sm:$0xff] }
 0x591   : > { %7489 = vst [vmem:[#allocation105_spill] sm:$0xff] %v6563_v39  ;;  %v3229_v44 = vsub.f32 %v7506_v29, %v6453_v35  ;;  %v3235_v29 = vsub.f32 %v7510_v19, %v6453_v35  ;;  %v7513_v19 = vld [vmem:[#allocation90_spill] sm:$0xff]  ;;  %v3242_v46 = vsub.f32 %v7516_v54, %v6453_v35 }
 0x592   : > { %7490 = vst [vmem:[#allocation51_spill] sm:$0xff] %v6566_v10  ;;  %v3256_v14 = vsub.f32 1.5, %v3255_v41 }
 0x593   : > { %7491 = vst [vmem:[#allocation89_spill] sm:$0xff] %v6569_v56  ;;  %v3240_v56 = vsub.f32 %v7514_v1, %v6453_v35 }
 0x594   : > { %7492 = vst [vmem:[#allocation106_spill] sm:$0xff] %v6572_v27  ;;  %v3257_v41 = vmul.f32 %v3744_v6, %v3256_v14  ;;  %v3239_v14 = vsub.f32 %v7513_v19, %v6453_v35  ;;  %v7519_v19 = vsub.f32 %v6380_v53, %v6453_v35 }
 0x595   : > { %7493 = vst [vmem:[#allocation73_spill] sm:$0xff] %v6575_v49  ;;  %v7518_v49 = vld [vmem:[#allocation118_spill] sm:$0xff] }
 0x596   : > { %7494 = vst [vmem:[#allocation107_spill] sm:$0xff] %v6578_v32  ;;  %v3261_v10 = vsel %vm3260_vm11, %v3744_v6, %v3257_v41  ;;  %v3244_v27 = vsub.f32 %v7518_v49, %v6453_v35 }
 0x597   : > { %7495 = vst [vmem:[#allocation76_spill] sm:$0xff] %v6581_v21  ;;  %v7517_v21 = vld [vmem:[#allocation94_spill] sm:$0xff]  ;;  %v3293_v1 = vmul.f32 %v3261_v10, %v7519_v19  ;;  %v3262_v51 = vmul.f32 %v3261_v10, %v3219_v5  ;;  %v3263_v6 = vmul.f32 %v3261_v10, %v3220_v63  ;;  %v3264_v41 = vmul.f32 %v3261_v10, %v3221_v50 }
 0x598   : > { %v3243_v32 = vsub.f32 %v7517_v21, %v6453_v35  ;;  %v3265_v39 = vmul.f32 %v3261_v10, %v3222_v55  ;;  %v3266_v54 = vmul.f32 %v3261_v10, %v3223_v28  ;;  %v3267_v58 = vmul.f32 %v3261_v10, %v3224_v15  ;;  %v7520_v15 = vld [vmem:[#allocation113_spill] sm:$0xff] }
 0x599   : > { %v3268_v23 = vmul.f32 %v3261_v10, %v3225_v9  ;;  %v3328_v21 = vmul.f32 %v6625_v33, %v3293_v1  ;;  %v3269_v30 = vmul.f32 %v3261_v10, %v3226_v18  ;;  %v3270_v49 = vmul.f32 %v3261_v10, %v3227_v3 }
 0x59a   : > { %v3271_v16 = vmul.f32 %v3261_v10, %v3228_v40  ;;  %v3272_v24 = vmul.f32 %v3261_v10, %v3229_v44  ;;  %v3273_v17 = vmul.f32 %v3261_v10, %v3230_v57  ;;  %v3274_v43 = vmul.f32 %v3261_v10, %v3231_v45 }
 0x59b   : > { %v3275_v8 = vmul.f32 %v3261_v10, %v3232_v31  ;;  %v3363_v22 = vadd.f32 %v6644_v34, %v3328_v21  ;;  %v3276_v53 = vmul.f32 %v3261_v10, %v3233_v20  ;;  %v3277_v19 = vmul.f32 %v3261_v10, %v3234_v12 }
 0x59c   : > { %v3278_v5 = vmul.f32 %v3261_v10, %v3235_v29  ;;  %v3279_v63 = vmul.f32 %v3261_v10, %v3236_v38  ;;  %v3280_v50 = vmul.f32 %v3261_v10, %v3237_v2  ;;  %v3281_v55 = vmul.f32 %v3261_v10, %v3238_v13 }
 0x59d   : > { %v3282_v28 = vmul.f32 %v3261_v10, %v3239_v14  ;;  %v3395_v9 = vadd.f32 %v3363_v22, %v7520_v15  ;;  %v3283_v36 = vmul.f32 %v3261_v10, %v3240_v56  ;;  %v3284_v1 = vmul.f32 %v3261_v10, %v3241_v48 }
 0x59e   : > { %v3285_v18 = vmul.f32 %v3261_v10, %v3242_v46  ;;  %v3286_v3 = vmul.f32 %v3261_v10, %v3243_v32  ;;  %v3287_v40 = vmul.f32 %v3261_v10, %v3244_v27  ;;  %v7521_v44 = vsub.f32 %v6336_v61, %v6453_v35  ;;  %v7529_v27 = vld [vmem:[#allocation102_spill] sm:$0xff] }
 0x59f   : > { %v7522_v45 = vsub.f32 %v6349_v0, %v6453_v35  ;;  %v3427_v20 = vmax.f32 %v3395_v9, 0.0  ;;  %v7523_v2 = vsub.f32 %v6355_v59, %v6453_v35  ;;  %v7524_v48 = vsub.f32 %v6361_v42, %v6453_v35 }
 0x5a0   : > { %v3288_v57 = vmul.f32 %v3261_v10, %v7521_v44  ;;  %v7525_v22 = vsub.f32 %v6367_v4, %v6453_v35  ;;  %v6669_v61 = vadd.f32 %v6450_v11, %v6508_v62  ;;  %v6673_v0 = vadd.f32 %v6450_v11, %v6511_v52 }
 0x5a1   : > { %v3289_v31 = vmul.f32 %v3261_v10, %v7522_v45  ;;  %v3290_v12 = vmul.f32 %v3261_v10, %v7523_v2  ;;  %v3291_v46 = vmul.f32 %v3261_v10, %v7524_v48  ;;  %v6677_v59 = vadd.f32 %v6450_v11, %v6514_v47  ;;  %3459 = vst [vmem:[%s6701_s4 + $0xf8] sm:$0xff] %v3427_v20  ;;  %v7526_v47 = vld [vmem:[#allocation93_spill] sm:$0xff] }
 0x5a2   : > { %v3292_v56 = vmul.f32 %v3261_v10, %v7525_v22  ;;  %v6681_v42 = vadd.f32 %v6450_v11, %v6517_v25  ;;  %v6685_v4 = vadd.f32 %v6450_v11, %v6520_v60  ;;  %v6689_v35 = vadd.f32 %v6450_v11, %v6523_v26  ;;  %v7527_v60 = vld [vmem:[#allocation44_spill] sm:$0xff]  ;;  %v7528_v10 = vld [vmem:[#allocation119_spill] sm:$0xff] }
 0x5a3   : > { %v6693_v62 = vadd.f32 %v6450_v11, %v6526_v37  ;;  %v6697_v52 = vadd.f32 %v6450_v11, %v6529_v7  ;;  %v6706_v25 = vadd.f32 %v6450_v11, %v7526_v47  ;;  %v6710_v26 = vadd.f32 %v6450_v11, %v7527_v60 }
 0x5a4   : > { %v6714_v37 = vadd.f32 %v6450_v11, %v7528_v10  ;;  %v6718_v7 = vadd.f32 %v6450_v11, %v7529_v27  ;;  %v3297_v32 = vmul.f32 %v6625_v33, %v3262_v51  ;;  %v3298_v29 = vmul.f32 %v6625_v33, %v3263_v6 }
 0x5a5   : > { %v3299_v38 = vmul.f32 %v6625_v33, %v3264_v41  ;;  %v3300_v13 = vmul.f32 %v6625_v33, %v3265_v39  ;;  %v3301_v14 = vmul.f32 %v6625_v33, %v3266_v54  ;;  %v3302_v21 = vmul.f32 %v6625_v33, %v3267_v58 }
 0x5a6   : > { %v3303_v15 = vmul.f32 %v6625_v33, %v3268_v23  ;;  %v3304_v9 = vmul.f32 %v6625_v33, %v3269_v30  ;;  %v3305_v44 = vmul.f32 %v6625_v33, %v3270_v49  ;;  %v3306_v45 = vmul.f32 %v6625_v33, %v3271_v16 }
 0x5a7   : > { %v3307_v51 = vmul.f32 %v6625_v33, %v3272_v24  ;;  %v6732_v6 = vmul.f32 %v6625_v33, %v3273_v17  ;;  %v6735_v41 = vmul.f32 %v6625_v33, %v3274_v43  ;;  %v6738_v39 = vmul.f32 %v6625_v33, %v3275_v8 }
 0x5a8   : > { %v6741_v58 = vmul.f32 %v6625_v33, %v3276_v53  ;;  %v3312_v30 = vmul.f32 %v6625_v33, %v3277_v19  ;;  %v3313_v23 = vmul.f32 %v6625_v33, %v3278_v5  ;;  %v3314_v16 = vmul.f32 %v6625_v33, %v3279_v63 }
 0x5a9   : > { %v3315_v24 = vmul.f32 %v6625_v33, %v3280_v50  ;;  %v3316_v17 = vmul.f32 %v6625_v33, %v3281_v55  ;;  %v3317_v54 = vmul.f32 %v6625_v33, %v3282_v28  ;;  %v3318_v43 = vmul.f32 %v6625_v33, %v3283_v36 }
 0x5aa   : > { %v3319_v8 = vmul.f32 %v6625_v33, %v3284_v1  ;;  %v3320_v49 = vmul.f32 %v6625_v33, %v3285_v18  ;;  %v3321_v53 = vmul.f32 %v6625_v33, %v3286_v3  ;;  %v3322_v19 = vmul.f32 %v6625_v33, %v3287_v40 }
 0x5ab   : > { %v3323_v5 = vmul.f32 %v6625_v33, %v3288_v57  ;;  %v3324_v63 = vmul.f32 %v6625_v33, %v3289_v31  ;;  %v3325_v50 = vmul.f32 %v6625_v33, %v3290_v12  ;;  %v3326_v55 = vmul.f32 %v6625_v33, %v3291_v46 }
 0x5ac   : > { %v3327_v28 = vmul.f32 %v6625_v33, %v3292_v56  ;;  %v3332_v36 = vadd.f32 %v6644_v34, %v3297_v32  ;;  %v3333_v1 = vadd.f32 %v6644_v34, %v3298_v29  ;;  %v3334_v18 = vadd.f32 %v6644_v34, %v3299_v38 }
 0x5ad   : > { %v3335_v3 = vadd.f32 %v6644_v34, %v3300_v13  ;;  %v3336_v40 = vadd.f32 %v6644_v34, %v3301_v14  ;;  %v3337_v57 = vadd.f32 %v6644_v34, %v3302_v21  ;;  %v3338_v31 = vadd.f32 %v6644_v34, %v3303_v15 }
 0x5ae   : > { %v3339_v20 = vadd.f32 %v6644_v34, %v3304_v9  ;;  %v3340_v2 = vadd.f32 %v6644_v34, %v3305_v44  ;;  %v3341_v33 = vadd.f32 %v6644_v34, %v3306_v45  ;;  %v3342_v12 = vadd.f32 %v6644_v34, %v3307_v51  ;;  %v7530_v44 = vld [vmem:[#allocation68_spill] sm:$0xff]  ;;  %v7531_v51 = vld [vmem:[#allocation103_spill] sm:$0xff] }
 0x5af   : > { %v3347_v48 = vadd.f32 %v6644_v34, %v3312_v30  ;;  %v3348_v46 = vadd.f32 %v6644_v34, %v3313_v23  ;;  %v3349_v22 = vadd.f32 %v6644_v34, %v3314_v16  ;;  %v3350_v56 = vadd.f32 %v6644_v34, %v3315_v24  ;;  %v7532_v23 = vld [vmem:[#allocation97_spill] sm:$0xff]  ;;  %v7533_v24 = vld [vmem:[#allocation38_spill] sm:$0xff] }
 0x5b0   : > { %v3351_v47 = vadd.f32 %v6644_v34, %v3316_v17  ;;  %v3352_v60 = vadd.f32 %v6644_v34, %v3317_v54  ;;  %v3353_v10 = vadd.f32 %v6644_v34, %v3318_v43  ;;  %v3354_v27 = vadd.f32 %v6644_v34, %v3319_v8  ;;  %v7534_v54 = vld [vmem:[#allocation104_spill] sm:$0xff]  ;;  %v7535_v8 = vld [vmem:[#allocation70_spill] sm:$0xff] }
 0x5b1   : > { %v3355_v32 = vadd.f32 %v6644_v34, %v3320_v49  ;;  %v3356_v29 = vadd.f32 %v6644_v34, %v3321_v53  ;;  %v3357_v38 = vadd.f32 %v6644_v34, %v3322_v19  ;;  %v3358_v13 = vadd.f32 %v6644_v34, %v3323_v5  ;;  %v7536_v53 = vld [vmem:[#allocation105_spill] sm:$0xff]  ;;  %v7537_v5 = vld [vmem:[#allocation106_spill] sm:$0xff] }
 0x5b2   : > { %v3359_v14 = vadd.f32 %v6644_v34, %v3324_v63  ;;  %v3360_v21 = vadd.f32 %v6644_v34, %v3325_v50  ;;  %v3361_v15 = vadd.f32 %v6644_v34, %v3326_v55  ;;  %v3362_v9 = vadd.f32 %v6644_v34, %v3327_v28  ;;  %v7538_v50 = vld [vmem:[#allocation73_spill] sm:$0xff]  ;;  %v7539_v28 = vld [vmem:[#allocation107_spill] sm:$0xff] }
 0x5b3   : > { %v3364_v45 = vadd.f32 %v3332_v36, %v7530_v44  ;;  %v3365_v30 = vadd.f32 %v3333_v1, %v7531_v51  ;;  %v3366_v16 = vadd.f32 %v3334_v18, %v7532_v23  ;;  %v3367_v17 = vadd.f32 %v3335_v3, %v7533_v24  ;;  %v7540_v1 = vld [vmem:[#allocation76_spill] sm:$0xff] }
 0x5b4   : > { %v3368_v43 = vadd.f32 %v3336_v40, %v7534_v54  ;;  %v3369_v49 = vadd.f32 %v3337_v57, %v7535_v8  ;;  %v3370_v19 = vadd.f32 %v3338_v31, %v7536_v53  ;;  %v6794_v63 = vadd.f32 %v3347_v48, %v7537_v5 }
 0x5b5   : > { %v6797_v55 = vadd.f32 %v3348_v46, %v7538_v50  ;;  %v6800_v36 = vadd.f32 %v3349_v22, %v7539_v28  ;;  %v6803_v44 = vadd.f32 %v3350_v56, %v7540_v1  ;;  %v6806_v18 = vadd.f32 %v3351_v47, %v6669_v61  ;;  %v7541_v56 = vld [vmem:[#allocation98_spill] sm:$0xff]  ;;  %v7542_v47 = vld [vmem:[#allocation51_spill] sm:$0xff] }
 0x5b6   : > { %v6809_v3 = vadd.f32 %v3352_v60, %v6673_v0  ;;  %v6812_v40 = vadd.f32 %v3353_v10, %v6677_v59  ;;  %v6815_v57 = vadd.f32 %v3354_v27, %v6681_v42  ;;  %v6818_v31 = vadd.f32 %v3355_v32, %v6685_v4  ;;  %v7543_v10 = vld [vmem:[#allocation41_spill] sm:$0xff] }
 0x5b7   : > { %v6821_v48 = vadd.f32 %v3356_v29, %v6689_v35  ;;  %v6824_v46 = vadd.f32 %v3357_v38, %v6693_v62  ;;  %v6827_v61 = vadd.f32 %v3358_v13, %v6697_v52  ;;  %v6830_v0 = vadd.f32 %v3359_v14, %v6706_v25  ;;  %v7544_v27 = vld [vmem:[#allocation89_spill] sm:$0xff]  ;;  %v7545_v38 = vld [vmem:[#allocation115_spill] sm:$0xff] }
 0x5b8   : > { %v6833_v59 = vadd.f32 %v3360_v21, %v6710_v26  ;;  %v6836_v42 = vadd.f32 %v3361_v15, %v6714_v37  ;;  %v6839_v4 = vadd.f32 %v3362_v9, %v6718_v7  ;;  %v3396_v35 = vmax.f32 %v3364_v45, 0.0  ;;  %v7546_v21 = vld [vmem:[#allocation100_spill] sm:$0xff]  ;;  %v7547_v45 = vld [vmem:[#allocation117_spill] sm:$0xff] }
 0x5b9   : > { %v3397_v62 = vmax.f32 %v3365_v30, 0.0  ;;  %v3398_v22 = vmax.f32 %v3366_v16, 0.0  ;;  %v1252_v52 = vadd.f32 %v6450_v11, %v7541_v56  ;;  %v3343_v25 = vadd.f32 %v6644_v34, %v6732_v6  ;;  %v7548_v30 = vld [vmem:[#allocation101_spill] sm:$0xff] }
 0x5ba   : > { %v3371_v60 = vadd.f32 %v3339_v20, %v7542_v47  ;;  %v3399_v26 = vmax.f32 %v3367_v17, 0.0  ;;  %v1253_v37 = vadd.f32 %v6450_v11, %v7543_v10  ;;  %v3344_v7 = vadd.f32 %v6644_v34, %v6735_v41  ;;  %3428 = vst [vmem:[%s6701_s4] sm:$0xff] %v3396_v35 }
 0x5bb   : > { %v3372_v32 = vadd.f32 %v3340_v2, %v7544_v27  ;;  %v3400_v29 = vmax.f32 %v3368_v43, 0.0  ;;  %v1254_v13 = vadd.f32 %v6450_v11, %v7545_v38  ;;  %v3345_v6 = vadd.f32 %v6644_v34, %v6738_v39  ;;  %3429 = vst [vmem:[%s6701_s4 + $0x8] sm:$0xff] %v3397_v62 }
 0x5bc   : > { %v3373_v20 = vadd.f32 %v3341_v33, %v1252_v52  ;;  %v3401_v14 = vmax.f32 %v3369_v49, 0.0  ;;  %v1255_v15 = vadd.f32 %v6450_v11, %v7546_v21  ;;  %v3346_v41 = vadd.f32 %v6644_v34, %v6741_v58  ;;  %3430 = vst [vmem:[%s6701_s4 + $0x10] sm:$0xff] %v3398_v22 }
 0x5bd   : > { %v3374_v2 = vadd.f32 %v3342_v12, %v1253_v37  ;;  %v3402_v9 = vmax.f32 %v3370_v19, 0.0  ;;  %v1256_v51 = vadd.f32 %v6450_v11, %v7547_v45  ;;  %v3375_v39 = vadd.f32 %v3343_v25, %v1254_v13  ;;  %3431 = vst [vmem:[%s6701_s4 + $0x18] sm:$0xff] %v3399_v26 }
 0x5be   : > { %v3403_v33 = vmax.f32 %v3371_v60, 0.0  ;;  %v1257_v23 = vadd.f32 %v6450_v11, %v7548_v30  ;;  %v3376_v16 = vadd.f32 %v3344_v7, %v1255_v15  ;;  %v3404_v24 = vmax.f32 %v3372_v32, 0.0  ;;  %3432 = vst [vmem:[%s6701_s4 + $0x20] sm:$0xff] %v3400_v29 }
 0x5bf   : > { %v3377_v34 = vadd.f32 %v3345_v6, %v1256_v51  ;;  %v3405_v58 = vmax.f32 %v3373_v20, 0.0  ;;  %3433 = vst [vmem:[%s6701_s4 + $0x28] sm:$0xff] %v3401_v14  ;;  %v3406_v17 = vmax.f32 %v3374_v2, 0.0  ;;  %v3407_v54 = vmax.f32 %v3375_v39, 0.0 }
 0x5c0   : > { %v3378_v12 = vadd.f32 %v3346_v41, %v1257_v23  ;;  %3434 = vst [vmem:[%s6701_s4 + $0x30] sm:$0xff] %v3402_v9  ;;  %v3408_v43 = vmax.f32 %v3376_v16, 0.0  ;;  %v3411_v49 = vmax.f32 %v6794_v63, 0.0  ;;  %v3412_v53 = vmax.f32 %v6797_v55, 0.0 }
 0x5c1   : > { %3435 = vst [vmem:[%s6701_s4 + $0x38] sm:$0xff] %v3403_v33  ;;  %v3409_v11 = vmax.f32 %v3377_v34, 0.0  ;;  %v3413_v19 = vmax.f32 %v6800_v36, 0.0  ;;  %v3414_v5 = vmax.f32 %v6803_v44, 0.0  ;;  %v3415_v50 = vmax.f32 %v6806_v18, 0.0 }
 0x5c2   : > { %3436 = vst [vmem:[%s6701_s4 + $0x40] sm:$0xff] %v3404_v24  ;;  %v3410_v8 = vmax.f32 %v3378_v12, 0.0  ;;  %v3416_v63 = vmax.f32 %v6809_v3, 0.0  ;;  %v3417_v55 = vmax.f32 %v6812_v40, 0.0  ;;  %v3418_v28 = vmax.f32 %v6815_v57, 0.0 }
 0x5c3   : > { %3437 = vst [vmem:[%s6701_s4 + $0x48] sm:$0xff] %v3405_v58  ;;  %v3419_v36 = vmax.f32 %v6818_v31, 0.0  ;;  %v3420_v1 = vmax.f32 %v6821_v48, 0.0  ;;  %v3421_v44 = vmax.f32 %v6824_v46, 0.0  ;;  %v3422_v18 = vmax.f32 %v6827_v61, 0.0 }
 0x5c4   : > { %3438 = vst [vmem:[%s6701_s4 + $0x50] sm:$0xff] %v3406_v17  ;;  %v3423_v3 = vmax.f32 %v6830_v0, 0.0  ;;  %v3424_v40 = vmax.f32 %v6833_v59, 0.0  ;;  %v3425_v57 = vmax.f32 %v6836_v42, 0.0  ;;  %v3426_v31 = vmax.f32 %v6839_v4, 0.0 }
 0x5c5   : > { %3439 = vst [vmem:[%s6701_s4 + $0x58] sm:$0xff] %v3407_v54 }
 0x5c6   : > { %3440 = vst [vmem:[%s6701_s4 + $0x60] sm:$0xff] %v3408_v43 }
 0x5c7   : > { %3441 = vst [vmem:[%s6701_s4 + $0x68] sm:$0xff] %v3409_v11 }
 0x5c8   : > { %3442 = vst [vmem:[%s6701_s4 + $0x70] sm:$0xff] %v3410_v8 }
 0x5c9   : > { %3443 = vst [vmem:[%s6701_s4 + $0x78] sm:$0xff] %v3411_v49 }
 0x5ca   : > { %3444 = vst [vmem:[%s6701_s4 + $0x80] sm:$0xff] %v3412_v53 }
 0x5cb   : > { %3445 = vst [vmem:[%s6701_s4 + $0x88] sm:$0xff] %v3413_v19 }
 0x5cc   : > { %3446 = vst [vmem:[%s6701_s4 + $0x90] sm:$0xff] %v3414_v5 }
 0x5cd   : > { %3447 = vst [vmem:[%s6701_s4 + $0x98] sm:$0xff] %v3415_v50 }
 0x5ce   : > { %3448 = vst [vmem:[%s6701_s4 + $0xa0] sm:$0xff] %v3416_v63 }
 0x5cf   : > { %3449 = vst [vmem:[%s6701_s4 + $0xa8] sm:$0xff] %v3417_v55 }
 0x5d0   : > { %3450 = vst [vmem:[%s6701_s4 + $0xb0] sm:$0xff] %v3418_v28 }
 0x5d1   : > { %3451 = vst [vmem:[%s6701_s4 + $0xb8] sm:$0xff] %v3419_v36 }
 0x5d2   : > { %3452 = vst [vmem:[%s6701_s4 + $0xc0] sm:$0xff] %v3420_v1 }
 0x5d3   : > { %3453 = vst [vmem:[%s6701_s4 + $0xc8] sm:$0xff] %v3421_v44 }
 0x5d4   : > { %3454 = vst [vmem:[%s6701_s4 + $0xd0] sm:$0xff] %v3422_v18 }
 0x5d5   : > { %3455 = vst [vmem:[%s6701_s4 + $0xd8] sm:$0xff] %v3423_v3 }
 0x5d6   : > { %3456 = vst [vmem:[%s6701_s4 + $0xe0] sm:$0xff] %v3424_v40 }
 0x5d7   : > { %3457 = vst [vmem:[%s6701_s4 + $0xe8] sm:$0xff] %v3425_v57 }
 0x5d8   : > { %3458 = vst [vmem:[%s6701_s4 + $0xf0] sm:$0xff] %v3426_v31 }
 0x5d9   : > { %3919 = shalt.err (!%p3916_p10)
}
 0x5da   : > { %s3975_s1 = smov 128   ;;  %s3976_s4 = smov 8  }
 0x5db   : > { %3662 = dma.vmem_to_hbm [thread:$0]  (%p4123_p3), %s3474_s17, 4096, %s3476_s12, %s3461_s26, %s3975_s1, %s3975_s1, %s3976_s4  }
 0x5dc PF: > { %s3490_s7 = sand.u32 1, %s3954_s13   ;;  %p7549_p12 = scmp.ge.s32.totalorder %s3966_s16, 2 }
 0x5dd   : > { %s3491_s19 = scalar_lea.sflag [#allocation5], %s3490_s7 }
 0x5de   : > { %p3679_p13 = pnand %p7549_p12, %p4067_p6 }
 0x5e0   : > { %p3680_p0 = pneg %p3679_p13 }
 0x5e2   : > { %3949 = dma.done.wait (%p3680_p0), %s3491_s19, 4096  }
 0x5e3   : > { %3951 = vsyncadd (%p3680_p0), %s3491_s19, 4294963200  ;;  %s7550_s24 = sld [smem:[#allocation16_spill]]  ;;  %p25_p5 = scmp.ge.s32.totalorder %s4105_s29, 4  }
 0x5e4   : > { %s7551_s13 = smov %s3958_s14  ;;  %s7552_s14 = smov %s3962_s15 }
 0x5e5   : > { %s7554_s16 = smov %s4105_s29  ;;  %27 = sbr.rel (!%p25_p5) target bundleno = 11 (0xb), region = 127 }
 0x5e9   : > { %s7553_s15 = smov %s7550_s24 }
 0x5ea   :  { %3497 = vsyncpa [#allocation4], 1 }
 0x5eb   :  { %3499 = vsyncpa [#allocation4 + $0x1], 1 }
 0x5ec   :  { %3500 = vsyncpa [#allocation7], 1 }
 0x5ed   :  { %3501 = vsyncpa [#allocation10], 1 }
 0x5ee   :  { %3502 = vsyncpa [#allocation5], 1 }
 0x5ef   :  { %3504 = vsyncpa [#allocation5 + $0x1], 1 }

</bundles_post_ra>
